<compile_context>
chip_gen: v6e
topology: v6e:2x2x1
jax: 0.10.0
libtpu: 0.0.40
codegen_flags: <defaults>
</compile_context>

<pallas_src>
import numpy as np

import jax
import jax.numpy as jnp
from jax import lax
from jax.experimental import pallas as pl
from jax.experimental.pallas import tpu as pltpu

BN_EPS = 1e-5   # PyTorch BatchNorm2d default
_H = 28         # input spatial size implied by the reference model


# ------------------------------ fused kernel -------------------------------

def _fused_kernel(x_ref,
                  b1_ref, r1_ref, b2_ref, r2_ref, b3_ref, r3_ref,
                  b4_ref, r4_ref, b5_ref, r5_ref, b6_ref, r6_ref,
                  b7_ref, r7_ref, b8_ref,
                  o_ref,
                  a1, a2, a3, a4, a5, a6, a7):
    """Whole network for one batch of images; activations stay in VMEM."""
    f32 = jnp.float32

    def dotf(a, w):
        return jnp.dot(a, w, preferred_element_type=f32)

    def conv_bn_relu(src, dst, band_ref, bias_ref, n_out):
        # src[h] is a (B, P_in) slab; one output row = sum over KH row taps of
        # a (B, P_in) @ (P_in, P_out) matmul (BN scale folded into the band,
        # BN bias as a (1, P_out) row), then ReLU.
        kh = band_ref.shape[0]
        bias = bias_ref[...]

        def body(h, carry):
            acc = dotf(src[h], band_ref[0])
            for di in range(1, kh):
                acc = acc + dotf(src[h + di], band_ref[di])
            dst[h] = jnp.maximum(acc + bias, 0.0)
            return carry

        lax.fori_loop(0, n_out, body, 0)

    conv_bn_relu(x_ref, a1, b1_ref, r1_ref, 26)   # convblock1: 26 x (B, 128)
    conv_bn_relu(a1, a2, b2_ref, r2_ref, 24)      # convblock2: 24 x (B, 256)
    conv_bn_relu(a2, a3, b3_ref, r3_ref, 22)      # convblock3: 22 x (B, 384)

    # MaxPool2d(2,2) fused with convblock4 (1x1 conv 16->4 + BN + ReLU).
    # Row-pair max is elementwise; width-pair max via a 16-lane-shifted slice;
    # the even-block compaction is folded into the (336, 128) B4 weight.
    w4 = b4_ref[...]
    bias4 = r4_ref[...]

    def pool_body(r, carry):
        m = jnp.maximum(a3[2 * r], a3[2 * r + 1])        # (B, 384)
        mp = jnp.maximum(m[:, 0:336], m[:, 16:352])      # (B, 336), valid at even 16-blocks
        a4[r] = jnp.maximum(dotf(mp, w4) + bias4, 0.0)   # (B, 128)
        return carry

    lax.fori_loop(0, 11, pool_body, 0)

    conv_bn_relu(a4, a5, b5_ref, r5_ref, 9)       # convblock5: 9 x (B, 128)
    conv_bn_relu(a5, a6, b6_ref, r6_ref, 7)       # convblock6: 7 x (B, 128)

    # convblock7: 1x1 conv 16->10 + BN + ReLU (block-diagonal matmul).
    w7 = b7_ref[...]
    bias7 = r7_ref[...]

    def c7_body(h, carry):
        a7[h] = jnp.maximum(dotf(a6[h], w7) + bias7, 0.0)
        return carry

    lax.fori_loop(0, 7, c7_body, 0)

    # convblock8: 7x7 conv 10->10 (no BN / ReLU), spatial 7x7 -> 1x1.
    logits = dotf(a7[0], b8_ref[0])
    for di in range(1, 7):
        logits = logits + dotf(a7[di], b8_ref[di])        # (B, 10)

    # log_softmax (max-stabilized)
    mx = jnp.max(logits, axis=-1, keepdims=True)
    z = logits - mx
    lse = jnp.log(jnp.sum(jnp.exp(z), axis=-1, keepdims=True))
    o_ref[...] = (z - lse).astype(o_ref.dtype)


# ------------------------ weight preparation (once) -------------------------

def prepare_params(params):
    """Fold BN into banded conv weights laid out for the batch-major kernel."""

    def fold(gamma, beta, mean, var):
        scale = np.asarray(gamma) / np.sqrt(np.asarray(var) + BN_EPS)
        return scale, np.asarray(beta) - np.asarray(mean) * scale

    def band(w, scale, w_in, p_in, p_out):
        # (kh, p_in, p_out): per row-tap banded matrix; input lane = w*Cin+ci,
        # output lane = q*Cout+co (lane dims zero-padded to 128 multiples).
        w = np.asarray(w)
        kh, kw, cin, cout = w.shape
        w_out = w_in - kw + 1
        ws = w * scale[None, None, None, :]
        b = np.zeros((kh, p_in, p_out), np.float32)
        for di in range(kh):
            for dj in range(kw):
                for q in range(w_out):
                    b[di, (q + dj) * cin:(q + dj + 1) * cin,
                      q * cout:(q + 1) * cout] = ws[di, dj]
        return b

    def bias_row(bias, w_out, cout, p_out):
        r = np.zeros((1, p_out), np.float32)
        for q in range(w_out):
            r[0, q * cout:(q + 1) * cout] = bias
        return r

    prep = {}
    #             w_in, cin, cout, p_in, p_out
    geom = {"1": (28, 1, 4, 28, 128),
            "2": (26, 4, 8, 128, 256),
            "3": (24, 8, 16, 256, 384),
            "5": (11, 4, 8, 128, 128),
            "6": (9, 8, 16, 128, 128)}
    for k, (w_in, cin, cout, p_in, p_out) in geom.items():
        w, gamma, beta, mean, var = params["c" + k]
        scale, bias = fold(gamma, beta, mean, var)
        prep["B" + k] = jnp.asarray(band(w, scale, w_in, p_in, p_out))
        prep["r" + k] = jnp.asarray(bias_row(bias, w_in - 2, cout, p_out))

    # convblock4: 1x1 conv 16->4 + BN + ReLU, with the maxpool even-block
    # compaction folded in (input = un-compacted 336-lane pooled slab).
    w, gamma, beta, mean, var = params["c4"]
    scale, bias = fold(gamma, beta, mean, var)
    ws = np.asarray(w)[0, 0] * scale[None, :]                 # (16, 4)
    b4 = np.zeros((336, 128), np.float32)
    for q in range(11):
        b4[(2 * q) * 16:(2 * q + 1) * 16, q * 4:(q + 1) * 4] = ws
    prep["B4"] = jnp.asarray(b4)
    prep["r4"] = jnp.asarray(bias_row(bias, 11, 4, 128))

    # convblock7: 1x1 conv 16->10 + BN + ReLU over width 7 (block diagonal).
    w, gamma, beta, mean, var = params["c7"]
    scale, bias = fold(gamma, beta, mean, var)
    ws = np.asarray(w)[0, 0] * scale[None, :]                 # (16, 10)
    b7 = np.zeros((128, 128), np.float32)
    for q in range(7):
        b7[q * 16:(q + 1) * 16, q * 10:(q + 1) * 10] = ws
    prep["B7"] = jnp.asarray(b7)
    prep["r7"] = jnp.asarray(bias_row(bias, 7, 10, 128))

    # convblock8: 7x7 conv 10->10, no BN, no bias.
    w8 = np.asarray(params["c8"])                             # (7, 7, 10, 10)
    b8 = np.zeros((7, 128, 10), np.float32)
    for di in range(7):
        for q in range(7):
            b8[di, q * 10:(q + 1) * 10, :] = w8[di, q]
    prep["B8"] = jnp.asarray(b8)
    return prep


# --------------------------------- forward ----------------------------------

def _round_up(a, m):
    return (a + m - 1) // m * m


def forward(prep, x_nchw):
    n = x_nchw.shape[0]
    # Cin == 1 -> NCHW to (N, H, W) is a pure reshape; then put the batch on
    # the sublane axis: (H, N, W).
    x = x_nchw.reshape(n, _H, _H).astype(jnp.float32)
    x = jnp.transpose(x, (1, 0, 2))

    b = min(128, _round_up(n, 8))          # images per grid step (MXU M dim)
    n_pad = _round_up(n, b)
    if n_pad != n:
        x = jnp.pad(x, ((0, 0), (0, n_pad - n), (0, 0)))

    weights = (prep["B1"], prep["r1"], prep["B2"], prep["r2"],
               prep["B3"], prep["r3"], prep["B4"], prep["r4"],
               prep["B5"], prep["r5"], prep["B6"], prep["r6"],
               prep["B7"], prep["r7"], prep["B8"])

    def _const_spec(a):
        nd = a.ndim

        def idx(i):
            return (0,) * nd

        return pl.BlockSpec(a.shape, idx)

    scratch = [
        pltpu.VMEM((26, b, 128), jnp.float32),   # convblock1 out
        pltpu.VMEM((24, b, 256), jnp.float32),   # convblock2 out
        pltpu.VMEM((22, b, 384), jnp.float32),   # convblock3 out
        pltpu.VMEM((11, b, 128), jnp.float32),   # pool + convblock4 out
        pltpu.VMEM((9, b, 128), jnp.float32),    # convblock5 out
        pltpu.VMEM((7, b, 128), jnp.float32),    # convblock6 out
        pltpu.VMEM((7, b, 128), jnp.float32),    # convblock7 out
    ]

    out = pl.pallas_call(
        _fused_kernel,
        out_shape=jax.ShapeDtypeStruct((n_pad, 10), jnp.float32),
        grid=(n_pad // b,),
        in_specs=[pl.BlockSpec((_H, b, _H), lambda i: (0, i, 0))]
                 + [_const_spec(w) for w in weights],
        out_specs=pl.BlockSpec((b, 10), lambda i: (i, 0)),
        scratch_shapes=scratch,
        compiler_params=pltpu.CompilerParams(
            dimension_semantics=("parallel",),
            vmem_limit_bytes=32 * 1024 * 1024),
    )(x, *weights)
    return out[:n]


# ----------------------------- parameters / ref ------------------------------

def init_params(key):
    def conv_w(k, kh, kw, cin, cout):
        return 0.2 * jax.random.normal(k, (kh, kw, cin, cout), jnp.float32)

    def bn_p(k, c):
        k1, k2, k3, k4 = jax.random.split(k, 4)
        gamma = 1.0 + 0.1 * jax.random.normal(k1, (c,), jnp.float32)
        beta = 0.1 * jax.random.normal(k2, (c,), jnp.float32)
        mean = 0.1 * jax.random.normal(k3, (c,), jnp.float32)
        var = 1.0 + 0.1 * jax.random.uniform(k4, (c,), jnp.float32)
        return gamma, beta, mean, var

    ks = jax.random.split(key, 15)
    return {
        "c1": (conv_w(ks[0], 3, 3, 1, 4), *bn_p(ks[1], 4)),
        "c2": (conv_w(ks[2], 3, 3, 4, 8), *bn_p(ks[3], 8)),
        "c3": (conv_w(ks[4], 3, 3, 8, 16), *bn_p(ks[5], 16)),
        "c4": (conv_w(ks[6], 1, 1, 16, 4), *bn_p(ks[7], 4)),
        "c5": (conv_w(ks[8], 3, 3, 4, 8), *bn_p(ks[9], 8)),
        "c6": (conv_w(ks[10], 3, 3, 8, 16), *bn_p(ks[11], 16)),
        "c7": (conv_w(ks[12], 1, 1, 16, 10), *bn_p(ks[13], 10)),
        "c8": conv_w(ks[14], 7, 7, 10, 10),
    }


def ref_forward(params, x_nchw):
    """Pure-JAX (XLA) reference with identical semantics, for validation."""
    hp = jax.lax.Precision.HIGHEST
    dn = ("NHWC", "HWIO", "NHWC")

    def block(x, w, gamma, beta, mean, var):
        y = jax.lax.conv_general_dilated(x, w, (1, 1), "VALID",
                                         dimension_numbers=dn, precision=hp)
        y = (y - mean) * (gamma / jnp.sqrt(var + BN_EPS)) + beta
        return jnp.maximum(y, 0.0)

    x = jnp.transpose(x_nchw, (0, 2, 3, 1)).astype(jnp.float32)
    x = block(x, *params["c1"])
    x = block(x, *params["c2"])
    x = block(x, *params["c3"])
    x = jax.lax.reduce_window(x, -jnp.inf, jax.lax.max,
                              (1, 2, 2, 1), (1, 2, 2, 1), "VALID")
    x = block(x, *params["c4"])
    x = block(x, *params["c5"])
    x = block(x, *params["c6"])
    x = block(x, *params["c7"])
    x = jax.lax.conv_general_dilated(x, params["c8"], (1, 1), "VALID",
                                     dimension_numbers=dn, precision=hp)
    return jax.nn.log_softmax(x.reshape(x.shape[0], 10), axis=-1)


# ----------------------------------- main ------------------------------------

if __name__ == "__main__":
    key = jax.random.PRNGKey(0)
    pkey, xkey = jax.random.split(key)
    params = init_params(pkey)
    prep = prepare_params(params)

    fwd = jax.jit(forward)

    # Small check (batch=2, exercises padding to the 8-sublane minimum).
    x = jax.random.normal(xkey, (2, 1, 28, 28), jnp.float32)
    out = jax.block_until_ready(fwd(prep, x))
    assert out.shape == (2, 10)
    assert bool(jnp.all(jnp.isfinite(out)))
    assert bool(jnp.allclose(jnp.sum(jnp.exp(out), axis=-1), 1.0, atol=1e-4))
    ref = ref_forward(params, x)
    assert bool(jnp.allclose(out, ref, atol=1e-3, rtol=1e-3)), (
        "max abs diff vs reference: %f" % float(jnp.max(jnp.abs(out - ref))))

    # Larger check: 160 images -> 128 per grid step, 2 grid steps (the
    # performance configuration: full MXU M-dim, parallel batch grid axis).
    x2 = jax.random.normal(jax.random.PRNGKey(1), (160, 1, 28, 28),
                           jnp.float32)
    out2 = jax.block_until_ready(fwd(prep, x2))
    assert out2.shape == (160, 10)
    assert bool(jnp.all(jnp.isfinite(out2)))
    ref2 = ref_forward(params, x2)
    assert bool(jnp.allclose(out2, ref2, atol=1e-3, rtol=1e-3)), (
        "max abs diff vs reference (batch=160): %f"
        % float(jnp.max(jnp.abs(out2 - ref2))))

    print("KERNEL_OK")
</pallas_src>

<mosaic_0001>
module attributes {stable_mosaic.version = 11 : i64} {
  func.func @_fused_kernel(%arg0: i32, %arg1: memref<28x8x28xf32, #tpu.memory_space<vmem>>, %arg2: memref<3x28x128xf32, #tpu.memory_space<vmem>>, %arg3: memref<1x128xf32, #tpu.memory_space<vmem>>, %arg4: memref<3x128x256xf32, #tpu.memory_space<vmem>>, %arg5: memref<1x256xf32, #tpu.memory_space<vmem>>, %arg6: memref<3x256x384xf32, #tpu.memory_space<vmem>>, %arg7: memref<1x384xf32, #tpu.memory_space<vmem>>, %arg8: memref<336x128xf32, #tpu.memory_space<vmem>>, %arg9: memref<1x128xf32, #tpu.memory_space<vmem>>, %arg10: memref<3x128x128xf32, #tpu.memory_space<vmem>>, %arg11: memref<1x128xf32, #tpu.memory_space<vmem>>, %arg12: memref<3x128x128xf32, #tpu.memory_space<vmem>>, %arg13: memref<1x128xf32, #tpu.memory_space<vmem>>, %arg14: memref<128x128xf32, #tpu.memory_space<vmem>>, %arg15: memref<1x128xf32, #tpu.memory_space<vmem>>, %arg16: memref<7x128x10xf32, #tpu.memory_space<vmem>>, %arg17: memref<8x10xf32, #tpu.memory_space<vmem>>, %arg18: memref<26x8x128xf32, #tpu.memory_space<vmem>>, %arg19: memref<24x8x256xf32, #tpu.memory_space<vmem>>, %arg20: memref<22x8x384xf32, #tpu.memory_space<vmem>>, %arg21: memref<11x8x128xf32, #tpu.memory_space<vmem>>, %arg22: memref<9x8x128xf32, #tpu.memory_space<vmem>>, %arg23: memref<7x8x128xf32, #tpu.memory_space<vmem>>, %arg24: memref<7x8x128xf32, #tpu.memory_space<vmem>>) attributes {dimension_semantics = [#tpu.dimension_semantics<parallel>], iteration_bounds = array<i64: 1>, scalar_prefetch = 0 : i64, scratch_operands = 7 : i64, tpu.core_type = #tpu.core_type<tc>, window_params = [{transform_indices = @transform_0, window_bounds = array<i64: 28, 8, 28>}, {pipeline_mode = #tpu.pipeline_mode<synchronous>, transform_indices = @transform_1, window_bounds = array<i64: 3, 28, 128>}, {pipeline_mode = #tpu.pipeline_mode<synchronous>, transform_indices = @transform_2, window_bounds = array<i64: 1, 128>}, {pipeline_mode = #tpu.pipeline_mode<synchronous>, transform_indices = @transform_3, window_bounds = array<i64: 3, 128, 256>}, {pipeline_mode = #tpu.pipeline_mode<synchronous>, transform_indices = @transform_4, window_bounds = array<i64: 1, 256>}, {pipeline_mode = #tpu.pipeline_mode<synchronous>, transform_indices = @transform_5, window_bounds = array<i64: 3, 256, 384>}, {pipeline_mode = #tpu.pipeline_mode<synchronous>, transform_indices = @transform_6, window_bounds = array<i64: 1, 384>}, {pipeline_mode = #tpu.pipeline_mode<synchronous>, transform_indices = @transform_7, window_bounds = array<i64: 336, 128>}, {pipeline_mode = #tpu.pipeline_mode<synchronous>, transform_indices = @transform_8, window_bounds = array<i64: 1, 128>}, {pipeline_mode = #tpu.pipeline_mode<synchronous>, transform_indices = @transform_9, window_bounds = array<i64: 3, 128, 128>}, {pipeline_mode = #tpu.pipeline_mode<synchronous>, transform_indices = @transform_10, window_bounds = array<i64: 1, 128>}, {pipeline_mode = #tpu.pipeline_mode<synchronous>, transform_indices = @transform_11, window_bounds = array<i64: 3, 128, 128>}, {pipeline_mode = #tpu.pipeline_mode<synchronous>, transform_indices = @transform_12, window_bounds = array<i64: 1, 128>}, {pipeline_mode = #tpu.pipeline_mode<synchronous>, transform_indices = @transform_13, window_bounds = array<i64: 128, 128>}, {pipeline_mode = #tpu.pipeline_mode<synchronous>, transform_indices = @transform_14, window_bounds = array<i64: 1, 128>}, {pipeline_mode = #tpu.pipeline_mode<synchronous>, transform_indices = @transform_15, window_bounds = array<i64: 7, 128, 10>}, {transform_indices = @transform_16, window_bounds = array<i64: 8, 10>}]} {
    %c0 = arith.constant 0 : index
    %c0_0 = arith.constant 0 : index
    %0 = vector.load %arg3[%c0, %c0_0] : memref<1x128xf32, #tpu.memory_space<vmem>>, vector<1x128xf32>
    %c0_i32 = arith.constant 0 : i32
    %c26_i32 = arith.constant 26 : i32
    %1 = arith.addi %c0_i32, %c26_i32 : i32
    %c1_i32 = arith.constant 1 : i32
    scf.for %arg25 = %c0_i32 to %1 step %c1_i32  : i32 {
      %68 = arith.index_cast %arg25 : i32 to index
      %c0_83 = arith.constant 0 : index
      %c0_84 = arith.constant 0 : index
      %69 = vector.load %arg1[%68, %c0_83, %c0_84] : memref<28x8x28xf32, #tpu.memory_space<vmem>>, vector<1x8x28xf32>
      %70 = vector.shape_cast %69 : vector<1x8x28xf32> to vector<8x28xf32>
      %c0_85 = arith.constant 0 : index
      %c0_86 = arith.constant 0 : index
      %c0_87 = arith.constant 0 : index
      %71 = vector.load %arg2[%c0_85, %c0_86, %c0_87] : memref<3x28x128xf32, #tpu.memory_space<vmem>>, vector<1x28x128xf32>
      %72 = vector.shape_cast %71 : vector<1x28x128xf32> to vector<28x128xf32>
      %cst_88 = arith.constant dense<0.000000e+00> : vector<8x128xf32>
      %73 = tpu.matmul %70, %72, %cst_88 {dimension_numbers = #tpu.dot_dimension_numbers<[1], [0], [0], [1], [0, 0, 1, 1], [], []>} : vector<8x28xf32>, vector<28x128xf32>, vector<8x128xf32> -> vector<8x128xf32>
      %c1_i32_89 = arith.constant 1 : i32
      %74 = arith.addi %arg25, %c1_i32_89 : i32
      %75 = arith.index_cast %74 : i32 to index
      %c0_90 = arith.constant 0 : index
      %c0_91 = arith.constant 0 : index
      %76 = vector.load %arg1[%75, %c0_90, %c0_91] : memref<28x8x28xf32, #tpu.memory_space<vmem>>, vector<1x8x28xf32>
      %77 = vector.shape_cast %76 : vector<1x8x28xf32> to vector<8x28xf32>
      %c1_92 = arith.constant 1 : index
      %c0_93 = arith.constant 0 : index
      %c0_94 = arith.constant 0 : index
      %78 = vector.load %arg2[%c1_92, %c0_93, %c0_94] : memref<3x28x128xf32, #tpu.memory_space<vmem>>, vector<1x28x128xf32>
      %79 = vector.shape_cast %78 : vector<1x28x128xf32> to vector<28x128xf32>
      %cst_95 = arith.constant dense<0.000000e+00> : vector<8x128xf32>
      %80 = tpu.matmul %77, %79, %cst_95 {dimension_numbers = #tpu.dot_dimension_numbers<[1], [0], [0], [1], [0, 0, 1, 1], [], []>} : vector<8x28xf32>, vector<28x128xf32>, vector<8x128xf32> -> vector<8x128xf32>
      %81 = arith.addf %73, %80 : vector<8x128xf32>
      %c2_i32 = arith.constant 2 : i32
      %82 = arith.addi %arg25, %c2_i32 : i32
      %83 = arith.index_cast %82 : i32 to index
      %c0_96 = arith.constant 0 : index
      %c0_97 = arith.constant 0 : index
      %84 = vector.load %arg1[%83, %c0_96, %c0_97] : memref<28x8x28xf32, #tpu.memory_space<vmem>>, vector<1x8x28xf32>
      %85 = vector.shape_cast %84 : vector<1x8x28xf32> to vector<8x28xf32>
      %c2_98 = arith.constant 2 : index
      %c0_99 = arith.constant 0 : index
      %c0_100 = arith.constant 0 : index
      %86 = vector.load %arg2[%c2_98, %c0_99, %c0_100] : memref<3x28x128xf32, #tpu.memory_space<vmem>>, vector<1x28x128xf32>
      %87 = vector.shape_cast %86 : vector<1x28x128xf32> to vector<28x128xf32>
      %cst_101 = arith.constant dense<0.000000e+00> : vector<8x128xf32>
      %88 = tpu.matmul %85, %87, %cst_101 {dimension_numbers = #tpu.dot_dimension_numbers<[1], [0], [0], [1], [0, 0, 1, 1], [], []>} : vector<8x28xf32>, vector<28x128xf32>, vector<8x128xf32> -> vector<8x128xf32>
      %89 = arith.addf %81, %88 : vector<8x128xf32>
      %90 = vector.broadcast %0 : vector<1x128xf32> to vector<8x128xf32>
      %91 = arith.addf %89, %90 : vector<8x128xf32>
      %cst_102 = arith.constant 0.000000e+00 : f32
      %92 = vector.broadcast %cst_102 : f32 to vector<8x128xf32>
      %93 = arith.maximumf %91, %92 : vector<8x128xf32>
      %94 = arith.index_cast %arg25 : i32 to index
      %c0_103 = arith.constant 0 : index
      %c0_104 = arith.constant 0 : index
      %95 = vector.load %arg18[%94, %c0_103, %c0_104] : memref<26x8x128xf32, #tpu.memory_space<vmem>>, vector<1x8x128xf32>
      %96 = vector.shape_cast %95 : vector<1x8x128xf32> to vector<8x128xf32>
      %97 = vector.shape_cast %93 : vector<8x128xf32> to vector<1x8x128xf32>
      tpu.vector_store %arg18[%94, %c0_103, %c0_104], %97 {strides = array<i32>} : memref<26x8x128xf32, #tpu.memory_space<vmem>>, vector<1x8x128xf32>,
    }
    %c26_i32_1 = arith.constant 26 : i32
    %c0_2 = arith.constant 0 : index
    %c0_3 = arith.constant 0 : index
    %2 = vector.load %arg5[%c0_2, %c0_3] : memref<1x256xf32, #tpu.memory_space<vmem>>, vector<1x256xf32>
    %c0_i32_4 = arith.constant 0 : i32
    %c24_i32 = arith.constant 24 : i32
    %3 = arith.addi %c0_i32_4, %c24_i32 : i32
    %c1_i32_5 = arith.constant 1 : i32
    scf.for %arg25 = %c0_i32_4 to %3 step %c1_i32_5  : i32 {
      %68 = arith.index_cast %arg25 : i32 to index
      %c0_83 = arith.constant 0 : index
      %c0_84 = arith.constant 0 : index
      %69 = vector.load %arg18[%68, %c0_83, %c0_84] : memref<26x8x128xf32, #tpu.memory_space<vmem>>, vector<1x8x128xf32>
      %70 = vector.shape_cast %69 : vector<1x8x128xf32> to vector<8x128xf32>
      %c0_85 = arith.constant 0 : index
      %c0_86 = arith.constant 0 : index
      %c0_87 = arith.constant 0 : index
      %71 = vector.load %arg4[%c0_85, %c0_86, %c0_87] : memref<3x128x256xf32, #tpu.memory_space<vmem>>, vector<1x128x256xf32>
      %72 = vector.shape_cast %71 : vector<1x128x256xf32> to vector<128x256xf32>
      %cst_88 = arith.constant dense<0.000000e+00> : vector<8x256xf32>
      %73 = tpu.matmul %70, %72, %cst_88 {dimension_numbers = #tpu.dot_dimension_numbers<[1], [0], [0], [1], [0, 0, 1, 1], [], []>} : vector<8x128xf32>, vector<128x256xf32>, vector<8x256xf32> -> vector<8x256xf32>
      %c1_i32_89 = arith.constant 1 : i32
      %74 = arith.addi %arg25, %c1_i32_89 : i32
      %75 = arith.index_cast %74 : i32 to index
      %c0_90 = arith.constant 0 : index
      %c0_91 = arith.constant 0 : index
      %76 = vector.load %arg18[%75, %c0_90, %c0_91] : memref<26x8x128xf32, #tpu.memory_space<vmem>>, vector<1x8x128xf32>
      %77 = vector.shape_cast %76 : vector<1x8x128xf32> to vector<8x128xf32>
      %c1_92 = arith.constant 1 : index
      %c0_93 = arith.constant 0 : index
      %c0_94 = arith.constant 0 : index
      %78 = vector.load %arg4[%c1_92, %c0_93, %c0_94] : memref<3x128x256xf32, #tpu.memory_space<vmem>>, vector<1x128x256xf32>
      %79 = vector.shape_cast %78 : vector<1x128x256xf32> to vector<128x256xf32>
      %cst_95 = arith.constant dense<0.000000e+00> : vector<8x256xf32>
      %80 = tpu.matmul %77, %79, %cst_95 {dimension_numbers = #tpu.dot_dimension_numbers<[1], [0], [0], [1], [0, 0, 1, 1], [], []>} : vector<8x128xf32>, vector<128x256xf32>, vector<8x256xf32> -> vector<8x256xf32>
      %81 = arith.addf %73, %80 : vector<8x256xf32>
      %c2_i32 = arith.constant 2 : i32
      %82 = arith.addi %arg25, %c2_i32 : i32
      %83 = arith.index_cast %82 : i32 to index
      %c0_96 = arith.constant 0 : index
      %c0_97 = arith.constant 0 : index
      %84 = vector.load %arg18[%83, %c0_96, %c0_97] : memref<26x8x128xf32, #tpu.memory_space<vmem>>, vector<1x8x128xf32>
      %85 = vector.shape_cast %84 : vector<1x8x128xf32> to vector<8x128xf32>
      %c2_98 = arith.constant 2 : index
      %c0_99 = arith.constant 0 : index
      %c0_100 = arith.constant 0 : index
      %86 = vector.load %arg4[%c2_98, %c0_99, %c0_100] : memref<3x128x256xf32, #tpu.memory_space<vmem>>, vector<1x128x256xf32>
      %87 = vector.shape_cast %86 : vector<1x128x256xf32> to vector<128x256xf32>
      %cst_101 = arith.constant dense<0.000000e+00> : vector<8x256xf32>
      %88 = tpu.matmul %85, %87, %cst_101 {dimension_numbers = #tpu.dot_dimension_numbers<[1], [0], [0], [1], [0, 0, 1, 1], [], []>} : vector<8x128xf32>, vector<128x256xf32>, vector<8x256xf32> -> vector<8x256xf32>
      %89 = arith.addf %81, %88 : vector<8x256xf32>
      %90 = vector.broadcast %2 : vector<1x256xf32> to vector<8x256xf32>
      %91 = arith.addf %89, %90 : vector<8x256xf32>
      %cst_102 = arith.constant 0.000000e+00 : f32
      %92 = vector.broadcast %cst_102 : f32 to vector<8x256xf32>
      %93 = arith.maximumf %91, %92 : vector<8x256xf32>
      %94 = arith.index_cast %arg25 : i32 to index
      %c0_103 = arith.constant 0 : index
      %c0_104 = arith.constant 0 : index
      %95 = vector.load %arg19[%94, %c0_103, %c0_104] : memref<24x8x256xf32, #tpu.memory_space<vmem>>, vector<1x8x256xf32>
      %96 = vector.shape_cast %95 : vector<1x8x256xf32> to vector<8x256xf32>
      %97 = vector.shape_cast %93 : vector<8x256xf32> to vector<1x8x256xf32>
      tpu.vector_store %arg19[%94, %c0_103, %c0_104], %97 {strides = array<i32>} : memref<24x8x256xf32, #tpu.memory_space<vmem>>, vector<1x8x256xf32>,
    }
    %c24_i32_6 = arith.constant 24 : i32
    %c0_7 = arith.constant 0 : index
    %c0_8 = arith.constant 0 : index
    %4 = vector.load %arg7[%c0_7, %c0_8] : memref<1x384xf32, #tpu.memory_space<vmem>>, vector<1x384xf32>
    %c0_i32_9 = arith.constant 0 : i32
    %c22_i32 = arith.constant 22 : i32
    %5 = arith.addi %c0_i32_9, %c22_i32 : i32
    %c1_i32_10 = arith.constant 1 : i32
    scf.for %arg25 = %c0_i32_9 to %5 step %c1_i32_10  : i32 {
      %68 = arith.index_cast %arg25 : i32 to index
      %c0_83 = arith.constant 0 : index
      %c0_84 = arith.constant 0 : index
      %69 = vector.load %arg19[%68, %c0_83, %c0_84] : memref<24x8x256xf32, #tpu.memory_space<vmem>>, vector<1x8x256xf32>
      %70 = vector.shape_cast %69 : vector<1x8x256xf32> to vector<8x256xf32>
      %c0_85 = arith.constant 0 : index
      %c0_86 = arith.constant 0 : index
      %c0_87 = arith.constant 0 : index
      %71 = vector.load %arg6[%c0_85, %c0_86, %c0_87] : memref<3x256x384xf32, #tpu.memory_space<vmem>>, vector<1x256x384xf32>
      %72 = vector.shape_cast %71 : vector<1x256x384xf32> to vector<256x384xf32>
      %cst_88 = arith.constant dense<0.000000e+00> : vector<8x384xf32>
      %73 = tpu.matmul %70, %72, %cst_88 {dimension_numbers = #tpu.dot_dimension_numbers<[1], [0], [0], [1], [0, 0, 1, 1], [], []>} : vector<8x256xf32>, vector<256x384xf32>, vector<8x384xf32> -> vector<8x384xf32>
      %c1_i32_89 = arith.constant 1 : i32
      %74 = arith.addi %arg25, %c1_i32_89 : i32
      %75 = arith.index_cast %74 : i32 to index
      %c0_90 = arith.constant 0 : index
      %c0_91 = arith.constant 0 : index
      %76 = vector.load %arg19[%75, %c0_90, %c0_91] : memref<24x8x256xf32, #tpu.memory_space<vmem>>, vector<1x8x256xf32>
      %77 = vector.shape_cast %76 : vector<1x8x256xf32> to vector<8x256xf32>
      %c1_92 = arith.constant 1 : index
      %c0_93 = arith.constant 0 : index
      %c0_94 = arith.constant 0 : index
      %78 = vector.load %arg6[%c1_92, %c0_93, %c0_94] : memref<3x256x384xf32, #tpu.memory_space<vmem>>, vector<1x256x384xf32>
      %79 = vector.shape_cast %78 : vector<1x256x384xf32> to vector<256x384xf32>
      %cst_95 = arith.constant dense<0.000000e+00> : vector<8x384xf32>
      %80 = tpu.matmul %77, %79, %cst_95 {dimension_numbers = #tpu.dot_dimension_numbers<[1], [0], [0], [1], [0, 0, 1, 1], [], []>} : vector<8x256xf32>, vector<256x384xf32>, vector<8x384xf32> -> vector<8x384xf32>
      %81 = arith.addf %73, %80 : vector<8x384xf32>
      %c2_i32 = arith.constant 2 : i32
      %82 = arith.addi %arg25, %c2_i32 : i32
      %83 = arith.index_cast %82 : i32 to index
      %c0_96 = arith.constant 0 : index
      %c0_97 = arith.constant 0 : index
      %84 = vector.load %arg19[%83, %c0_96, %c0_97] : memref<24x8x256xf32, #tpu.memory_space<vmem>>, vector<1x8x256xf32>
      %85 = vector.shape_cast %84 : vector<1x8x256xf32> to vector<8x256xf32>
      %c2_98 = arith.constant 2 : index
      %c0_99 = arith.constant 0 : index
      %c0_100 = arith.constant 0 : index
      %86 = vector.load %arg6[%c2_98, %c0_99, %c0_100] : memref<3x256x384xf32, #tpu.memory_space<vmem>>, vector<1x256x384xf32>
      %87 = vector.shape_cast %86 : vector<1x256x384xf32> to vector<256x384xf32>
      %cst_101 = arith.constant dense<0.000000e+00> : vector<8x384xf32>
      %88 = tpu.matmul %85, %87, %cst_101 {dimension_numbers = #tpu.dot_dimension_numbers<[1], [0], [0], [1], [0, 0, 1, 1], [], []>} : vector<8x256xf32>, vector<256x384xf32>, vector<8x384xf32> -> vector<8x384xf32>
      %89 = arith.addf %81, %88 : vector<8x384xf32>
      %90 = vector.broadcast %4 : vector<1x384xf32> to vector<8x384xf32>
      %91 = arith.addf %89, %90 : vector<8x384xf32>
      %cst_102 = arith.constant 0.000000e+00 : f32
      %92 = vector.broadcast %cst_102 : f32 to vector<8x384xf32>
      %93 = arith.maximumf %91, %92 : vector<8x384xf32>
      %94 = arith.index_cast %arg25 : i32 to index
      %c0_103 = arith.constant 0 : index
      %c0_104 = arith.constant 0 : index
      %95 = vector.load %arg20[%94, %c0_103, %c0_104] : memref<22x8x384xf32, #tpu.memory_space<vmem>>, vector<1x8x384xf32>
      %96 = vector.shape_cast %95 : vector<1x8x384xf32> to vector<8x384xf32>
      %97 = vector.shape_cast %93 : vector<8x384xf32> to vector<1x8x384xf32>
      tpu.vector_store %arg20[%94, %c0_103, %c0_104], %97 {strides = array<i32>} : memref<22x8x384xf32, #tpu.memory_space<vmem>>, vector<1x8x384xf32>,
    }
    %c22_i32_11 = arith.constant 22 : i32
    %c0_12 = arith.constant 0 : index
    %c0_13 = arith.constant 0 : index
    %6 = vector.load %arg8[%c0_12, %c0_13] : memref<336x128xf32, #tpu.memory_space<vmem>>, vector<336x128xf32>
    %c0_14 = arith.constant 0 : index
    %c0_15 = arith.constant 0 : index
    %7 = vector.load %arg9[%c0_14, %c0_15] : memref<1x128xf32, #tpu.memory_space<vmem>>, vector<1x128xf32>
    %c0_i32_16 = arith.constant 0 : i32
    %c11_i32 = arith.constant 11 : i32
    %8 = arith.addi %c0_i32_16, %c11_i32 : i32
    %c1_i32_17 = arith.constant 1 : i32
    scf.for %arg25 = %c0_i32_16 to %8 step %c1_i32_17  : i32 {
      %c2_i32 = arith.constant 2 : i32
      %68 = arith.muli %c2_i32, %arg25 : i32
      %69 = arith.index_cast %68 : i32 to index
      %c0_83 = arith.constant 0 : index
      %c0_84 = arith.constant 0 : index
      %70 = vector.load %arg20[%69, %c0_83, %c0_84] : memref<22x8x384xf32, #tpu.memory_space<vmem>>, vector<1x8x384xf32>
      %71 = vector.shape_cast %70 : vector<1x8x384xf32> to vector<8x384xf32>
      %c2_i32_85 = arith.constant 2 : i32
      %72 = arith.muli %c2_i32_85, %arg25 : i32
      %c1_i32_86 = arith.constant 1 : i32
      %73 = arith.addi %72, %c1_i32_86 : i32
      %74 = arith.index_cast %73 : i32 to index
      %c0_87 = arith.constant 0 : index
      %c0_88 = arith.constant 0 : index
      %75 = vector.load %arg20[%74, %c0_87, %c0_88] : memref<22x8x384xf32, #tpu.memory_space<vmem>>, vector<1x8x384xf32>
      %76 = vector.shape_cast %75 : vector<1x8x384xf32> to vector<8x384xf32>
      %77 = arith.maximumf %71, %76 : vector<8x384xf32>
      %78 = vector.extract_strided_slice %77 {offsets = [0, 0], sizes = [8, 336], strides = [1, 1]} : vector<8x384xf32> to vector<8x336xf32>
      %79 = vector.extract_strided_slice %77 {offsets = [0, 16], sizes = [8, 336], strides = [1, 1]} : vector<8x384xf32> to vector<8x336xf32>
      %80 = arith.maximumf %78, %79 : vector<8x336xf32>
      %cst_89 = arith.constant dense<0.000000e+00> : vector<8x128xf32>
      %81 = tpu.matmul %80, %6, %cst_89 {dimension_numbers = #tpu.dot_dimension_numbers<[1], [0], [0], [1], [0, 0, 1, 1], [], []>} : vector<8x336xf32>, vector<336x128xf32>, vector<8x128xf32> -> vector<8x128xf32>
      %82 = vector.broadcast %7 : vector<1x128xf32> to vector<8x128xf32>
      %83 = arith.addf %81, %82 : vector<8x128xf32>
      %cst_90 = arith.constant 0.000000e+00 : f32
      %84 = vector.broadcast %cst_90 : f32 to vector<8x128xf32>
      %85 = arith.maximumf %83, %84 : vector<8x128xf32>
      %86 = arith.index_cast %arg25 : i32 to index
      %c0_91 = arith.constant 0 : index
      %c0_92 = arith.constant 0 : index
      %87 = vector.load %arg21[%86, %c0_91, %c0_92] : memref<11x8x128xf32, #tpu.memory_space<vmem>>, vector<1x8x128xf32>
      %88 = vector.shape_cast %87 : vector<1x8x128xf32> to vector<8x128xf32>
      %89 = vector.shape_cast %85 : vector<8x128xf32> to vector<1x8x128xf32>
      tpu.vector_store %arg21[%86, %c0_91, %c0_92], %89 {strides = array<i32>} : memref<11x8x128xf32, #tpu.memory_space<vmem>>, vector<1x8x128xf32>,
    }
    %c11_i32_18 = arith.constant 11 : i32
    %c0_19 = arith.constant 0 : index
    %c0_20 = arith.constant 0 : index
    %9 = vector.load %arg11[%c0_19, %c0_20] : memref<1x128xf32, #tpu.memory_space<vmem>>, vector<1x128xf32>
    %c0_i32_21 = arith.constant 0 : i32
    %c9_i32 = arith.constant 9 : i32
    %10 = arith.addi %c0_i32_21, %c9_i32 : i32
    %c1_i32_22 = arith.constant 1 : i32
    scf.for %arg25 = %c0_i32_21 to %10 step %c1_i32_22  : i32 {
      %68 = arith.index_cast %arg25 : i32 to index
      %c0_83 = arith.constant 0 : index
      %c0_84 = arith.constant 0 : index
      %69 = vector.load %arg21[%68, %c0_83, %c0_84] : memref<11x8x128xf32, #tpu.memory_space<vmem>>, vector<1x8x128xf32>
      %70 = vector.shape_cast %69 : vector<1x8x128xf32> to vector<8x128xf32>
      %c0_85 = arith.constant 0 : index
      %c0_86 = arith.constant 0 : index
      %c0_87 = arith.constant 0 : index
      %71 = vector.load %arg10[%c0_85, %c0_86, %c0_87] : memref<3x128x128xf32, #tpu.memory_space<vmem>>, vector<1x128x128xf32>
      %72 = vector.shape_cast %71 : vector<1x128x128xf32> to vector<128x128xf32>
      %cst_88 = arith.constant dense<0.000000e+00> : vector<8x128xf32>
      %73 = tpu.matmul %70, %72, %cst_88 {dimension_numbers = #tpu.dot_dimension_numbers<[1], [0], [0], [1], [0, 0, 1, 1], [], []>} : vector<8x128xf32>, vector<128x128xf32>, vector<8x128xf32> -> vector<8x128xf32>
      %c1_i32_89 = arith.constant 1 : i32
      %74 = arith.addi %arg25, %c1_i32_89 : i32
      %75 = arith.index_cast %74 : i32 to index
      %c0_90 = arith.constant 0 : index
      %c0_91 = arith.constant 0 : index
      %76 = vector.load %arg21[%75, %c0_90, %c0_91] : memref<11x8x128xf32, #tpu.memory_space<vmem>>, vector<1x8x128xf32>
      %77 = vector.shape_cast %76 : vector<1x8x128xf32> to vector<8x128xf32>
      %c1_92 = arith.constant 1 : index
      %c0_93 = arith.constant 0 : index
      %c0_94 = arith.constant 0 : index
      %78 = vector.load %arg10[%c1_92, %c0_93, %c0_94] : memref<3x128x128xf32, #tpu.memory_space<vmem>>, vector<1x128x128xf32>
      %79 = vector.shape_cast %78 : vector<1x128x128xf32> to vector<128x128xf32>
      %cst_95 = arith.constant dense<0.000000e+00> : vector<8x128xf32>
      %80 = tpu.matmul %77, %79, %cst_95 {dimension_numbers = #tpu.dot_dimension_numbers<[1], [0], [0], [1], [0, 0, 1, 1], [], []>} : vector<8x128xf32>, vector<128x128xf32>, vector<8x128xf32> -> vector<8x128xf32>
      %81 = arith.addf %73, %80 : vector<8x128xf32>
      %c2_i32 = arith.constant 2 : i32
      %82 = arith.addi %arg25, %c2_i32 : i32
      %83 = arith.index_cast %82 : i32 to index
      %c0_96 = arith.constant 0 : index
      %c0_97 = arith.constant 0 : index
      %84 = vector.load %arg21[%83, %c0_96, %c0_97] : memref<11x8x128xf32, #tpu.memory_space<vmem>>, vector<1x8x128xf32>
      %85 = vector.shape_cast %84 : vector<1x8x128xf32> to vector<8x128xf32>
      %c2_98 = arith.constant 2 : index
      %c0_99 = arith.constant 0 : index
      %c0_100 = arith.constant 0 : index
      %86 = vector.load %arg10[%c2_98, %c0_99, %c0_100] : memref<3x128x128xf32, #tpu.memory_space<vmem>>, vector<1x128x128xf32>
      %87 = vector.shape_cast %86 : vector<1x128x128xf32> to vector<128x128xf32>
      %cst_101 = arith.constant dense<0.000000e+00> : vector<8x128xf32>
      %88 = tpu.matmul %85, %87, %cst_101 {dimension_numbers = #tpu.dot_dimension_numbers<[1], [0], [0], [1], [0, 0, 1, 1], [], []>} : vector<8x128xf32>, vector<128x128xf32>, vector<8x128xf32> -> vector<8x128xf32>
      %89 = arith.addf %81, %88 : vector<8x128xf32>
      %90 = vector.broadcast %9 : vector<1x128xf32> to vector<8x128xf32>
      %91 = arith.addf %89, %90 : vector<8x128xf32>
      %cst_102 = arith.constant 0.000000e+00 : f32
      %92 = vector.broadcast %cst_102 : f32 to vector<8x128xf32>
      %93 = arith.maximumf %91, %92 : vector<8x128xf32>
      %94 = arith.index_cast %arg25 : i32 to index
      %c0_103 = arith.constant 0 : index
      %c0_104 = arith.constant 0 : index
      %95 = vector.load %arg22[%94, %c0_103, %c0_104] : memref<9x8x128xf32, #tpu.memory_space<vmem>>, vector<1x8x128xf32>
      %96 = vector.shape_cast %95 : vector<1x8x128xf32> to vector<8x128xf32>
      %97 = vector.shape_cast %93 : vector<8x128xf32> to vector<1x8x128xf32>
      tpu.vector_store %arg22[%94, %c0_103, %c0_104], %97 {strides = array<i32>} : memref<9x8x128xf32, #tpu.memory_space<vmem>>, vector<1x8x128xf32>,
    }
    %c9_i32_23 = arith.constant 9 : i32
    %c0_24 = arith.constant 0 : index
    %c0_25 = arith.constant 0 : index
    %11 = vector.load %arg13[%c0_24, %c0_25] : memref<1x128xf32, #tpu.memory_space<vmem>>, vector<1x128xf32>
    %c0_i32_26 = arith.constant 0 : i32
    %c7_i32 = arith.constant 7 : i32
    %12 = arith.addi %c0_i32_26, %c7_i32 : i32
    %c1_i32_27 = arith.constant 1 : i32
    scf.for %arg25 = %c0_i32_26 to %12 step %c1_i32_27  : i32 {
      %68 = arith.index_cast %arg25 : i32 to index
      %c0_83 = arith.constant 0 : index
      %c0_84 = arith.constant 0 : index
      %69 = vector.load %arg22[%68, %c0_83, %c0_84] : memref<9x8x128xf32, #tpu.memory_space<vmem>>, vector<1x8x128xf32>
      %70 = vector.shape_cast %69 : vector<1x8x128xf32> to vector<8x128xf32>
      %c0_85 = arith.constant 0 : index
      %c0_86 = arith.constant 0 : index
      %c0_87 = arith.constant 0 : index
      %71 = vector.load %arg12[%c0_85, %c0_86, %c0_87] : memref<3x128x128xf32, #tpu.memory_space<vmem>>, vector<1x128x128xf32>
      %72 = vector.shape_cast %71 : vector<1x128x128xf32> to vector<128x128xf32>
      %cst_88 = arith.constant dense<0.000000e+00> : vector<8x128xf32>
      %73 = tpu.matmul %70, %72, %cst_88 {dimension_numbers = #tpu.dot_dimension_numbers<[1], [0], [0], [1], [0, 0, 1, 1], [], []>} : vector<8x128xf32>, vector<128x128xf32>, vector<8x128xf32> -> vector<8x128xf32>
      %c1_i32_89 = arith.constant 1 : i32
      %74 = arith.addi %arg25, %c1_i32_89 : i32
      %75 = arith.index_cast %74 : i32 to index
      %c0_90 = arith.constant 0 : index
      %c0_91 = arith.constant 0 : index
      %76 = vector.load %arg22[%75, %c0_90, %c0_91] : memref<9x8x128xf32, #tpu.memory_space<vmem>>, vector<1x8x128xf32>
      %77 = vector.shape_cast %76 : vector<1x8x128xf32> to vector<8x128xf32>
      %c1_92 = arith.constant 1 : index
      %c0_93 = arith.constant 0 : index
      %c0_94 = arith.constant 0 : index
      %78 = vector.load %arg12[%c1_92, %c0_93, %c0_94] : memref<3x128x128xf32, #tpu.memory_space<vmem>>, vector<1x128x128xf32>
      %79 = vector.shape_cast %78 : vector<1x128x128xf32> to vector<128x128xf32>
      %cst_95 = arith.constant dense<0.000000e+00> : vector<8x128xf32>
      %80 = tpu.matmul %77, %79, %cst_95 {dimension_numbers = #tpu.dot_dimension_numbers<[1], [0], [0], [1], [0, 0, 1, 1], [], []>} : vector<8x128xf32>, vector<128x128xf32>, vector<8x128xf32> -> vector<8x128xf32>
      %81 = arith.addf %73, %80 : vector<8x128xf32>
      %c2_i32 = arith.constant 2 : i32
      %82 = arith.addi %arg25, %c2_i32 : i32
      %83 = arith.index_cast %82 : i32 to index
      %c0_96 = arith.constant 0 : index
      %c0_97 = arith.constant 0 : index
      %84 = vector.load %arg22[%83, %c0_96, %c0_97] : memref<9x8x128xf32, #tpu.memory_space<vmem>>, vector<1x8x128xf32>
      %85 = vector.shape_cast %84 : vector<1x8x128xf32> to vector<8x128xf32>
      %c2_98 = arith.constant 2 : index
      %c0_99 = arith.constant 0 : index
      %c0_100 = arith.constant 0 : index
      %86 = vector.load %arg12[%c2_98, %c0_99, %c0_100] : memref<3x128x128xf32, #tpu.memory_space<vmem>>, vector<1x128x128xf32>
      %87 = vector.shape_cast %86 : vector<1x128x128xf32> to vector<128x128xf32>
      %cst_101 = arith.constant dense<0.000000e+00> : vector<8x128xf32>
      %88 = tpu.matmul %85, %87, %cst_101 {dimension_numbers = #tpu.dot_dimension_numbers<[1], [0], [0], [1], [0, 0, 1, 1], [], []>} : vector<8x128xf32>, vector<128x128xf32>, vector<8x128xf32> -> vector<8x128xf32>
      %89 = arith.addf %81, %88 : vector<8x128xf32>
      %90 = vector.broadcast %11 : vector<1x128xf32> to vector<8x128xf32>
      %91 = arith.addf %89, %90 : vector<8x128xf32>
      %cst_102 = arith.constant 0.000000e+00 : f32
      %92 = vector.broadcast %cst_102 : f32 to vector<8x128xf32>
      %93 = arith.maximumf %91, %92 : vector<8x128xf32>
      %94 = arith.index_cast %arg25 : i32 to index
      %c0_103 = arith.constant 0 : index
      %c0_104 = arith.constant 0 : index
      %95 = vector.load %arg23[%94, %c0_103, %c0_104] : memref<7x8x128xf32, #tpu.memory_space<vmem>>, vector<1x8x128xf32>
      %96 = vector.shape_cast %95 : vector<1x8x128xf32> to vector<8x128xf32>
      %97 = vector.shape_cast %93 : vector<8x128xf32> to vector<1x8x128xf32>
      tpu.vector_store %arg23[%94, %c0_103, %c0_104], %97 {strides = array<i32>} : memref<7x8x128xf32, #tpu.memory_space<vmem>>, vector<1x8x128xf32>,
    }
    %c7_i32_28 = arith.constant 7 : i32
    %c0_29 = arith.constant 0 : index
    %c0_30 = arith.constant 0 : index
    %13 = vector.load %arg14[%c0_29, %c0_30] : memref<128x128xf32, #tpu.memory_space<vmem>>, vector<128x128xf32>
    %c0_31 = arith.constant 0 : index
    %c0_32 = arith.constant 0 : index
    %14 = vector.load %arg15[%c0_31, %c0_32] : memref<1x128xf32, #tpu.memory_space<vmem>>, vector<1x128xf32>
    %c0_i32_33 = arith.constant 0 : i32
    %c7_i32_34 = arith.constant 7 : i32
    %15 = arith.addi %c0_i32_33, %c7_i32_34 : i32
    %c1_i32_35 = arith.constant 1 : i32
    scf.for %arg25 = %c0_i32_33 to %15 step %c1_i32_35  : i32 {
      %68 = arith.index_cast %arg25 : i32 to index
      %c0_83 = arith.constant 0 : index
      %c0_84 = arith.constant 0 : index
      %69 = vector.load %arg23[%68, %c0_83, %c0_84] : memref<7x8x128xf32, #tpu.memory_space<vmem>>, vector<1x8x128xf32>
      %70 = vector.shape_cast %69 : vector<1x8x128xf32> to vector<8x128xf32>
      %cst_85 = arith.constant dense<0.000000e+00> : vector<8x128xf32>
      %71 = tpu.matmul %70, %13, %cst_85 {dimension_numbers = #tpu.dot_dimension_numbers<[1], [0], [0], [1], [0, 0, 1, 1], [], []>} : vector<8x128xf32>, vector<128x128xf32>, vector<8x128xf32> -> vector<8x128xf32>
      %72 = vector.broadcast %14 : vector<1x128xf32> to vector<8x128xf32>
      %73 = arith.addf %71, %72 : vector<8x128xf32>
      %cst_86 = arith.constant 0.000000e+00 : f32
      %74 = vector.broadcast %cst_86 : f32 to vector<8x128xf32>
      %75 = arith.maximumf %73, %74 : vector<8x128xf32>
      %76 = arith.index_cast %arg25 : i32 to index
      %c0_87 = arith.constant 0 : index
      %c0_88 = arith.constant 0 : index
      %77 = vector.load %arg24[%76, %c0_87, %c0_88] : memref<7x8x128xf32, #tpu.memory_space<vmem>>, vector<1x8x128xf32>
      %78 = vector.shape_cast %77 : vector<1x8x128xf32> to vector<8x128xf32>
      %79 = vector.shape_cast %75 : vector<8x128xf32> to vector<1x8x128xf32>
      tpu.vector_store %arg24[%76, %c0_87, %c0_88], %79 {strides = array<i32>} : memref<7x8x128xf32, #tpu.memory_space<vmem>>, vector<1x8x128xf32>,
    }
    %c7_i32_36 = arith.constant 7 : i32
    %c0_37 = arith.constant 0 : index
    %c0_38 = arith.constant 0 : index
    %c0_39 = arith.constant 0 : index
    %16 = vector.load %arg24[%c0_37, %c0_38, %c0_39] : memref<7x8x128xf32, #tpu.memory_space<vmem>>, vector<1x8x128xf32>
    %17 = vector.shape_cast %16 : vector<1x8x128xf32> to vector<8x128xf32>
    %c0_40 = arith.constant 0 : index
    %c0_41 = arith.constant 0 : index
    %c0_42 = arith.constant 0 : index
    %18 = vector.load %arg16[%c0_40, %c0_41, %c0_42] : memref<7x128x10xf32, #tpu.memory_space<vmem>>, vector<1x128x10xf32>
    %19 = vector.shape_cast %18 : vector<1x128x10xf32> to vector<128x10xf32>
    %cst = arith.constant dense<0.000000e+00> : vector<8x10xf32>
    %20 = tpu.matmul %17, %19, %cst {dimension_numbers = #tpu.dot_dimension_numbers<[1], [0], [0], [1], [0, 0, 1, 1], [], []>} : vector<8x128xf32>, vector<128x10xf32>, vector<8x10xf32> -> vector<8x10xf32>
    %c1 = arith.constant 1 : index
    %c0_43 = arith.constant 0 : index
    %c0_44 = arith.constant 0 : index
    %21 = vector.load %arg24[%c1, %c0_43, %c0_44] : memref<7x8x128xf32, #tpu.memory_space<vmem>>, vector<1x8x128xf32>
    %22 = vector.shape_cast %21 : vector<1x8x128xf32> to vector<8x128xf32>
    %c1_45 = arith.constant 1 : index
    %c0_46 = arith.constant 0 : index
    %c0_47 = arith.constant 0 : index
    %23 = vector.load %arg16[%c1_45, %c0_46, %c0_47] : memref<7x128x10xf32, #tpu.memory_space<vmem>>, vector<1x128x10xf32>
    %24 = vector.shape_cast %23 : vector<1x128x10xf32> to vector<128x10xf32>
    %cst_48 = arith.constant dense<0.000000e+00> : vector<8x10xf32>
    %25 = tpu.matmul %22, %24, %cst_48 {dimension_numbers = #tpu.dot_dimension_numbers<[1], [0], [0], [1], [0, 0, 1, 1], [], []>} : vector<8x128xf32>, vector<128x10xf32>, vector<8x10xf32> -> vector<8x10xf32>
    %26 = arith.addf %20, %25 : vector<8x10xf32>
    %c2 = arith.constant 2 : index
    %c0_49 = arith.constant 0 : index
    %c0_50 = arith.constant 0 : index
    %27 = vector.load %arg24[%c2, %c0_49, %c0_50] : memref<7x8x128xf32, #tpu.memory_space<vmem>>, vector<1x8x128xf32>
    %28 = vector.shape_cast %27 : vector<1x8x128xf32> to vector<8x128xf32>
    %c2_51 = arith.constant 2 : index
    %c0_52 = arith.constant 0 : index
    %c0_53 = arith.constant 0 : index
    %29 = vector.load %arg16[%c2_51, %c0_52, %c0_53] : memref<7x128x10xf32, #tpu.memory_space<vmem>>, vector<1x128x10xf32>
    %30 = vector.shape_cast %29 : vector<1x128x10xf32> to vector<128x10xf32>
    %cst_54 = arith.constant dense<0.000000e+00> : vector<8x10xf32>
    %31 = tpu.matmul %28, %30, %cst_54 {dimension_numbers = #tpu.dot_dimension_numbers<[1], [0], [0], [1], [0, 0, 1, 1], [], []>} : vector<8x128xf32>, vector<128x10xf32>, vector<8x10xf32> -> vector<8x10xf32>
    %32 = arith.addf %26, %31 : vector<8x10xf32>
    %c3 = arith.constant 3 : index
    %c0_55 = arith.constant 0 : index
    %c0_56 = arith.constant 0 : index
    %33 = vector.load %arg24[%c3, %c0_55, %c0_56] : memref<7x8x128xf32, #tpu.memory_space<vmem>>, vector<1x8x128xf32>
    %34 = vector.shape_cast %33 : vector<1x8x128xf32> to vector<8x128xf32>
    %c3_57 = arith.constant 3 : index
    %c0_58 = arith.constant 0 : index
    %c0_59 = arith.constant 0 : index
    %35 = vector.load %arg16[%c3_57, %c0_58, %c0_59] : memref<7x128x10xf32, #tpu.memory_space<vmem>>, vector<1x128x10xf32>
    %36 = vector.shape_cast %35 : vector<1x128x10xf32> to vector<128x10xf32>
    %cst_60 = arith.constant dense<0.000000e+00> : vector<8x10xf32>
    %37 = tpu.matmul %34, %36, %cst_60 {dimension_numbers = #tpu.dot_dimension_numbers<[1], [0], [0], [1], [0, 0, 1, 1], [], []>} : vector<8x128xf32>, vector<128x10xf32>, vector<8x10xf32> -> vector<8x10xf32>
    %38 = arith.addf %32, %37 : vector<8x10xf32>
    %c4 = arith.constant 4 : index
    %c0_61 = arith.constant 0 : index
    %c0_62 = arith.constant 0 : index
    %39 = vector.load %arg24[%c4, %c0_61, %c0_62] : memref<7x8x128xf32, #tpu.memory_space<vmem>>, vector<1x8x128xf32>
    %40 = vector.shape_cast %39 : vector<1x8x128xf32> to vector<8x128xf32>
    %c4_63 = arith.constant 4 : index
    %c0_64 = arith.constant 0 : index
    %c0_65 = arith.constant 0 : index
    %41 = vector.load %arg16[%c4_63, %c0_64, %c0_65] : memref<7x128x10xf32, #tpu.memory_space<vmem>>, vector<1x128x10xf32>
    %42 = vector.shape_cast %41 : vector<1x128x10xf32> to vector<128x10xf32>
    %cst_66 = arith.constant dense<0.000000e+00> : vector<8x10xf32>
    %43 = tpu.matmul %40, %42, %cst_66 {dimension_numbers = #tpu.dot_dimension_numbers<[1], [0], [0], [1], [0, 0, 1, 1], [], []>} : vector<8x128xf32>, vector<128x10xf32>, vector<8x10xf32> -> vector<8x10xf32>
    %44 = arith.addf %38, %43 : vector<8x10xf32>
    %c5 = arith.constant 5 : index
    %c0_67 = arith.constant 0 : index
    %c0_68 = arith.constant 0 : index
    %45 = vector.load %arg24[%c5, %c0_67, %c0_68] : memref<7x8x128xf32, #tpu.memory_space<vmem>>, vector<1x8x128xf32>
    %46 = vector.shape_cast %45 : vector<1x8x128xf32> to vector<8x128xf32>
    %c5_69 = arith.constant 5 : index
    %c0_70 = arith.constant 0 : index
    %c0_71 = arith.constant 0 : index
    %47 = vector.load %arg16[%c5_69, %c0_70, %c0_71] : memref<7x128x10xf32, #tpu.memory_space<vmem>>, vector<1x128x10xf32>
    %48 = vector.shape_cast %47 : vector<1x128x10xf32> to vector<128x10xf32>
    %cst_72 = arith.constant dense<0.000000e+00> : vector<8x10xf32>
    %49 = tpu.matmul %46, %48, %cst_72 {dimension_numbers = #tpu.dot_dimension_numbers<[1], [0], [0], [1], [0, 0, 1, 1], [], []>} : vector<8x128xf32>, vector<128x10xf32>, vector<8x10xf32> -> vector<8x10xf32>
    %50 = arith.addf %44, %49 : vector<8x10xf32>
    %c6 = arith.constant 6 : index
    %c0_73 = arith.constant 0 : index
    %c0_74 = arith.constant 0 : index
    %51 = vector.load %arg24[%c6, %c0_73, %c0_74] : memref<7x8x128xf32, #tpu.memory_space<vmem>>, vector<1x8x128xf32>
    %52 = vector.shape_cast %51 : vector<1x8x128xf32> to vector<8x128xf32>
    %c6_75 = arith.constant 6 : index
    %c0_76 = arith.constant 0 : index
    %c0_77 = arith.constant 0 : index
    %53 = vector.load %arg16[%c6_75, %c0_76, %c0_77] : memref<7x128x10xf32, #tpu.memory_space<vmem>>, vector<1x128x10xf32>
    %54 = vector.shape_cast %53 : vector<1x128x10xf32> to vector<128x10xf32>
    %cst_78 = arith.constant dense<0.000000e+00> : vector<8x10xf32>
    %55 = tpu.matmul %52, %54, %cst_78 {dimension_numbers = #tpu.dot_dimension_numbers<[1], [0], [0], [1], [0, 0, 1, 1], [], []>} : vector<8x128xf32>, vector<128x10xf32>, vector<8x10xf32> -> vector<8x10xf32>
    %56 = arith.addf %50, %55 : vector<8x10xf32>
    %cst_79 = arith.constant dense<0xFF800000> : vector<8xf32>
    %57 = vector.multi_reduction <maximumf>, %56, %cst_79 [1] : vector<8x10xf32> to vector<8xf32>
    %58 = vector.shape_cast %57 : vector<8xf32> to vector<8x1xf32>
    %59 = vector.broadcast %58 : vector<8x1xf32> to vector<8x10xf32>
    %60 = arith.subf %56, %59 : vector<8x10xf32>
    %61 = math.exp %60 : vector<8x10xf32>
    %cst_80 = arith.constant dense<0.000000e+00> : vector<8xf32>
    %62 = vector.multi_reduction <add>, %61, %cst_80 [1] : vector<8x10xf32> to vector<8xf32>
    %63 = vector.shape_cast %62 : vector<8xf32> to vector<8x1xf32>
    %64 = math.log %63 : vector<8x1xf32>
    %65 = vector.broadcast %64 : vector<8x1xf32> to vector<8x10xf32>
    %66 = arith.subf %60, %65 : vector<8x10xf32>
    %c0_81 = arith.constant 0 : index
    %c0_82 = arith.constant 0 : index
    %67 = vector.load %arg17[%c0_81, %c0_82] : memref<8x10xf32, #tpu.memory_space<vmem>>, vector<8x10xf32>
    tpu.vector_store %arg17[%c0_81, %c0_82], %66 {strides = array<i32>} : memref<8x10xf32, #tpu.memory_space<vmem>>, vector<8x10xf32>,
    return
  }
  func.func @transform_0(%arg0: i32) -> (i32, i32, i32) {
    %c0_i32 = arith.constant 0 : i32
    %c0_i32_0 = arith.constant 0 : i32
    %c0_i32_1 = arith.constant 0 : i32
    return %c0_i32, %arg0, %c0_i32_0 : i32, i32, i32
  }
  func.func @transform_1(%arg0: i32) -> (i32, i32, i32) {
    %c0_i32 = arith.constant 0 : i32
    %c0_i32_0 = arith.constant 0 : i32
    %c0_i32_1 = arith.constant 0 : i32
    %c0_i32_2 = arith.constant 0 : i32
    return %c0_i32, %c0_i32_0, %c0_i32_1 : i32, i32, i32
  }
  func.func @transform_2(%arg0: i32) -> (i32, i32) {
    %c0_i32 = arith.constant 0 : i32
    %c0_i32_0 = arith.constant 0 : i32
    %c0_i32_1 = arith.constant 0 : i32
    return %c0_i32, %c0_i32_0 : i32, i32
  }
  func.func @transform_3(%arg0: i32) -> (i32, i32, i32) {
    %c0_i32 = arith.constant 0 : i32
    %c0_i32_0 = arith.constant 0 : i32
    %c0_i32_1 = arith.constant 0 : i32
    %c0_i32_2 = arith.constant 0 : i32
    return %c0_i32, %c0_i32_0, %c0_i32_1 : i32, i32, i32
  }
  func.func @transform_4(%arg0: i32) -> (i32, i32) {
    %c0_i32 = arith.constant 0 : i32
    %c0_i32_0 = arith.constant 0 : i32
    %c0_i32_1 = arith.constant 0 : i32
    return %c0_i32, %c0_i32_0 : i32, i32
  }
  func.func @transform_5(%arg0: i32) -> (i32, i32, i32) {
    %c0_i32 = arith.constant 0 : i32
    %c0_i32_0 = arith.constant 0 : i32
    %c0_i32_1 = arith.constant 0 : i32
    %c0_i32_2 = arith.constant 0 : i32
    return %c0_i32, %c0_i32_0, %c0_i32_1 : i32, i32, i32
  }
  func.func @transform_6(%arg0: i32) -> (i32, i32) {
    %c0_i32 = arith.constant 0 : i32
    %c0_i32_0 = arith.constant 0 : i32
    %c0_i32_1 = arith.constant 0 : i32
    return %c0_i32, %c0_i32_0 : i32, i32
  }
  func.func @transform_7(%arg0: i32) -> (i32, i32) {
    %c0_i32 = arith.constant 0 : i32
    %c0_i32_0 = arith.constant 0 : i32
    %c0_i32_1 = arith.constant 0 : i32
    return %c0_i32, %c0_i32_0 : i32, i32
  }
  func.func @transform_8(%arg0: i32) -> (i32, i32) {
    %c0_i32 = arith.constant 0 : i32
    %c0_i32_0 = arith.constant 0 : i32
    %c0_i32_1 = arith.constant 0 : i32
    return %c0_i32, %c0_i32_0 : i32, i32
  }
  func.func @transform_9(%arg0: i32) -> (i32, i32, i32) {
    %c0_i32 = arith.constant 0 : i32
    %c0_i32_0 = arith.constant 0 : i32
    %c0_i32_1 = arith.constant 0 : i32
    %c0_i32_2 = arith.constant 0 : i32
    return %c0_i32, %c0_i32_0, %c0_i32_1 : i32, i32, i32
  }
  func.func @transform_10(%arg0: i32) -> (i32, i32) {
    %c0_i32 = arith.constant 0 : i32
    %c0_i32_0 = arith.constant 0 : i32
    %c0_i32_1 = arith.constant 0 : i32
    return %c0_i32, %c0_i32_0 : i32, i32
  }
  func.func @transform_11(%arg0: i32) -> (i32, i32, i32) {
    %c0_i32 = arith.constant 0 : i32
    %c0_i32_0 = arith.constant 0 : i32
    %c0_i32_1 = arith.constant 0 : i32
    %c0_i32_2 = arith.constant 0 : i32
    return %c0_i32, %c0_i32_0, %c0_i32_1 : i32, i32, i32
  }
  func.func @transform_12(%arg0: i32) -> (i32, i32) {
    %c0_i32 = arith.constant 0 : i32
    %c0_i32_0 = arith.constant 0 : i32
    %c0_i32_1 = arith.constant 0 : i32
    return %c0_i32, %c0_i32_0 : i32, i32
  }
  func.func @transform_13(%arg0: i32) -> (i32, i32) {
    %c0_i32 = arith.constant 0 : i32
    %c0_i32_0 = arith.constant 0 : i32
    %c0_i32_1 = arith.constant 0 : i32
    return %c0_i32, %c0_i32_0 : i32, i32
  }
  func.func @transform_14(%arg0: i32) -> (i32, i32) {
    %c0_i32 = arith.constant 0 : i32
    %c0_i32_0 = arith.constant 0 : i32
    %c0_i32_1 = arith.constant 0 : i32
    return %c0_i32, %c0_i32_0 : i32, i32
  }
  func.func @transform_15(%arg0: i32) -> (i32, i32, i32) {
    %c0_i32 = arith.constant 0 : i32
    %c0_i32_0 = arith.constant 0 : i32
    %c0_i32_1 = arith.constant 0 : i32
    %c0_i32_2 = arith.constant 0 : i32
    return %c0_i32, %c0_i32_0, %c0_i32_1 : i32, i32, i32
  }
  func.func @transform_16(%arg0: i32) -> (i32, i32) {
    %c0_i32 = arith.constant 0 : i32
    %c0_i32_0 = arith.constant 0 : i32
    return %arg0, %c0_i32 : i32, i32
  }
}

</mosaic_0001>

<bundles_post_ra>
// kernel: forward.1
= control target key start
LH: loop header
LB: loop body
LE: loop exit
PB: predicated region body
PF: predicated region fallthrough
CT: control target
= control target key end

     0   :  { %s5903_s0 = inlined_call_operand.vmem [shape: f32[28,8,28], index: 0, kind: input, shape index: {}]   ;;  %s5904_s1 = inlined_call_operand.hbm [shape: f32[3,28,128], index: 1, kind: input, shape index: {}]   ;;  %s5905_s2 = inlined_call_operand.hbm [shape: f32[1,128], index: 2, kind: input, shape index: {}]   ;;  %s5906_s3 = inlined_call_operand.hbm [shape: f32[3,128,256], index: 3, kind: input, shape index: {}]   ;;  %s5907_s4 = inlined_call_operand.hbm [shape: f32[1,256], index: 4, kind: input, shape index: {}]   ;;  %s5908_s5 = inlined_call_operand.hbm [shape: f32[3,256,384], index: 5, kind: input, shape index: {}]   ;;  %s5909_s6 = inlined_call_operand.hbm [shape: f32[1,384], index: 6, kind: input, shape index: {}]   ;;  %s5910_s7 = inlined_call_operand.hbm [shape: f32[336,128], index: 7, kind: input, shape index: {}]   ;;  %s5911_s8 = inlined_call_operand.hbm [shape: f32[1,128], index: 8, kind: input, shape index: {}]   ;;  %s5912_s9 = inlined_call_operand.hbm [shape: f32[3,128,128], index: 9, kind: input, shape index: {}]   ;;  %s5913_s10 = inlined_call_operand.hbm [shape: f32[1,128], index: 10, kind: input, shape index: {}]   ;;  %s5914_s11 = inlined_call_operand.hbm [shape: f32[3,128,128], index: 11, kind: input, shape index: {}]   ;;  %s5915_s12 = inlined_call_operand.hbm [shape: f32[1,128], index: 12, kind: input, shape index: {}]   ;;  %s5916_s13 = inlined_call_operand.hbm [shape: f32[128,128], index: 13, kind: input, shape index: {}]   ;;  %s5917_s14 = inlined_call_operand.hbm [shape: f32[1,128], index: 14, kind: input, shape index: {}]   ;;  %s5918_s15 = inlined_call_operand.vmem [shape: f32[7,128,10], index: 15, kind: input, shape index: {}]   ;;  %s5919_s16 = inlined_call_operand.vmem [shape: f32[8,10], index: 16, kind: output, shape index: {}]  }
   0x1   :  { %5920 = sst [smem:[#allocation39_spill]] %s5903_s0 }
   0x2   :  { %21 = vsyncpa [#allocation10], 0 }
   0x3   :  { %22 = vsyncpa [#allocation12], 0 }
   0x4   :  { %23 = vsyncpa [#allocation15], 0 }
   0x5   :  { %24 = vsyncpa [#allocation18], 0 }
   0x6   :  { %25 = vsyncpa [#allocation21], 0 }
   0x7   :  { %26 = vsyncpa [#allocation24], 0 }
   0x8   :  { %27 = vsyncpa [#allocation27], 0 }
   0x9   :  { %28 = vsyncpa [#allocation30], 0  ;;  %s4845_s21 = smov [#allocation11]   ;;  %s4846_s23 = smov [#allocation14]  }
   0xa   :  { %s49_s22 = sshll.u32 %s4845_s21, 4  ;;  %s71_s24 = sshll.u32 %s4846_s23, 4  ;;  %s50_s22 = int_to_ptr.vmem [resolvable:$true] %s49_s22  ;;  %s72_s24 = int_to_ptr.vmem [resolvable:$true] %s71_s24 }
   0xb   :  { %s4501_s25 = scalar_lea.vmem %s50_s22, 16  ;;  %s4505_s26 = scalar_lea.vmem %s50_s22, 32 }
   0xc   :  { %p4502_p0 = scmp.ne.s32.totalorder %s50_s22, %s4501_s25  ;;  %p4506_p1 = scmp.lt.s32.totalorder %s50_s22, %s50_s22 }
   0xd   :  { %p4507_p2 = scmp.lt.s32.totalorder %s4505_s26, %s4501_s25 }
   0xf   :  { %p4508_p3 = por %p4507_p2, %p4506_p1 }
  0x11   :  { %p4509_p4 = pnand %p4508_p3, %p4502_p0 }
  0x13   :  { %4512 = shalt.err (!%p4509_p4)
}
  0x14   :  { %52 = dma.hbm_to_vmem [thread:$0]  %s5905_s2, 16, %s50_s22, [#allocation12]  }
  0x15   :  { %s4521_s29 = scalar_lea.vmem %s72_s24, 32  ;;  %p4526_p6 = scmp.lt.s32.totalorder %s72_s24, %s72_s24 }
  0x16   :  { %p4522_p5 = scmp.ne.s32.totalorder %s72_s24, %s4521_s29  ;;  %p4527_p7 = scmp.lt.s32.totalorder %s4521_s29, %s4521_s29 }
  0x18   :  { %p4528_p8 = por %p4527_p7, %p4526_p6 }
  0x1a   :  { %p4529_p9 = pnand %p4528_p8, %p4522_p5 }
  0x1c   :  { %4532 = shalt.err (!%p4529_p9)
}
  0x1d   :  { %74 = dma.hbm_to_vmem [thread:$0]  %s5907_s4, 32, %s72_s24, [#allocation15]  }
  0x1e   :  { %s4847_s17 = smov [#allocation17]   ;;  %s4848_s19 = smov [#allocation20]  }
  0x1f   :  { %s93_s18 = sshll.u32 %s4847_s17, 4  ;;  %s115_s20 = sshll.u32 %s4848_s19, 4  ;;  %s94_s18 = int_to_ptr.vmem [resolvable:$true] %s93_s18  ;;  %s116_s20 = int_to_ptr.vmem [resolvable:$true] %s115_s20 }
  0x20   :  { %s4541_s21 = scalar_lea.vmem %s94_s18, 48  ;;  %s4545_s2 = scalar_lea.vmem %s94_s18, 64 }
  0x21   :  { %p4542_p10 = scmp.ne.s32.totalorder %s94_s18, %s4541_s21  ;;  %p4546_p11 = scmp.lt.s32.totalorder %s94_s18, %s94_s18 }
  0x22   :  { %p4547_p12 = scmp.lt.s32.totalorder %s4545_s2, %s4541_s21 }
  0x24   :  { %p4548_p13 = por %p4547_p12, %p4546_p11 }
  0x26   :  { %p4549_p0 = pnand %p4548_p13, %p4542_p10 }
  0x28   :  { %4552 = shalt.err (!%p4549_p0)
}
  0x29   :  { %96 = dma.hbm_to_vmem [thread:$0]  %s5909_s6, 48, %s94_s18, [#allocation18]  }
  0x2a   :  { %s4561_s25 = scalar_lea.vmem %s116_s20, 16  ;;  %s4565_s4 = scalar_lea.vmem %s116_s20, 32 }
  0x2b   :  { %p4562_p1 = scmp.ne.s32.totalorder %s116_s20, %s4561_s25  ;;  %p4566_p2 = scmp.lt.s32.totalorder %s116_s20, %s116_s20 }
  0x2c   :  { %p4567_p3 = scmp.lt.s32.totalorder %s4565_s4, %s4561_s25 }
  0x2e   :  { %p4568_p4 = por %p4567_p3, %p4566_p2 }
  0x30   :  { %p4569_p5 = pnand %p4568_p4, %p4562_p1 }
  0x32   :  { %4572 = shalt.err (!%p4569_p5)
}
  0x33   :  { %118 = dma.hbm_to_vmem [thread:$0]  %s5911_s8, 16, %s116_s20, [#allocation21]  }
  0x34   :  { %s4849_s27 = smov [#allocation23]   ;;  %s4850_s29 = smov [#allocation26]  }
  0x35   :  { %s137_s28 = sshll.u32 %s4849_s27, 4  ;;  %s159_s30 = sshll.u32 %s4850_s29, 4  ;;  %s138_s28 = int_to_ptr.vmem [resolvable:$true] %s137_s28  ;;  %s160_s30 = int_to_ptr.vmem [resolvable:$true] %s159_s30 }
  0x36   :  { %s4581_s0 = scalar_lea.vmem %s138_s28, 16  ;;  %s4585_s6 = scalar_lea.vmem %s138_s28, 32 }
  0x37   :  { %p4582_p6 = scmp.ne.s32.totalorder %s138_s28, %s4581_s0  ;;  %p4586_p7 = scmp.lt.s32.totalorder %s138_s28, %s138_s28 }
  0x38   :  { %p4587_p8 = scmp.lt.s32.totalorder %s4585_s6, %s4581_s0 }
  0x3a   :  { %p4588_p9 = por %p4587_p8, %p4586_p7 }
  0x3c   :  { %p4589_p10 = pnand %p4588_p9, %p4582_p6 }
  0x3e   :  { %4592 = shalt.err (!%p4589_p10)
}
  0x3f   :  { %140 = dma.hbm_to_vmem [thread:$0]  %s5913_s10, 16, %s138_s28, [#allocation24]  }
  0x40   :  { %s4601_s19 = scalar_lea.vmem %s160_s30, 16  ;;  %s4605_s8 = scalar_lea.vmem %s160_s30, 32 }
  0x41   :  { %p4602_p11 = scmp.ne.s32.totalorder %s160_s30, %s4601_s19  ;;  %p4606_p12 = scmp.lt.s32.totalorder %s160_s30, %s160_s30 }
  0x42   :  { %p4607_p13 = scmp.lt.s32.totalorder %s4605_s8, %s4601_s19 }
  0x44   :  { %p4608_p0 = por %p4607_p13, %p4606_p12 }
  0x46   :  { %p4609_p1 = pnand %p4608_p0, %p4602_p11 }
  0x48   :  { %4612 = shalt.err (!%p4609_p1)
}
  0x49   :  { %162 = dma.hbm_to_vmem [thread:$0]  %s5915_s12, 16, %s160_s30, [#allocation27]  }
  0x4a   :  { %s4851_s2 = smov [#allocation9]  }
  0x4b   :  { %s36_s22 = sshll.u32 %s4851_s2, 4  ;;  %s37_s22 = int_to_ptr.vmem [resolvable:$true] %s36_s22 }
  0x4c   :  { %s4621_s23 = scalar_lea.vmem %s37_s22, 1536  ;;  %p4626_p3 = scmp.lt.s32.totalorder %s37_s22, %s37_s22 }
  0x4d   :  { %p4622_p2 = scmp.ne.s32.totalorder %s37_s22, %s4621_s23  ;;  %p4627_p4 = scmp.lt.s32.totalorder %s4621_s23, %s4621_s23 }
  0x4f   :  { %p4628_p5 = por %p4627_p4, %p4626_p3 }
  0x51   :  { %p4629_p6 = pnand %p4628_p5, %p4622_p2 }
  0x53   :  { %4632 = shalt.err (!%p4629_p6)
}
  0x54   :  { %s4852_s10 = smov 128   ;;  %s4853_s25 = smov 8  }
  0x55   :  { %42 = dma.hbm_to_vmem [thread:$0]  %s5904_s1, 1536, %s37_s22, [#allocation10], %s4852_s10, %s4852_s10, %s4853_s25  }
  0x56   :  { %s4854_s12 = smov [#allocation13]  }
  0x57   :  { %s58_s26 = sshll.u32 %s4854_s12, 4  ;;  %s59_s26 = int_to_ptr.vmem [resolvable:$true] %s58_s26 }
  0x58   :  { %s4641_s27 = scalar_lea.vmem %s59_s26, 12288  ;;  %p4646_p8 = scmp.lt.s32.totalorder %s59_s26, %s59_s26 }
  0x59   :  { %p4642_p7 = scmp.ne.s32.totalorder %s59_s26, %s4641_s27  ;;  %p4647_p9 = scmp.lt.s32.totalorder %s4641_s27, %s4641_s27 }
  0x5b   :  { %p4648_p10 = por %p4647_p9, %p4646_p8 }
  0x5d   :  { %p4649_p11 = pnand %p4648_p10, %p4642_p7 }
  0x5f   :  { %4652 = shalt.err (!%p4649_p11)
}
  0x60   :  { %s4855_s28 = smov 256   ;;  %s4856_s29 = smov 16  }
  0x61   :  { %64 = dma.hbm_to_vmem [thread:$0]  %s5906_s3, 12288, %s59_s26, [#allocation12], %s4855_s28, %s4855_s28, %s4856_s29  }
  0x62   :  { %s4857_s6 = smov [#allocation16]  }
  0x63   :  { %s80_s17 = sshll.u32 %s4857_s6, 4  ;;  %s81_s17 = int_to_ptr.vmem [resolvable:$true] %s80_s17 }
  0x64   :  { %s4661_s1 = scalar_lea.vmem %s81_s17, 36864  ;;  %p4666_p13 = scmp.lt.s32.totalorder %s81_s17, %s81_s17 }
  0x65   :  { %p4662_p12 = scmp.ne.s32.totalorder %s81_s17, %s4661_s1  ;;  %p4667_p0 = scmp.lt.s32.totalorder %s4661_s1, %s4661_s1 }
  0x67   :  { %p4668_p1 = por %p4667_p0, %p4666_p13 }
  0x69   :  { %p4669_p2 = pnand %p4668_p1, %p4662_p12 }
  0x6b   :  { %4672 = shalt.err (!%p4669_p2)
}
  0x6c   :  { %s4858_s18 = smov 384   ;;  %s4859_s19 = smov 24  }
  0x6d   :  { %86 = dma.hbm_to_vmem [thread:$0]  %s5908_s5, 36864, %s81_s17, [#allocation15], %s4858_s18, %s4858_s18, %s4859_s19  }
  0x6e   :  { %s4860_s21 = smov [#allocation19]   ;;  %s4861_s3 = smov [#allocation22]  }
  0x6f   :  { %s102_s2 = sshll.u32 %s4860_s21, 4  ;;  %s124_s22 = sshll.u32 %s4861_s3, 4  ;;  %s103_s2 = int_to_ptr.vmem [resolvable:$true] %s102_s2  ;;  %s125_s22 = int_to_ptr.vmem [resolvable:$true] %s124_s22 }
  0x70   :  { %s4681_s23 = scalar_lea.vmem %s103_s2, 5376  ;;  %p4686_p4 = scmp.lt.s32.totalorder %s103_s2, %s103_s2 }
  0x71   :  { %p4682_p3 = scmp.ne.s32.totalorder %s103_s2, %s4681_s23  ;;  %p4687_p5 = scmp.lt.s32.totalorder %s4681_s23, %s4681_s23 }
  0x73   :  { %p4688_p6 = por %p4687_p5, %p4686_p4 }
  0x75   :  { %p4689_p7 = pnand %p4688_p6, %p4682_p3 }
  0x77   :  { %4692 = shalt.err (!%p4689_p7)
}
  0x78   :  { %108 = dma.hbm_to_vmem [thread:$0]  %s5910_s7, 5376, %s103_s2, [#allocation18], %s4852_s10, %s4852_s10, %s4853_s25  }
  0x79   :  { %s4701_s5 = scalar_lea.vmem %s125_s22, 6144  ;;  %p4706_p9 = scmp.lt.s32.totalorder %s125_s22, %s125_s22 }
  0x7a   :  { %p4702_p8 = scmp.ne.s32.totalorder %s125_s22, %s4701_s5  ;;  %p4707_p10 = scmp.lt.s32.totalorder %s4701_s5, %s4701_s5 }
  0x7c   :  { %p4708_p11 = por %p4707_p10, %p4706_p9 }
  0x7e   :  { %p4709_p12 = pnand %p4708_p11, %p4702_p8 }
  0x80   :  { %4712 = shalt.err (!%p4709_p12)
}
  0x81   :  { %130 = dma.hbm_to_vmem [thread:$0]  %s5912_s9, 6144, %s125_s22, [#allocation21], %s4852_s10, %s4852_s10, %s4853_s25  }
  0x82   :  { %s4862_s27 = smov [#allocation25]   ;;  %s4863_s29 = smov [#allocation28]  }
  0x83   :  { %s146_s28 = sshll.u32 %s4862_s27, 4  ;;  %s168_s7 = sshll.u32 %s4863_s29, 4  ;;  %s147_s28 = int_to_ptr.vmem [resolvable:$true] %s146_s28  ;;  %s169_s7 = int_to_ptr.vmem [resolvable:$true] %s168_s7 }
  0x84   :  { %s4721_s30 = scalar_lea.vmem %s147_s28, 6144  ;;  %p4726_p0 = scmp.lt.s32.totalorder %s147_s28, %s147_s28 }
  0x85   :  { %p4722_p13 = scmp.ne.s32.totalorder %s147_s28, %s4721_s30  ;;  %p4727_p1 = scmp.lt.s32.totalorder %s4721_s30, %s4721_s30 }
  0x87   :  { %p4728_p2 = por %p4727_p1, %p4726_p0 }
  0x89   :  { %p4729_p3 = pnand %p4728_p2, %p4722_p13 }
  0x8b   :  { %4732 = shalt.err (!%p4729_p3)
}
  0x8c   :  { %152 = dma.hbm_to_vmem [thread:$0]  %s5914_s11, 6144, %s147_s28, [#allocation24], %s4852_s10, %s4852_s10, %s4853_s25  }
  0x8d   :  { %s4741_s9 = scalar_lea.vmem %s169_s7, 2048  ;;  %p4746_p5 = scmp.lt.s32.totalorder %s169_s7, %s169_s7 }
  0x8e   :  { %p4742_p4 = scmp.ne.s32.totalorder %s169_s7, %s4741_s9  ;;  %p4747_p6 = scmp.lt.s32.totalorder %s4741_s9, %s4741_s9 }
  0x90   :  { %p4748_p7 = por %p4747_p6, %p4746_p5 }
  0x92   :  { %p4749_p8 = pnand %p4748_p7, %p4742_p4 }
  0x94   :  { %4752 = shalt.err (!%p4749_p8)
}
  0x95   :  { %174 = dma.hbm_to_vmem [thread:$0]  %s5916_s13, 2048, %s169_s7, [#allocation27], %s4852_s10, %s4852_s10, %s4853_s25  }
  0x96   :  { %s4864_s18 = smov [#allocation29]  }
  0x97   :  { %s181_s19 = sshll.u32 %s4864_s18, 4  ;;  %s182_s19 = int_to_ptr.vmem [resolvable:$true] %s181_s19 }
  0x98   :  { %s4761_s8 = scalar_lea.vmem %s182_s19, 16  ;;  %s4765_s11 = scalar_lea.vmem %s182_s19, 32 }
  0x99   :  { %p4762_p9 = scmp.ne.s32.totalorder %s182_s19, %s4761_s8  ;;  %p4766_p10 = scmp.lt.s32.totalorder %s182_s19, %s182_s19 }
  0x9a   :  { %p4767_p11 = scmp.lt.s32.totalorder %s4765_s11, %s4761_s8 }
  0x9c   :  { %p4768_p12 = por %p4767_p11, %p4766_p10 }
  0x9e   :  { %p4769_p13 = pnand %p4768_p12, %p4762_p9 }
  0xa0   :  { %4772 = shalt.err (!%p4769_p13)
}
  0xa1   :  { %184 = dma.hbm_to_vmem [thread:$0]  %s5917_s14, 16, %s182_s19, [#allocation30]  }
  0xa2   :  { %4801 = dma.done.wait [#allocation10], 1536  }
  0xa3   :  { %4802 = vsyncadd [#allocation10], 4294965760 }
  0xa4   :  { %4803 = dma.done.wait [#allocation12], 12304  }
  0xa5   :  { %4804 = vsyncadd [#allocation12], 4294954992 }
  0xa6   :  { %4805 = dma.done.wait [#allocation15], 36896  }
  0xa7   :  { %4806 = vsyncadd [#allocation15], 4294930400 }
  0xa8   :  { %4807 = dma.done.wait [#allocation18], 5424  }
  0xa9   :  { %4808 = vsyncadd [#allocation18], 4294961872 }
  0xaa   :  { %4809 = dma.done.wait [#allocation21], 6160  }
  0xab   :  { %4810 = vsyncadd [#allocation21], 4294961136 }
  0xac   :  { %4811 = dma.done.wait [#allocation24], 6160  }
  0xad   :  { %4812 = vsyncadd [#allocation24], 4294961136 }
  0xae   :  { %4813 = dma.done.wait [#allocation27], 2064  }
  0xaf   :  { %4814 = vsyncadd [#allocation27], 4294965232 }
  0xb0   :  { %4815 = dma.done.wait [#allocation30], 16  }
  0xb1   :  { %4816 = vsyncadd [#allocation30], 4294967280  ;;  %v5021_v0 = vld [vmem:[#allocation11] ss:$0 sm:$0xff]  ;;  %s5023_s13 = smov 0  }
  0xb2 LB: > { %v251_v1 = vld [vmem:[#allocation9 + $0x38] sm:$0xf]  ;;  %vm256_vm0 = vcmask 1043456   ;;  %v4865_v3 = vmov 0.0   ;;  %v250_v4 = vld [vmem:[#allocation9 + $0x30] sm:$0xff]  ;;  %s3291_s14 = sshll.u32 %s4819_s13, 3  ;;  %s4819_s13 = sphi %s5023_s13, %s235_s13  }
  0xb3   : > { %v242_v2 = vld [vmem:[#allocation9 + $0x18] sm:$0xf]  ;;  %3848 = vmatprep.subr.mxu0 %v4865_v3  ;;  %3859 = vmatprep.subr.mxu1 %v4865_v3  ;;  %v241_v5 = vld [vmem:[#allocation9 + $0x10] sm:$0xff]  ;;  %v249_v6 = vld [vmem:[#allocation9 + $0x28] sm:$0xff]  ;;  %s5921_s2 = sld [smem:[#allocation39_spill]]  ;;  %vm252_vm1 = vcmask 228352  }
  0xb4   : > { %3849 = vmatpush3.msk.msra.mxu0 %vm256_vm0, %v251_v1  ;;  %3860 = vmatpush3.msk.msra.mxu1 %vm256_vm0, %v242_v2  ;;  %v240_v7 = vld [vmem:[#allocation9 + $0x8] sm:$0xff]  ;;  %v248_v8 = vld [vmem:[#allocation9 + $0x20] sm:$0xff]  ;;  %vm4866_vm2 = vmmov 0   ;;  %v414_v12 = vld [vmem:[#allocation9 + $0x58] sm:$0xf]  ;;  %s500_s22 = scalar_lea.vmem [#allocation2], %s3291_s14 }
  0xb5   : > { %3850 = vmatprep.subr.mxu0 %v4865_v3  ;;  %3861 = vmatprep.subr.mxu1 %v4865_v3  ;;  %v239_v10 = vld [vmem:[#allocation9] sm:$0xff]  ;;  %v413_v13 = vld [vmem:[#allocation9 + $0x50] sm:$0xff]  ;;  %v412_v14 = vld [vmem:[#allocation9 + $0x48] sm:$0xff]  ;;  %s235_s13 = sadd.s32 1, %s4819_s13  }
  0xb6   : > { %3851 = vmatpush3.msra.mxu0 %v250_v4  ;;  %3862 = vmatpush3.msra.mxu1 %v241_v5  ;;  %v411_v15 = vld [vmem:[#allocation9 + $0x40] sm:$0xff]  ;;  %p232_p0 = scmp.ge.s32.totalorder %s235_s13, 26  }
  0xb7   : > { %3852 = vmatprep.subr.mxu0 %v4865_v3  ;;  %3863 = vmatprep.subr.mxu1 %v4865_v3  ;;  %v5051_v27 = vld [vmem:[#allocation14] sm:$0x3] (%p232_p0)  ;;  %s5053_s23 = smov (%p232_p0), 0  }
  0xb8   : > { %3853 = vmatpush3.msra.mxu0 %v249_v6  ;;  %3864 = vmatpush3.msra.mxu1 %v240_v7 }
  0xb9   : > { %s5036_s3 = scalar_lea.vmem %s5921_s2, %s3291_s14  ;;  %3854 = vmatprep.subr.mxu0 %v4865_v3  ;;  %3856 = vmatprep.mubr.msk.f32.mxu0 %vm4866_vm2, %v4865_v3 }
  0xba   : > { %v3293_v9 = vld [vmem:[%s5036_s3 + $0x8] sm:$0xff]  ;;  %3855 = vmatpush3.msra.mxu0 %v248_v8  ;;  %3865 = vmatprep.subr.mxu1 %v4865_v3  ;;  %v238_v11 = vld [vmem:[%s5036_s3] sm:$0xff]  ;;  %v3299_v16 = vld [vmem:[%s5036_s3 + $0x10] sm:$0xff] }
  0xbb   : > { %3857 = vmatmul.mubr.msk.f32.vlgmr.msra.gmra.mxu0 %vm252_vm1, %v3293_v9  ;;  %3866 = vmatpush3.msra.mxu1 %v239_v10 }
  0xbc   : > { %3867 = vmatprep.mubr.msk.f32.mxu1 %vm4866_vm2, %v4865_v3  ;;  %3870 = vmatprep.subr.mxu0 %v4865_v3 }
  0xbd   : > { %3868 = vmatmul.mubr.msk.f32.vlgmr.msra.gmra.mxu1 %vm252_vm1, %v238_v11  ;;  %3871 = vmatpush3.msk.msra.mxu0 %vm256_vm0, %v414_v12 }
  0xbe   : > { %3872 = vmatprep.subr.mxu0 %v4865_v3  ;;  %3878 = vmatprep.mubr.msk.f32.mxu0 %vm4866_vm2, %v4865_v3 }
  0xbf   : > { %3873 = vmatpush3.msra.mxu0 %v413_v13 }
  0xc0   : > { %3874 = vmatprep.subr.mxu0 %v4865_v3 }
  0xc1   : > { %3875 = vmatpush3.msra.mxu0 %v412_v14 }
  0xc2   : > { %3876 = vmatprep.subr.mxu0 %v4865_v3 }
  0xc3   : > { %3877 = vmatpush3.msra.mxu0 %v411_v15 }
  0xc4   : > { %3879 = vmatmul.mubr.msk.f32.vlgmr.msra.gmra.mxu0 %vm252_vm1, %v3299_v16 }
 0x17b   : > { %v326_v17 = vpop.f32.mrf.mxu0 }
 0x17d   : > { %v402_v18 = vpop.f32.mrf.mxu1  ;;  %v3858_v19 = vpop.f32.mrf.mxu0 }
 0x17e   : > { %v403_v21 = vadd.f32 %v402_v18, %v326_v17 }
 0x17f   : > { %v3869_v20 = vpop.f32.mrf.mxu1 }
 0x184   : > { %v487_v22 = vpop.f32.mrf.mxu0 }
 0x185   : > { %v491_v23 = vadd.f32 %v487_v22, %v403_v21 }
 0x186   : > { %v3880_v24 = vpop.f32.mrf.mxu0 }
 0x187   : > { %v498_v25 = vadd.f32 %v5021_v0, %v491_v23  ;;  %234 = sbr.rel (!%p232_p0) target bundleno = 178 (0xb2), region = 236 }
 0x189   : > { %v499_v26 = vmax.f32 %v498_v25, 0.0 }
 0x18b   : > { %501 = vst [vmem:[%s500_s22] sm:$0xff] %v499_v26 }
 0x18c LB: > { %v580_v28 = vld [vmem:[#allocation13 + $0x1f8] sm:$0xff]  ;;  %v579_v30 = vld [vmem:[#allocation13 + $0x1f0] sm:$0xff]  ;;  %v578_v32 = vld [vmem:[#allocation13 + $0x1e8] sm:$0xff]  ;;  %s3303_s4 = sshll.u32 %s4823_s23, 3  ;;  %s3440_s5 = sshll.u32 %s4823_s23, 4  ;;  %s4823_s23 = sphi %s5053_s23, %s508_s23  }
 0x18d   : > { %v543_v29 = vld [vmem:[#allocation13 + $0xf8] sm:$0xff]  ;;  %581 = vmatprep.subr.mxu0 %v580_v28  ;;  %v542_v31 = vld [vmem:[#allocation13 + $0xf0] sm:$0xff]  ;;  %v541_v33 = vld [vmem:[#allocation13 + $0xe8] sm:$0xff]  ;;  %s5059_s24 = scalar_lea.vmem [#allocation2], %s3303_s4  ;;  %s850_s12 = scalar_lea.vmem [#allocation3], %s3440_s5 }
 0x18e   : > { %652 = vmatprep.subr.mxu1 %v543_v29  ;;  %582 = vmatpush1.msra.mxu0 %v579_v30  ;;  %v577_v34 = vld [vmem:[#allocation13 + $0x1e0] sm:$0xff]  ;;  %v576_v36 = vld [vmem:[#allocation13 + $0x1d8] sm:$0xff]  ;;  %v575_v38 = vld [vmem:[#allocation13 + $0x1d0] sm:$0xff]  ;;  %s508_s23 = sadd.s32 1, %s4823_s23  }
 0x18f   : > { %653 = vmatpush1.msra.mxu1 %v542_v31  ;;  %v540_v35 = vld [vmem:[#allocation13 + $0xe0] sm:$0xff]  ;;  %583 = vmatprep.subr.mxu0 %v578_v32  ;;  %v539_v37 = vld [vmem:[#allocation13 + $0xd8] sm:$0xff]  ;;  %v538_v39 = vld [vmem:[#allocation13 + $0xd0] sm:$0xff]  ;;  %v4867_v31 = vmov 0.0   ;;  %p505_p1 = scmp.ge.s32.totalorder %s508_s23, 24  }
 0x190   : > { %654 = vmatprep.subr.mxu1 %v541_v33  ;;  %584 = vmatpush1.msra.mxu0 %v577_v34  ;;  %v574_v40 = vld [vmem:[#allocation13 + $0x1c8] sm:$0xff]  ;;  %v573_v42 = vld [vmem:[#allocation13 + $0x1c0] sm:$0xff]  ;;  %v572_v44 = vld [vmem:[#allocation13 + $0x1b8] sm:$0xff]  ;;  %s5080_s26 = smov (%p505_p1), 0  }
 0x191   : > { %655 = vmatpush1.msra.mxu1 %v540_v35  ;;  %v537_v41 = vld [vmem:[#allocation13 + $0xc8] sm:$0xff]  ;;  %585 = vmatprep.subr.mxu0 %v576_v36  ;;  %v536_v43 = vld [vmem:[#allocation13 + $0xc0] sm:$0xff]  ;;  %v535_v45 = vld [vmem:[#allocation13 + $0xb8] sm:$0xff] }
 0x192   : > { %656 = vmatprep.subr.mxu1 %v539_v37  ;;  %586 = vmatpush1.msra.mxu0 %v575_v38  ;;  %v571_v46 = vld [vmem:[#allocation13 + $0x1b0] sm:$0xff]  ;;  %v570_v48 = vld [vmem:[#allocation13 + $0x1a8] sm:$0xff]  ;;  %v569_v50 = vld [vmem:[#allocation13 + $0x1a0] sm:$0xff] }
 0x193   : > { %657 = vmatpush1.msra.mxu1 %v538_v39  ;;  %587 = vmatprep.subr.mxu0 %v574_v40  ;;  %v534_v47 = vld [vmem:[#allocation13 + $0xb0] sm:$0xff]  ;;  %v533_v49 = vld [vmem:[#allocation13 + $0xa8] sm:$0xff]  ;;  %v532_v51 = vld [vmem:[#allocation13 + $0xa0] sm:$0xff] }
 0x194   : > { %658 = vmatprep.subr.mxu1 %v537_v41  ;;  %588 = vmatpush1.msra.mxu0 %v573_v42  ;;  %v568_v52 = vld [vmem:[#allocation13 + $0x198] sm:$0xff]  ;;  %v567_v54 = vld [vmem:[#allocation13 + $0x190] sm:$0xff]  ;;  %v566_v56 = vld [vmem:[#allocation13 + $0x188] sm:$0xff] }
 0x195   : > { %659 = vmatpush1.msra.mxu1 %v536_v43  ;;  %589 = vmatprep.subr.mxu0 %v572_v44  ;;  %v531_v53 = vld [vmem:[#allocation13 + $0x98] sm:$0xff]  ;;  %v530_v55 = vld [vmem:[#allocation13 + $0x90] sm:$0xff]  ;;  %v529_v57 = vld [vmem:[#allocation13 + $0x88] sm:$0xff] }
 0x196   : > { %660 = vmatprep.subr.mxu1 %v535_v45  ;;  %590 = vmatpush1.msra.mxu0 %v571_v46  ;;  %v565_v58 = vld [vmem:[#allocation13 + $0x180] sm:$0xff]  ;;  %v564_v60 = vld [vmem:[#allocation13 + $0x178] sm:$0xff]  ;;  %v563_v62 = vld [vmem:[#allocation13 + $0x170] sm:$0xff] }
 0x197   : > { %661 = vmatpush1.msra.mxu1 %v534_v47  ;;  %591 = vmatprep.subr.mxu0 %v570_v48  ;;  %v528_v59 = vld [vmem:[#allocation13 + $0x80] sm:$0xff]  ;;  %v527_v61 = vld [vmem:[#allocation13 + $0x78] sm:$0xff]  ;;  %v526_v63 = vld [vmem:[#allocation13 + $0x70] sm:$0xff] }
 0x198   : > { %662 = vmatprep.subr.mxu1 %v533_v49  ;;  %592 = vmatpush1.msra.mxu0 %v569_v50  ;;  %v562_v0 = vld [vmem:[#allocation13 + $0x168] sm:$0xff]  ;;  %v561_v2 = vld [vmem:[#allocation13 + $0x160] sm:$0xff]  ;;  %v560_v4 = vld [vmem:[#allocation13 + $0x158] sm:$0xff] }
 0x199   : > { %663 = vmatpush1.msra.mxu1 %v532_v51  ;;  %593 = vmatprep.subr.mxu0 %v568_v52  ;;  %v525_v1 = vld [vmem:[#allocation13 + $0x68] sm:$0xff]  ;;  %v524_v3 = vld [vmem:[#allocation13 + $0x60] sm:$0xff]  ;;  %v523_v5 = vld [vmem:[#allocation13 + $0x58] sm:$0xff] }
 0x19a   : > { %664 = vmatprep.subr.mxu1 %v531_v53  ;;  %594 = vmatpush1.msra.mxu0 %v567_v54  ;;  %v559_v6 = vld [vmem:[#allocation13 + $0x150] sm:$0xff]  ;;  %v558_v8 = vld [vmem:[#allocation13 + $0x148] sm:$0xff]  ;;  %v557_v10 = vld [vmem:[#allocation13 + $0x140] sm:$0xff] }
 0x19b   : > { %665 = vmatpush1.msra.mxu1 %v530_v55  ;;  %595 = vmatprep.subr.mxu0 %v566_v56  ;;  %v522_v7 = vld [vmem:[#allocation13 + $0x50] sm:$0xff]  ;;  %v521_v9 = vld [vmem:[#allocation13 + $0x48] sm:$0xff]  ;;  %v520_v11 = vld [vmem:[#allocation13 + $0x40] sm:$0xff] }
 0x19c   : > { %666 = vmatprep.subr.mxu1 %v529_v57  ;;  %596 = vmatpush1.msra.mxu0 %v565_v58  ;;  %v556_v12 = vld [vmem:[#allocation13 + $0x138] sm:$0xff]  ;;  %v555_v14 = vld [vmem:[#allocation13 + $0x130] sm:$0xff]  ;;  %v554_v16 = vld [vmem:[#allocation13 + $0x128] sm:$0xff] }
 0x19d   : > { %667 = vmatpush1.msra.mxu1 %v528_v59  ;;  %597 = vmatprep.subr.mxu0 %v564_v60  ;;  %v519_v13 = vld [vmem:[#allocation13 + $0x38] sm:$0xff]  ;;  %v518_v15 = vld [vmem:[#allocation13 + $0x30] sm:$0xff]  ;;  %v517_v17 = vld [vmem:[#allocation13 + $0x28] sm:$0xff] }
 0x19e   : > { %668 = vmatprep.subr.mxu1 %v527_v61  ;;  %598 = vmatpush1.msra.mxu0 %v563_v62  ;;  %v553_v18 = vld [vmem:[#allocation13 + $0x120] sm:$0xff]  ;;  %v552_v20 = vld [vmem:[#allocation13 + $0x118] sm:$0xff]  ;;  %v551_v22 = vld [vmem:[#allocation13 + $0x110] sm:$0xff] }
 0x19f   : > { %669 = vmatpush1.msra.mxu1 %v526_v63  ;;  %599 = vmatprep.subr.mxu0 %v562_v0  ;;  %v516_v19 = vld [vmem:[#allocation13 + $0x20] sm:$0xff]  ;;  %v515_v21 = vld [vmem:[#allocation13 + $0x18] sm:$0xff]  ;;  %v514_v23 = vld [vmem:[#allocation13 + $0x10] sm:$0xff] }
 0x1a0   : > { %670 = vmatprep.subr.mxu1 %v525_v1  ;;  %600 = vmatpush1.msra.mxu0 %v561_v2  ;;  %v550_v24 = vld [vmem:[#allocation13 + $0x108] sm:$0xff]  ;;  %v549_v26 = vld [vmem:[#allocation13 + $0x100] sm:$0xff]  ;;  %v3305_v29 = vld [vmem:[%s5059_s24 + $0x8] sm:$0xff]  ;;  %v834_v1 = vlaneseq }
 0x1a1   : > { %671 = vmatpush1.msra.mxu1 %v524_v3  ;;  %601 = vmatprep.subr.mxu0 %v560_v4  ;;  %v513_v25 = vld [vmem:[#allocation13 + $0x8] sm:$0xff]  ;;  %v512_v28 = vld [vmem:[#allocation13] sm:$0xff]  ;;  %v759_v32 = vld [vmem:[#allocation13 + $0x2f8] sm:$0xff] }
 0x1a2   : > { %672 = vmatprep.subr.mxu1 %v523_v5  ;;  %602 = vmatpush1.msra.mxu0 %v559_v6  ;;  %v511_v30 = vld [vmem:[%s5059_s24] sm:$0xff]  ;;  %v756_v35 = vld [vmem:[#allocation13 + $0x2e0] sm:$0xff]  ;;  %v755_v36 = vld [vmem:[#allocation13 + $0x2d8] sm:$0xff]  ;;  %v5064_v2 = vshrl.u32 %v834_v1, 7 }
 0x1a3   : > { %673 = vmatpush1.msra.mxu1 %v522_v7  ;;  %603 = vmatprep.subr.mxu0 %v558_v8  ;;  %v758_v33 = vld [vmem:[#allocation13 + $0x2f0] sm:$0xff]  ;;  %v757_v34 = vld [vmem:[#allocation13 + $0x2e8] sm:$0xff]  ;;  %v752_v39 = vld [vmem:[#allocation13 + $0x2c0] sm:$0xff] }
 0x1a4   : > { %674 = vmatprep.subr.mxu1 %v521_v9  ;;  %604 = vmatpush1.msra.mxu0 %v557_v10  ;;  %v754_v37 = vld [vmem:[#allocation13 + $0x2d0] sm:$0xff]  ;;  %v753_v38 = vld [vmem:[#allocation13 + $0x2c8] sm:$0xff]  ;;  %v751_v40 = vld [vmem:[#allocation13 + $0x2b8] sm:$0xff]  ;;  %v836_v5 = vsub.s32 0, %v5064_v2  ;;  %v840_v6 = vsub.s32 1, %v5064_v2 }
 0x1a5   : > { %675 = vmatpush1.msra.mxu1 %v520_v11  ;;  %605 = vmatprep.subr.mxu0 %v556_v12  ;;  %v750_v41 = vld [vmem:[#allocation13 + $0x2b0] sm:$0xff]  ;;  %v749_v42 = vld [vmem:[#allocation13 + $0x2a8] sm:$0xff]  ;;  %v748_v43 = vld [vmem:[#allocation13 + $0x2a0] sm:$0xff] }
 0x1a6   : > { %676 = vmatprep.subr.mxu1 %v519_v13  ;;  %606 = vmatpush1.msra.mxu0 %v555_v14  ;;  %v747_v44 = vld [vmem:[#allocation13 + $0x298] sm:$0xff]  ;;  %v746_v45 = vld [vmem:[#allocation13 + $0x290] sm:$0xff]  ;;  %v745_v46 = vld [vmem:[#allocation13 + $0x288] sm:$0xff]  ;;  %v837_v10 = vrot.slane %v5051_v27, %v836_v5  ;;  %v841_v14 = vrot.slane %v5051_v27, %v840_v6 }
 0x1a7   : > { %677 = vmatpush1.msra.mxu1 %v518_v15  ;;  %607 = vmatprep.subr.mxu0 %v554_v16  ;;  %v744_v47 = vld [vmem:[#allocation13 + $0x280] sm:$0xff]  ;;  %v743_v48 = vld [vmem:[#allocation13 + $0x278] sm:$0xff]  ;;  %v742_v49 = vld [vmem:[#allocation13 + $0x270] sm:$0xff] }
 0x1a8   : > { %678 = vmatprep.subr.mxu1 %v517_v17  ;;  %608 = vmatpush1.msra.mxu0 %v553_v18  ;;  %v741_v50 = vld [vmem:[#allocation13 + $0x268] sm:$0xff]  ;;  %v740_v51 = vld [vmem:[#allocation13 + $0x260] sm:$0xff]  ;;  %v739_v52 = vld [vmem:[#allocation13 + $0x258] sm:$0xff] }
 0x1a9   : > { %679 = vmatpush1.msra.mxu1 %v516_v19  ;;  %609 = vmatprep.subr.mxu0 %v552_v20  ;;  %v738_v53 = vld [vmem:[#allocation13 + $0x250] sm:$0xff]  ;;  %v737_v54 = vld [vmem:[#allocation13 + $0x248] sm:$0xff]  ;;  %v736_v55 = vld [vmem:[#allocation13 + $0x240] sm:$0xff] }
 0x1aa   : > { %680 = vmatprep.subr.mxu1 %v515_v21  ;;  %610 = vmatpush1.msra.mxu0 %v551_v22  ;;  %v735_v56 = vld [vmem:[#allocation13 + $0x238] sm:$0xff]  ;;  %v734_v57 = vld [vmem:[#allocation13 + $0x230] sm:$0xff]  ;;  %v733_v58 = vld [vmem:[#allocation13 + $0x228] sm:$0xff] }
 0x1ab   : > { %681 = vmatpush1.msra.mxu1 %v514_v23  ;;  %611 = vmatprep.subr.mxu0 %v550_v24  ;;  %v732_v59 = vld [vmem:[#allocation13 + $0x220] sm:$0xff]  ;;  %v731_v60 = vld [vmem:[#allocation13 + $0x218] sm:$0xff]  ;;  %v730_v61 = vld [vmem:[#allocation13 + $0x210] sm:$0xff] }
 0x1ac   : > { %682 = vmatprep.subr.mxu1 %v513_v25  ;;  %612 = vmatpush1.msra.mxu0 %v549_v26  ;;  %v729_v62 = vld [vmem:[#allocation13 + $0x208] sm:$0xff]  ;;  %v728_v63 = vld [vmem:[#allocation13 + $0x200] sm:$0xff] }
 0x1ad   : > { %645 = vmatprep.mubr.f32.mxu0 %v4867_v31  ;;  %683 = vmatpush1.msra.mxu1 %v512_v28  ;;  %v3307_v0 = vld [vmem:[%s5059_s24 + $0x10] sm:$0xff] }
 0x1ae   : > { %716 = vmatprep.mubr.f32.mxu1 %v4867_v31  ;;  %646 = vmatmul.mubr.f32.vlgmr.msra.gmra.mxu0 %v3305_v29  ;;  %v5078_v21 = vld [vmem:[#allocation17] sm:$0x7] (%p505_p1) }
 0x1af   : > { %717 = vmatmul.mubr.f32.vlgmr.msra.gmra.mxu1 %v511_v30  ;;  %760 = vmatprep.subr.mxu0 %v759_v32 }
 0x1b0   : > { %824 = vmatprep.mubr.f32.mxu0 %v4867_v31  ;;  %761 = vmatpush1.msra.mxu0 %v758_v33 }
 0x1b1   : > { %762 = vmatprep.subr.mxu0 %v757_v34 }
 0x1b2   : > { %763 = vmatpush1.msra.mxu0 %v756_v35 }
 0x1b3   : > { %764 = vmatprep.subr.mxu0 %v755_v36 }
 0x1b4   : > { %765 = vmatpush1.msra.mxu0 %v754_v37 }
 0x1b5   : > { %766 = vmatprep.subr.mxu0 %v753_v38 }
 0x1b6   : > { %767 = vmatpush1.msra.mxu0 %v752_v39 }
 0x1b7   : > { %768 = vmatprep.subr.mxu0 %v751_v40 }
 0x1b8   : > { %769 = vmatpush1.msra.mxu0 %v750_v41 }
 0x1b9   : > { %770 = vmatprep.subr.mxu0 %v749_v42 }
 0x1ba   : > { %771 = vmatpush1.msra.mxu0 %v748_v43 }
 0x1bb   : > { %772 = vmatprep.subr.mxu0 %v747_v44 }
 0x1bc   : > { %773 = vmatpush1.msra.mxu0 %v746_v45 }
 0x1bd   : > { %774 = vmatprep.subr.mxu0 %v745_v46 }
 0x1be   : > { %775 = vmatpush1.msra.mxu0 %v744_v47 }
 0x1bf   : > { %776 = vmatprep.subr.mxu0 %v743_v48 }
 0x1c0   : > { %777 = vmatpush1.msra.mxu0 %v742_v49 }
 0x1c1   : > { %778 = vmatprep.subr.mxu0 %v741_v50 }
 0x1c2   : > { %779 = vmatpush1.msra.mxu0 %v740_v51 }
 0x1c3   : > { %780 = vmatprep.subr.mxu0 %v739_v52 }
 0x1c4   : > { %781 = vmatpush1.msra.mxu0 %v738_v53 }
 0x1c5   : > { %782 = vmatprep.subr.mxu0 %v737_v54 }
 0x1c6   : > { %783 = vmatpush1.msra.mxu0 %v736_v55 }
 0x1c7   : > { %784 = vmatprep.subr.mxu0 %v735_v56 }
 0x1c8   : > { %785 = vmatpush1.msra.mxu0 %v734_v57 }
 0x1c9   : > { %786 = vmatprep.subr.mxu0 %v733_v58 }
 0x1ca   : > { %787 = vmatpush1.msra.mxu0 %v732_v59 }
 0x1cb   : > { %788 = vmatprep.subr.mxu0 %v731_v60 }
 0x1cc   : > { %789 = vmatpush1.msra.mxu0 %v730_v61 }
 0x1cd   : > { %790 = vmatprep.subr.mxu0 %v729_v62 }
 0x1ce   : > { %791 = vmatpush1.msra.mxu0 %v728_v63 }
 0x1cf   : > { %825 = vmatmul.mubr.f32.vlgmr.msra.gmra.mxu0 %v3307_v0 }
 0x26e   : > { %v647_v3 = vpop.f32.mrf.mxu0 }
 0x26f   : > { %v718_v4 = vpop.f32.mrf.mxu1 }
 0x270   : > { %v649_v7 = vpop.f32.mrf.mxu0  ;;  %v719_v9 = vadd.f32 %v718_v4, %v647_v3 }
 0x271   : > { %v720_v8 = vpop.f32.mrf.mxu1 }
 0x272   : > { %v721_v12 = vadd.f32 %v720_v8, %v649_v7 }
 0x28f   : > { %v826_v11 = vpop.f32.mrf.mxu0 }
 0x290   : > { %v831_v13 = vadd.f32 %v826_v11, %v719_v9 }
 0x291   : > { %v828_v15 = vpop.f32.mrf.mxu0 }
 0x292   : > { %v844_v16 = vadd.f32 %v837_v10, %v831_v13  ;;  %v832_v17 = vadd.f32 %v828_v15, %v721_v12 }
 0x294   : > { %v846_v18 = vmax.f32 %v844_v16, 0.0  ;;  %v845_v19 = vadd.f32 %v841_v14, %v832_v17  ;;  %507 = sbr.rel (!%p505_p1) target bundleno = 396 (0x18c), region = 247 }
 0x296   : > { %851 = vst [vmem:[%s850_s12] sm:$0xff] %v846_v18  ;;  %v847_v20 = vmax.f32 %v845_v19, 0.0 }
 0x298   : > { %852 = vst [vmem:[%s850_s12 + $0x8] sm:$0xff] %v847_v20 }
 0x299 LB: > { %v1014_v22 = vld [vmem:[#allocation16 + $0x470] sm:$0xff]  ;;  %v1063_v23 = vld [vmem:[#allocation16 + $0x5f8] sm:$0xff]  ;;  %v1013_v24 = vld [vmem:[#allocation16 + $0x468] sm:$0xff]  ;;  %s3441_s27 = sshll.u32 %s4827_s26, 4  ;;  %s3442_s29 = smul.u32 24, %s4827_s26  ;;  %s4827_s26 = sphi %s5080_s26, %s859_s26  }
 0x29a   : > { %1064 = vmatprep.subr.mxu0 %v1014_v22  ;;  %3459 = vmatprep.subr.mxu1 %v1063_v23  ;;  %v1015_v25 = vld [vmem:[#allocation16 + $0x478] sm:$0xff]  ;;  %v1060_v28 = vld [vmem:[#allocation16 + $0x5e0] sm:$0xff]  ;;  %v1010_v29 = vld [vmem:[#allocation16 + $0x450] sm:$0xff]  ;;  %s5086_s28 = scalar_lea.vmem [#allocation3], %s3441_s27  ;;  %s859_s26 = sadd.s32 1, %s4827_s26  }
 0x29b   : > { %v1011_v26 = vld [vmem:[#allocation16 + $0x458] sm:$0xff]  ;;  %1065 = vmatpush1.msra.mxu0 %v1013_v24  ;;  %3460 = vmatpush3.msra.mxu1 %v1015_v25  ;;  %v1012_v27 = vld [vmem:[#allocation16 + $0x460] sm:$0xff]  ;;  %v1057_v31 = vld [vmem:[#allocation16 + $0x5c8] sm:$0xff]  ;;  %s1617_s7 = scalar_lea.vmem [#allocation4], %s3442_s29  ;;  %p856_p2 = scmp.ge.s32.totalorder %s859_s26, 22  }
 0x29c   : > { %v1008_v30 = vld [vmem:[#allocation16 + $0x440] sm:$0xff]  ;;  %1066 = vmatprep.subr.mxu0 %v1011_v26  ;;  %3461 = vmatprep.subr.mxu1 %v1060_v28  ;;  %v1007_v32 = vld [vmem:[#allocation16 + $0x438] sm:$0xff]  ;;  %v1009_v33 = vld [vmem:[#allocation16 + $0x448] sm:$0xff]  ;;  %s5204_s30 = smov (%p856_p2), 0  }
 0x29d   : > { %1067 = vmatpush1.msra.mxu0 %v1010_v29  ;;  %3462 = vmatpush3.msra.mxu1 %v1012_v27  ;;  %v1005_v34 = vld [vmem:[#allocation16 + $0x428] sm:$0xff]  ;;  %v1054_v35 = vld [vmem:[#allocation16 + $0x5b0] sm:$0xff]  ;;  %v1004_v36 = vld [vmem:[#allocation16 + $0x420] sm:$0xff] }
 0x29e   : > { %1068 = vmatprep.subr.mxu0 %v1008_v30  ;;  %3463 = vmatprep.subr.mxu1 %v1057_v31  ;;  %v1006_v37 = vld [vmem:[#allocation16 + $0x430] sm:$0xff]  ;;  %v1051_v39 = vld [vmem:[#allocation16 + $0x598] sm:$0xff]  ;;  %v1001_v40 = vld [vmem:[#allocation16 + $0x408] sm:$0xff] }
 0x29f   : > { %1069 = vmatpush1.msra.mxu0 %v1007_v32  ;;  %3464 = vmatpush3.msra.mxu1 %v1009_v33  ;;  %v1002_v38 = vld [vmem:[#allocation16 + $0x410] sm:$0xff]  ;;  %v1003_v41 = vld [vmem:[#allocation16 + $0x418] sm:$0xff]  ;;  %v1048_v43 = vld [vmem:[#allocation16 + $0x580] sm:$0xff] }
 0x2a0   : > { %1070 = vmatprep.subr.mxu0 %v1005_v34  ;;  %3465 = vmatprep.subr.mxu1 %v1054_v35  ;;  %v999_v42 = vld [vmem:[#allocation16 + $0x3f8] sm:$0xff]  ;;  %v998_v44 = vld [vmem:[#allocation16 + $0x3f0] sm:$0xff]  ;;  %v1000_v45 = vld [vmem:[#allocation16 + $0x400] sm:$0xff] }
 0x2a1   : > { %1071 = vmatpush1.msra.mxu0 %v1004_v36  ;;  %3466 = vmatpush3.msra.mxu1 %v1006_v37  ;;  %v996_v46 = vld [vmem:[#allocation16 + $0x3e0] sm:$0xff]  ;;  %v1045_v47 = vld [vmem:[#allocation16 + $0x568] sm:$0xff]  ;;  %v995_v48 = vld [vmem:[#allocation16 + $0x3d8] sm:$0xff] }
 0x2a2   : > { %1072 = vmatprep.subr.mxu0 %v1002_v38  ;;  %3467 = vmatprep.subr.mxu1 %v1051_v39  ;;  %v997_v49 = vld [vmem:[#allocation16 + $0x3e8] sm:$0xff]  ;;  %v1042_v51 = vld [vmem:[#allocation16 + $0x550] sm:$0xff]  ;;  %v992_v52 = vld [vmem:[#allocation16 + $0x3c0] sm:$0xff] }
 0x2a3   : > { %1073 = vmatpush1.msra.mxu0 %v1001_v40  ;;  %3468 = vmatpush3.msra.mxu1 %v1003_v41  ;;  %v993_v50 = vld [vmem:[#allocation16 + $0x3c8] sm:$0xff]  ;;  %v994_v53 = vld [vmem:[#allocation16 + $0x3d0] sm:$0xff]  ;;  %v1039_v55 = vld [vmem:[#allocation16 + $0x538] sm:$0xff] }
 0x2a4   : > { %1074 = vmatprep.subr.mxu0 %v999_v42  ;;  %3469 = vmatprep.subr.mxu1 %v1048_v43  ;;  %v990_v54 = vld [vmem:[#allocation16 + $0x3b0] sm:$0xff]  ;;  %v989_v56 = vld [vmem:[#allocation16 + $0x3a8] sm:$0xff]  ;;  %v991_v57 = vld [vmem:[#allocation16 + $0x3b8] sm:$0xff] }
 0x2a5   : > { %1075 = vmatpush1.msra.mxu0 %v998_v44  ;;  %3470 = vmatpush3.msra.mxu1 %v1000_v45  ;;  %v987_v58 = vld [vmem:[#allocation16 + $0x398] sm:$0xff]  ;;  %v1036_v59 = vld [vmem:[#allocation16 + $0x520] sm:$0xff]  ;;  %v986_v60 = vld [vmem:[#allocation16 + $0x390] sm:$0xff] }
 0x2a6   : > { %1076 = vmatprep.subr.mxu0 %v996_v46  ;;  %3471 = vmatprep.subr.mxu1 %v1045_v47  ;;  %v988_v61 = vld [vmem:[#allocation16 + $0x3a0] sm:$0xff]  ;;  %v1033_v63 = vld [vmem:[#allocation16 + $0x508] sm:$0xff]  ;;  %v983_v0 = vld [vmem:[#allocation16 + $0x378] sm:$0xff] }
 0x2a7   : > { %1077 = vmatpush1.msra.mxu0 %v995_v48  ;;  %3472 = vmatpush3.msra.mxu1 %v997_v49  ;;  %v984_v62 = vld [vmem:[#allocation16 + $0x380] sm:$0xff]  ;;  %v985_v1 = vld [vmem:[#allocation16 + $0x388] sm:$0xff]  ;;  %v1030_v4 = vld [vmem:[#allocation16 + $0x4f0] sm:$0xff] }
 0x2a8   : > { %1078 = vmatprep.subr.mxu0 %v993_v50  ;;  %3473 = vmatprep.subr.mxu1 %v1042_v51  ;;  %v981_v3 = vld [vmem:[#allocation16 + $0x368] sm:$0xff]  ;;  %v980_v7 = vld [vmem:[#allocation16 + $0x360] sm:$0xff]  ;;  %v982_v8 = vld [vmem:[#allocation16 + $0x370] sm:$0xff] }
 0x2a9   : > { %1079 = vmatpush1.msra.mxu0 %v992_v52  ;;  %3474 = vmatpush3.msra.mxu1 %v994_v53  ;;  %v978_v9 = vld [vmem:[#allocation16 + $0x350] sm:$0xff]  ;;  %v1027_v10 = vld [vmem:[#allocation16 + $0x4d8] sm:$0xff]  ;;  %v977_v11 = vld [vmem:[#allocation16 + $0x348] sm:$0xff] }
 0x2aa   : > { %1080 = vmatprep.subr.mxu0 %v990_v54  ;;  %3475 = vmatprep.subr.mxu1 %v1039_v55  ;;  %v979_v12 = vld [vmem:[#allocation16 + $0x358] sm:$0xff]  ;;  %v1024_v14 = vld [vmem:[#allocation16 + $0x4c0] sm:$0xff]  ;;  %v974_v15 = vld [vmem:[#allocation16 + $0x330] sm:$0xff] }
 0x2ab   : > { %1081 = vmatpush1.msra.mxu0 %v989_v56  ;;  %3476 = vmatpush3.msra.mxu1 %v991_v57  ;;  %v975_v13 = vld [vmem:[#allocation16 + $0x338] sm:$0xff]  ;;  %v976_v16 = vld [vmem:[#allocation16 + $0x340] sm:$0xff]  ;;  %v1021_v18 = vld [vmem:[#allocation16 + $0x4a8] sm:$0xff] }
 0x2ac   : > { %1082 = vmatprep.subr.mxu0 %v987_v58  ;;  %3477 = vmatprep.subr.mxu1 %v1036_v59  ;;  %v972_v17 = vld [vmem:[#allocation16 + $0x320] sm:$0xff]  ;;  %v971_v19 = vld [vmem:[#allocation16 + $0x318] sm:$0xff]  ;;  %v973_v20 = vld [vmem:[#allocation16 + $0x328] sm:$0xff] }
 0x2ad   : > { %1083 = vmatpush1.msra.mxu0 %v986_v60  ;;  %3478 = vmatpush3.msra.mxu1 %v988_v61  ;;  %v969_v22 = vld [vmem:[#allocation16 + $0x308] sm:$0xff]  ;;  %v1018_v23 = vld [vmem:[#allocation16 + $0x490] sm:$0xff]  ;;  %v968_v24 = vld [vmem:[#allocation16 + $0x300] sm:$0xff] }
 0x2ae   : > { %1084 = vmatprep.subr.mxu0 %v984_v62  ;;  %3479 = vmatprep.subr.mxu1 %v1033_v63  ;;  %v970_v25 = vld [vmem:[#allocation16 + $0x310] sm:$0xff]  ;;  %v5089_v28 = vld [vmem:[%s5086_s28 + $0x18] sm:$0xff]  ;;  %v5092_v30 = vld [vmem:[%s5086_s28 + $0x10] sm:$0xff] }
 0x2af   : > { %1085 = vmatpush1.msra.mxu0 %v983_v0  ;;  %3480 = vmatpush3.msra.mxu1 %v985_v1  ;;  %v1062_v26 = vld [vmem:[#allocation16 + $0x5f0] sm:$0xff]  ;;  %v1061_v27 = vld [vmem:[#allocation16 + $0x5e8] sm:$0xff]  ;;  %v1059_v31 = vld [vmem:[#allocation16 + $0x5d8] sm:$0xff] }
 0x2b0   : > { %1086 = vmatprep.subr.mxu0 %v981_v3  ;;  %3481 = vmatprep.subr.mxu1 %v1030_v4  ;;  %v911_v29 = vld [vmem:[#allocation16 + $0x170] sm:$0xff]  ;;  %v910_v32 = vld [vmem:[#allocation16 + $0x168] sm:$0xff]  ;;  %v908_v34 = vld [vmem:[#allocation16 + $0x158] sm:$0xff] }
 0x2b1   : > { %1087 = vmatpush1.msra.mxu0 %v980_v7  ;;  %3482 = vmatpush3.msra.mxu1 %v982_v8  ;;  %v1058_v33 = vld [vmem:[#allocation16 + $0x5d0] sm:$0xff]  ;;  %v1056_v35 = vld [vmem:[#allocation16 + $0x5c0] sm:$0xff]  ;;  %v1055_v37 = vld [vmem:[#allocation16 + $0x5b8] sm:$0xff] }
 0x2b2   : > { %1088 = vmatprep.subr.mxu0 %v978_v9  ;;  %3483 = vmatprep.subr.mxu1 %v1027_v10  ;;  %v907_v36 = vld [vmem:[#allocation16 + $0x150] sm:$0xff]  ;;  %v905_v38 = vld [vmem:[#allocation16 + $0x140] sm:$0xff]  ;;  %v1053_v39 = vld [vmem:[#allocation16 + $0x5a8] sm:$0xff] }
 0x2b3   : > { %1089 = vmatpush1.msra.mxu0 %v977_v11  ;;  %3484 = vmatpush3.msra.mxu1 %v979_v12  ;;  %v904_v40 = vld [vmem:[#allocation16 + $0x138] sm:$0xff]  ;;  %v1052_v41 = vld [vmem:[#allocation16 + $0x5a0] sm:$0xff]  ;;  %v902_v42 = vld [vmem:[#allocation16 + $0x128] sm:$0xff] }
 0x2b4   : > { %1090 = vmatprep.subr.mxu0 %v975_v13  ;;  %3485 = vmatprep.subr.mxu1 %v1024_v14  ;;  %v1050_v43 = vld [vmem:[#allocation16 + $0x590] sm:$0xff]  ;;  %v901_v44 = vld [vmem:[#allocation16 + $0x120] sm:$0xff]  ;;  %v1049_v45 = vld [vmem:[#allocation16 + $0x588] sm:$0xff] }
 0x2b5   : > { %1091 = vmatpush1.msra.mxu0 %v974_v15  ;;  %3486 = vmatpush3.msra.mxu1 %v976_v16  ;;  %v899_v46 = vld [vmem:[#allocation16 + $0x110] sm:$0xff]  ;;  %v1047_v47 = vld [vmem:[#allocation16 + $0x578] sm:$0xff]  ;;  %v898_v48 = vld [vmem:[#allocation16 + $0x108] sm:$0xff] }
 0x2b6   : > { %1092 = vmatprep.subr.mxu0 %v972_v17  ;;  %3487 = vmatprep.subr.mxu1 %v1021_v18  ;;  %v1046_v49 = vld [vmem:[#allocation16 + $0x570] sm:$0xff]  ;;  %v896_v50 = vld [vmem:[#allocation16 + $0xf8] sm:$0xff]  ;;  %v1044_v51 = vld [vmem:[#allocation16 + $0x560] sm:$0xff] }
 0x2b7   : > { %1093 = vmatpush1.msra.mxu0 %v971_v19  ;;  %3488 = vmatpush3.msra.mxu1 %v973_v20  ;;  %v895_v52 = vld [vmem:[#allocation16 + $0xf0] sm:$0xff]  ;;  %v1043_v53 = vld [vmem:[#allocation16 + $0x558] sm:$0xff]  ;;  %v893_v54 = vld [vmem:[#allocation16 + $0xe0] sm:$0xff] }
 0x2b8   : > { %1094 = vmatprep.subr.mxu0 %v969_v22  ;;  %3489 = vmatprep.subr.mxu1 %v1018_v23  ;;  %v1041_v55 = vld [vmem:[#allocation16 + $0x548] sm:$0xff]  ;;  %v892_v56 = vld [vmem:[#allocation16 + $0xd8] sm:$0xff]  ;;  %v1040_v57 = vld [vmem:[#allocation16 + $0x540] sm:$0xff] }
 0x2b9   : > { %1095 = vmatpush1.msra.mxu0 %v968_v24  ;;  %3490 = vmatpush3.msra.mxu1 %v970_v25  ;;  %v890_v58 = vld [vmem:[#allocation16 + $0xc8] sm:$0xff]  ;;  %v1038_v59 = vld [vmem:[#allocation16 + $0x530] sm:$0xff]  ;;  %v889_v60 = vld [vmem:[#allocation16 + $0xc0] sm:$0xff] }
 0x2ba   : > { %1096 = vmatprep.subr.mxu0 %v1062_v26  ;;  %1199 = vmatprep.mubr.f32.mxu1 %v5089_v28  ;;  %v1037_v61 = vld [vmem:[#allocation16 + $0x528] sm:$0xff]  ;;  %v887_v62 = vld [vmem:[#allocation16 + $0xb0] sm:$0xff]  ;;  %v1035_v63 = vld [vmem:[#allocation16 + $0x518] sm:$0xff] }
 0x2bb   : > { %1205 = vmatprep.subr.mxu1 %v911_v29  ;;  %1097 = vmatpush2.msra.mxu0 %v1061_v27  ;;  %v886_v0 = vld [vmem:[#allocation16 + $0xa8] sm:$0xff]  ;;  %v1034_v1 = vld [vmem:[#allocation16 + $0x510] sm:$0xff]  ;;  %v884_v3 = vld [vmem:[#allocation16 + $0x98] sm:$0xff] }
 0x2bc   : > { %1200 = vmatmul.mubr.f32.vlgmr.msra.gmra.mxu1 %v5092_v30  ;;  %1098 = vmatprep.subr.mxu0 %v1059_v31  ;;  %v1032_v4 = vld [vmem:[#allocation16 + $0x500] sm:$0xff]  ;;  %v883_v7 = vld [vmem:[#allocation16 + $0x90] sm:$0xff]  ;;  %v1031_v8 = vld [vmem:[#allocation16 + $0x4f8] sm:$0xff] }
 0x2bd   : > { %1206 = vmatpush1.msra.mxu1 %v910_v32  ;;  %1099 = vmatpush2.msra.mxu0 %v1058_v33  ;;  %v881_v9 = vld [vmem:[#allocation16 + $0x80] sm:$0xff]  ;;  %v1029_v10 = vld [vmem:[#allocation16 + $0x4e8] sm:$0xff]  ;;  %v880_v11 = vld [vmem:[#allocation16 + $0x78] sm:$0xff] }
 0x2be   : > { %1207 = vmatprep.subr.mxu1 %v908_v34  ;;  %1100 = vmatprep.subr.mxu0 %v1056_v35  ;;  %v1028_v12 = vld [vmem:[#allocation16 + $0x4e0] sm:$0xff]  ;;  %v878_v13 = vld [vmem:[#allocation16 + $0x68] sm:$0xff]  ;;  %v1026_v14 = vld [vmem:[#allocation16 + $0x4d0] sm:$0xff] }
 0x2bf   : > { %1208 = vmatpush1.msra.mxu1 %v907_v36  ;;  %1101 = vmatpush2.msra.mxu0 %v1055_v37  ;;  %v877_v15 = vld [vmem:[#allocation16 + $0x60] sm:$0xff]  ;;  %v1025_v16 = vld [vmem:[#allocation16 + $0x4c8] sm:$0xff]  ;;  %v875_v17 = vld [vmem:[#allocation16 + $0x50] sm:$0xff] }
 0x2c0   : > { %1209 = vmatprep.subr.mxu1 %v905_v38  ;;  %1102 = vmatprep.subr.mxu0 %v1053_v39  ;;  %v1023_v18 = vld [vmem:[#allocation16 + $0x4b8] sm:$0xff]  ;;  %v874_v19 = vld [vmem:[#allocation16 + $0x48] sm:$0xff]  ;;  %v1022_v20 = vld [vmem:[#allocation16 + $0x4b0] sm:$0xff] }
 0x2c1   : > { %1210 = vmatpush1.msra.mxu1 %v904_v40  ;;  %1103 = vmatpush2.msra.mxu0 %v1052_v41  ;;  %v872_v22 = vld [vmem:[#allocation16 + $0x38] sm:$0xff]  ;;  %v1020_v23 = vld [vmem:[#allocation16 + $0x4a0] sm:$0xff]  ;;  %v871_v24 = vld [vmem:[#allocation16 + $0x30] sm:$0xff] }
 0x2c2   : > { %1211 = vmatprep.subr.mxu1 %v902_v42  ;;  %1104 = vmatprep.subr.mxu0 %v1050_v43  ;;  %v1019_v25 = vld [vmem:[#allocation16 + $0x498] sm:$0xff]  ;;  %v869_v26 = vld [vmem:[#allocation16 + $0x20] sm:$0xff]  ;;  %v1017_v29 = vld [vmem:[#allocation16 + $0x488] sm:$0xff] }
 0x2c3   : > { %1212 = vmatpush1.msra.mxu1 %v901_v44  ;;  %1105 = vmatpush2.msra.mxu0 %v1049_v45  ;;  %v868_v27 = vld [vmem:[#allocation16 + $0x18] sm:$0xff]  ;;  %v1016_v31 = vld [vmem:[#allocation16 + $0x480] sm:$0xff]  ;;  %v866_v32 = vld [vmem:[#allocation16 + $0x8] sm:$0xff] }
 0x2c4   : > { %1213 = vmatprep.subr.mxu1 %v899_v46  ;;  %1106 = vmatprep.subr.mxu0 %v1047_v47  ;;  %v865_v33 = vld [vmem:[#allocation16] sm:$0xff]  ;;  %v959_v34 = vld [vmem:[#allocation16 + $0x2f0] sm:$0xff]  ;;  %v960_v35 = vld [vmem:[#allocation16 + $0x2f8] sm:$0xff] }
 0x2c5   : > { %1214 = vmatpush1.msra.mxu1 %v898_v48  ;;  %1107 = vmatpush2.msra.mxu0 %v1046_v49  ;;  %v958_v36 = vld [vmem:[#allocation16 + $0x2e8] sm:$0xff]  ;;  %v912_v37 = vld [vmem:[#allocation16 + $0x178] sm:$0xff]  ;;  %v957_v39 = vld [vmem:[#allocation16 + $0x2e0] sm:$0xff] }
 0x2c6   : > { %1215 = vmatprep.subr.mxu1 %v896_v50  ;;  %1108 = vmatprep.subr.mxu0 %v1044_v51  ;;  %v956_v38 = vld [vmem:[#allocation16 + $0x2d8] sm:$0xff]  ;;  %v955_v40 = vld [vmem:[#allocation16 + $0x2d0] sm:$0xff]  ;;  %v909_v41 = vld [vmem:[#allocation16 + $0x160] sm:$0xff] }
 0x2c7   : > { %1216 = vmatpush1.msra.mxu1 %v895_v52  ;;  %1109 = vmatpush2.msra.mxu0 %v1043_v53  ;;  %v953_v42 = vld [vmem:[#allocation16 + $0x2c0] sm:$0xff]  ;;  %v954_v43 = vld [vmem:[#allocation16 + $0x2c8] sm:$0xff]  ;;  %v952_v44 = vld [vmem:[#allocation16 + $0x2b8] sm:$0xff] }
 0x2c8   : > { %1217 = vmatprep.subr.mxu1 %v893_v54  ;;  %1110 = vmatprep.subr.mxu0 %v1041_v55  ;;  %v906_v45 = vld [vmem:[#allocation16 + $0x148] sm:$0xff]  ;;  %v951_v46 = vld [vmem:[#allocation16 + $0x2b0] sm:$0xff]  ;;  %v948_v49 = vld [vmem:[#allocation16 + $0x298] sm:$0xff] }
 0x2c9   : > { %1218 = vmatpush1.msra.mxu1 %v892_v56  ;;  %1111 = vmatpush2.msra.mxu0 %v1040_v57  ;;  %v903_v47 = vld [vmem:[#allocation16 + $0x130] sm:$0xff]  ;;  %v946_v50 = vld [vmem:[#allocation16 + $0x288] sm:$0xff]  ;;  %v900_v51 = vld [vmem:[#allocation16 + $0x118] sm:$0xff] }
 0x2ca   : > { %1219 = vmatprep.subr.mxu1 %v890_v58  ;;  %1112 = vmatprep.subr.mxu0 %v1038_v59  ;;  %v947_v48 = vld [vmem:[#allocation16 + $0x290] sm:$0xff]  ;;  %v944_v52 = vld [vmem:[#allocation16 + $0x278] sm:$0xff]  ;;  %v945_v53 = vld [vmem:[#allocation16 + $0x280] sm:$0xff] }
 0x2cb   : > { %1220 = vmatpush1.msra.mxu1 %v889_v60  ;;  %1113 = vmatpush2.msra.mxu0 %v1037_v61  ;;  %v943_v54 = vld [vmem:[#allocation16 + $0x270] sm:$0xff]  ;;  %v897_v55 = vld [vmem:[#allocation16 + $0x100] sm:$0xff]  ;;  %v942_v57 = vld [vmem:[#allocation16 + $0x268] sm:$0xff] }
 0x2cc   : > { %1221 = vmatprep.subr.mxu1 %v887_v62  ;;  %1114 = vmatprep.subr.mxu0 %v1035_v63  ;;  %v941_v56 = vld [vmem:[#allocation16 + $0x260] sm:$0xff]  ;;  %v940_v58 = vld [vmem:[#allocation16 + $0x258] sm:$0xff]  ;;  %v894_v59 = vld [vmem:[#allocation16 + $0xe8] sm:$0xff] }
 0x2cd   : > { %1222 = vmatpush1.msra.mxu1 %v886_v0  ;;  %1115 = vmatpush2.msra.mxu0 %v1034_v1  ;;  %v938_v60 = vld [vmem:[#allocation16 + $0x248] sm:$0xff]  ;;  %v939_v61 = vld [vmem:[#allocation16 + $0x250] sm:$0xff]  ;;  %v937_v62 = vld [vmem:[#allocation16 + $0x240] sm:$0xff] }
 0x2ce   : > { %1223 = vmatprep.subr.mxu1 %v884_v3  ;;  %1116 = vmatprep.subr.mxu0 %v1032_v4  ;;  %v891_v63 = vld [vmem:[#allocation16 + $0xd0] sm:$0xff]  ;;  %v936_v1 = vld [vmem:[#allocation16 + $0x238] sm:$0xff]  ;;  %v934_v3 = vld [vmem:[#allocation16 + $0x228] sm:$0xff] }
 0x2cf   : > { %1224 = vmatpush1.msra.mxu1 %v883_v7  ;;  %1117 = vmatpush2.msra.mxu0 %v1031_v8  ;;  %v935_v0 = vld [vmem:[#allocation16 + $0x230] sm:$0xff]  ;;  %v888_v4 = vld [vmem:[#allocation16 + $0xb8] sm:$0xff]  ;;  %v933_v8 = vld [vmem:[#allocation16 + $0x220] sm:$0xff] }
 0x2d0   : > { %1225 = vmatprep.subr.mxu1 %v881_v9  ;;  %1118 = vmatprep.subr.mxu0 %v1029_v10  ;;  %v932_v7 = vld [vmem:[#allocation16 + $0x218] sm:$0xff]  ;;  %v931_v9 = vld [vmem:[#allocation16 + $0x210] sm:$0xff]  ;;  %v885_v10 = vld [vmem:[#allocation16 + $0xa0] sm:$0xff] }
 0x2d1   : > { %1226 = vmatpush1.msra.mxu1 %v880_v11  ;;  %1119 = vmatpush2.msra.mxu0 %v1028_v12  ;;  %v929_v11 = vld [vmem:[#allocation16 + $0x200] sm:$0xff]  ;;  %v930_v12 = vld [vmem:[#allocation16 + $0x208] sm:$0xff] }
 0x2d2   : > { %1227 = vmatprep.subr.mxu1 %v878_v13  ;;  %1120 = vmatprep.subr.mxu0 %v1026_v14  ;;  %v928_v13 = vld [vmem:[#allocation16 + $0x1f8] sm:$0xff]  ;;  %v882_v14 = vld [vmem:[#allocation16 + $0x88] sm:$0xff] }
 0x2d3   : > { %1228 = vmatpush1.msra.mxu1 %v877_v15  ;;  %1121 = vmatpush2.msra.mxu0 %v1025_v16  ;;  %v926_v15 = vld [vmem:[#allocation16 + $0x1e8] sm:$0xff]  ;;  %v927_v16 = vld [vmem:[#allocation16 + $0x1f0] sm:$0xff] }
 0x2d4   : > { %1229 = vmatprep.subr.mxu1 %v875_v17  ;;  %1122 = vmatprep.subr.mxu0 %v1023_v18  ;;  %v925_v17 = vld [vmem:[#allocation16 + $0x1e0] sm:$0xff]  ;;  %v879_v18 = vld [vmem:[#allocation16 + $0x70] sm:$0xff] }
 0x2d5   : > { %1230 = vmatpush1.msra.mxu1 %v874_v19  ;;  %1123 = vmatpush2.msra.mxu0 %v1022_v20  ;;  %v923_v19 = vld [vmem:[#allocation16 + $0x1d0] sm:$0xff]  ;;  %v924_v20 = vld [vmem:[#allocation16 + $0x1d8] sm:$0xff] }
 0x2d6   : > { %1231 = vmatprep.subr.mxu1 %v872_v22  ;;  %1124 = vmatprep.subr.mxu0 %v1020_v23  ;;  %v922_v22 = vld [vmem:[#allocation16 + $0x1c8] sm:$0xff]  ;;  %v876_v23 = vld [vmem:[#allocation16 + $0x58] sm:$0xff] }
 0x2d7   : > { %1232 = vmatpush1.msra.mxu1 %v871_v24  ;;  %1125 = vmatpush2.msra.mxu0 %v1019_v25  ;;  %v920_v24 = vld [vmem:[#allocation16 + $0x1b8] sm:$0xff]  ;;  %v921_v25 = vld [vmem:[#allocation16 + $0x1c0] sm:$0xff] }
 0x2d8   : > { %1233 = vmatprep.subr.mxu1 %v869_v26  ;;  %1126 = vmatprep.subr.mxu0 %v1017_v29  ;;  %v919_v26 = vld [vmem:[#allocation16 + $0x1b0] sm:$0xff]  ;;  %v873_v29 = vld [vmem:[#allocation16 + $0x40] sm:$0xff] }
 0x2d9   : > { %1234 = vmatpush1.msra.mxu1 %v868_v27  ;;  %1127 = vmatpush2.msra.mxu0 %v1016_v31  ;;  %v917_v27 = vld [vmem:[#allocation16 + $0x1a0] sm:$0xff]  ;;  %v918_v31 = vld [vmem:[#allocation16 + $0x1a8] sm:$0xff] }
 0x2da   : > { %1235 = vmatprep.subr.mxu1 %v866_v32  ;;  %1128 = vmatprep.mubr.f32.mxu0 %v5089_v28  ;;  %v950_v28 = vld [vmem:[#allocation16 + $0x2a8] sm:$0xff]  ;;  %v916_v32 = vld [vmem:[#allocation16 + $0x198] sm:$0xff] }
 0x2db   : > { %1236 = vmatpush1.msra.mxu1 %v865_v33  ;;  %1129 = vmatmul.mubr.f32.vlgmr.msra.gmra.mxu0 %v5092_v30  ;;  %v949_v30 = vld [vmem:[#allocation16 + $0x2a0] sm:$0xff]  ;;  %v870_v33 = vld [vmem:[#allocation16 + $0x28] sm:$0xff] }
 0x2dc   : > { %1237 = vmatprep.subr.mxu1 %v959_v34  ;;  %3494 = vmatprep.subr.mxu0 %v960_v35  ;;  %v914_v34 = vld [vmem:[#allocation16 + $0x188] sm:$0xff]  ;;  %v915_v35 = vld [vmem:[#allocation16 + $0x190] sm:$0xff] }
 0x2dd   : > { %1238 = vmatpush2.msra.mxu1 %v958_v36  ;;  %3495 = vmatpush3.msra.mxu0 %v912_v37  ;;  %v913_v36 = vld [vmem:[#allocation16 + $0x180] sm:$0xff]  ;;  %v864_v37 = vld [vmem:[%s5086_s28 + $0x8] sm:$0xff] }
 0x2de   : > { %1239 = vmatprep.subr.mxu1 %v956_v38  ;;  %3496 = vmatprep.subr.mxu0 %v957_v39  ;;  %v867_v38 = vld [vmem:[#allocation16 + $0x10] sm:$0xff] }
 0x2df   : > { %1240 = vmatpush2.msra.mxu1 %v955_v40  ;;  %3497 = vmatpush3.msra.mxu0 %v909_v41  ;;  %v863_v39 = vld [vmem:[%s5086_s28] sm:$0xff]  ;;  %v1448_v41 = vld [vmem:[#allocation16 + $0x8f8] sm:$0xff] }
 0x2e0   : > { %1241 = vmatprep.subr.mxu1 %v953_v42  ;;  %3498 = vmatprep.subr.mxu0 %v954_v43  ;;  %v1399_v40 = vld [vmem:[#allocation16 + $0x770] sm:$0xff]  ;;  %v1398_v42 = vld [vmem:[#allocation16 + $0x768] sm:$0xff]  ;;  %v1400_v43 = vld [vmem:[#allocation16 + $0x778] sm:$0xff] }
 0x2e1   : > { %1242 = vmatpush2.msra.mxu1 %v952_v44  ;;  %3499 = vmatpush3.msra.mxu0 %v906_v45  ;;  %v1396_v44 = vld [vmem:[#allocation16 + $0x758] sm:$0xff]  ;;  %v1445_v45 = vld [vmem:[#allocation16 + $0x8e0] sm:$0xff] }
 0x2e2   : > { %1243 = vmatprep.subr.mxu1 %v950_v28  ;;  %3500 = vmatprep.subr.mxu0 %v951_v46  ;;  %v1395_v28 = vld [vmem:[#allocation16 + $0x750] sm:$0xff]  ;;  %v1397_v46 = vld [vmem:[#allocation16 + $0x760] sm:$0xff] }
 0x2e3   : > { %1244 = vmatpush2.msra.mxu1 %v949_v30  ;;  %3501 = vmatpush3.msra.mxu0 %v903_v47  ;;  %v1393_v30 = vld [vmem:[#allocation16 + $0x740] sm:$0xff]  ;;  %v1442_v47 = vld [vmem:[#allocation16 + $0x8c8] sm:$0xff] }
 0x2e4   : > { %1245 = vmatprep.subr.mxu1 %v947_v48  ;;  %3502 = vmatprep.subr.mxu0 %v948_v49  ;;  %v1392_v48 = vld [vmem:[#allocation16 + $0x738] sm:$0xff]  ;;  %v1394_v49 = vld [vmem:[#allocation16 + $0x748] sm:$0xff] }
 0x2e5   : > { %1246 = vmatpush2.msra.mxu1 %v946_v50  ;;  %3503 = vmatpush3.msra.mxu0 %v900_v51  ;;  %v1390_v50 = vld [vmem:[#allocation16 + $0x728] sm:$0xff]  ;;  %v1439_v51 = vld [vmem:[#allocation16 + $0x8b0] sm:$0xff] }
 0x2e6   : > { %1247 = vmatprep.subr.mxu1 %v944_v52  ;;  %3504 = vmatprep.subr.mxu0 %v945_v53  ;;  %v1389_v52 = vld [vmem:[#allocation16 + $0x720] sm:$0xff]  ;;  %v1391_v53 = vld [vmem:[#allocation16 + $0x730] sm:$0xff] }
 0x2e7   : > { %1248 = vmatpush2.msra.mxu1 %v943_v54  ;;  %3505 = vmatpush3.msra.mxu0 %v897_v55  ;;  %v1387_v54 = vld [vmem:[#allocation16 + $0x710] sm:$0xff]  ;;  %v1436_v55 = vld [vmem:[#allocation16 + $0x898] sm:$0xff] }
 0x2e8   : > { %1249 = vmatprep.subr.mxu1 %v941_v56  ;;  %3506 = vmatprep.subr.mxu0 %v942_v57  ;;  %v1386_v56 = vld [vmem:[#allocation16 + $0x708] sm:$0xff]  ;;  %v1388_v57 = vld [vmem:[#allocation16 + $0x718] sm:$0xff] }
 0x2e9   : > { %1250 = vmatpush2.msra.mxu1 %v940_v58  ;;  %3507 = vmatpush3.msra.mxu0 %v894_v59  ;;  %v1384_v58 = vld [vmem:[#allocation16 + $0x6f8] sm:$0xff]  ;;  %v1433_v59 = vld [vmem:[#allocation16 + $0x880] sm:$0xff] }
 0x2ea   : > { %1251 = vmatprep.subr.mxu1 %v938_v60  ;;  %3508 = vmatprep.subr.mxu0 %v939_v61  ;;  %v1383_v60 = vld [vmem:[#allocation16 + $0x6f0] sm:$0xff]  ;;  %v1385_v61 = vld [vmem:[#allocation16 + $0x700] sm:$0xff] }
 0x2eb   : > { %1252 = vmatpush2.msra.mxu1 %v937_v62  ;;  %3509 = vmatpush3.msra.mxu0 %v891_v63  ;;  %v1381_v62 = vld [vmem:[#allocation16 + $0x6e0] sm:$0xff]  ;;  %v1430_v63 = vld [vmem:[#allocation16 + $0x868] sm:$0xff] }
 0x2ec   : > { %1253 = vmatprep.subr.mxu1 %v935_v0  ;;  %3510 = vmatprep.subr.mxu0 %v936_v1  ;;  %v1380_v0 = vld [vmem:[#allocation16 + $0x6d8] sm:$0xff]  ;;  %v1382_v1 = vld [vmem:[#allocation16 + $0x6e8] sm:$0xff] }
 0x2ed   : > { %1254 = vmatpush2.msra.mxu1 %v934_v3  ;;  %3511 = vmatpush3.msra.mxu0 %v888_v4  ;;  %v1378_v3 = vld [vmem:[#allocation16 + $0x6c8] sm:$0xff]  ;;  %v1427_v4 = vld [vmem:[#allocation16 + $0x850] sm:$0xff] }
 0x2ee   : > { %1255 = vmatprep.subr.mxu1 %v932_v7  ;;  %3512 = vmatprep.subr.mxu0 %v933_v8  ;;  %v1377_v7 = vld [vmem:[#allocation16 + $0x6c0] sm:$0xff]  ;;  %v1379_v8 = vld [vmem:[#allocation16 + $0x6d0] sm:$0xff] }
 0x2ef   : > { %1256 = vmatpush2.msra.mxu1 %v931_v9  ;;  %3513 = vmatpush3.msra.mxu0 %v885_v10  ;;  %v1375_v9 = vld [vmem:[#allocation16 + $0x6b0] sm:$0xff]  ;;  %v1424_v10 = vld [vmem:[#allocation16 + $0x838] sm:$0xff] }
 0x2f0   : > { %1257 = vmatprep.subr.mxu1 %v929_v11  ;;  %3514 = vmatprep.subr.mxu0 %v930_v12  ;;  %v1374_v11 = vld [vmem:[#allocation16 + $0x6a8] sm:$0xff]  ;;  %v1376_v12 = vld [vmem:[#allocation16 + $0x6b8] sm:$0xff] }
 0x2f1   : > { %1258 = vmatpush2.msra.mxu1 %v928_v13  ;;  %3515 = vmatpush3.msra.mxu0 %v882_v14  ;;  %v1372_v13 = vld [vmem:[#allocation16 + $0x698] sm:$0xff]  ;;  %v1421_v14 = vld [vmem:[#allocation16 + $0x820] sm:$0xff] }
 0x2f2   : > { %1259 = vmatprep.subr.mxu1 %v926_v15  ;;  %3516 = vmatprep.subr.mxu0 %v927_v16  ;;  %v1371_v15 = vld [vmem:[#allocation16 + $0x690] sm:$0xff]  ;;  %v1373_v16 = vld [vmem:[#allocation16 + $0x6a0] sm:$0xff] }
 0x2f3   : > { %1260 = vmatpush2.msra.mxu1 %v925_v17  ;;  %3517 = vmatpush3.msra.mxu0 %v879_v18  ;;  %v1369_v17 = vld [vmem:[#allocation16 + $0x680] sm:$0xff]  ;;  %v1418_v18 = vld [vmem:[#allocation16 + $0x808] sm:$0xff] }
 0x2f4   : > { %1261 = vmatprep.subr.mxu1 %v923_v19  ;;  %3518 = vmatprep.subr.mxu0 %v924_v20  ;;  %v1368_v19 = vld [vmem:[#allocation16 + $0x678] sm:$0xff]  ;;  %v1370_v20 = vld [vmem:[#allocation16 + $0x688] sm:$0xff] }
 0x2f5   : > { %1262 = vmatpush2.msra.mxu1 %v922_v22  ;;  %3519 = vmatpush3.msra.mxu0 %v876_v23  ;;  %v1366_v22 = vld [vmem:[#allocation16 + $0x668] sm:$0xff]  ;;  %v1415_v23 = vld [vmem:[#allocation16 + $0x7f0] sm:$0xff] }
 0x2f6   : > { %1263 = vmatprep.subr.mxu1 %v920_v24  ;;  %3520 = vmatprep.subr.mxu0 %v921_v25  ;;  %v1365_v24 = vld [vmem:[#allocation16 + $0x660] sm:$0xff]  ;;  %v1367_v25 = vld [vmem:[#allocation16 + $0x670] sm:$0xff] }
 0x2f7   : > { %1264 = vmatpush2.msra.mxu1 %v919_v26  ;;  %3521 = vmatpush3.msra.mxu0 %v873_v29  ;;  %v1363_v26 = vld [vmem:[#allocation16 + $0x650] sm:$0xff]  ;;  %v1412_v29 = vld [vmem:[#allocation16 + $0x7d8] sm:$0xff] }
 0x2f8   : > { %1265 = vmatprep.subr.mxu1 %v917_v27  ;;  %3522 = vmatprep.subr.mxu0 %v918_v31  ;;  %v1362_v27 = vld [vmem:[#allocation16 + $0x648] sm:$0xff]  ;;  %v1364_v31 = vld [vmem:[#allocation16 + $0x658] sm:$0xff] }
 0x2f9   : > { %1266 = vmatpush2.msra.mxu1 %v916_v32  ;;  %3523 = vmatpush3.msra.mxu0 %v870_v33  ;;  %v1360_v32 = vld [vmem:[#allocation16 + $0x638] sm:$0xff]  ;;  %v1409_v33 = vld [vmem:[#allocation16 + $0x7c0] sm:$0xff] }
 0x2fa   : > { %1267 = vmatprep.subr.mxu1 %v914_v34  ;;  %3524 = vmatprep.subr.mxu0 %v915_v35  ;;  %v1359_v34 = vld [vmem:[#allocation16 + $0x630] sm:$0xff]  ;;  %v1361_v35 = vld [vmem:[#allocation16 + $0x640] sm:$0xff] }
 0x2fb   : > { %1268 = vmatpush2.msra.mxu1 %v913_v36  ;;  %1269 = vmatprep.mubr.f32.mxu1 %v864_v37  ;;  %v1357_v36 = vld [vmem:[#allocation16 + $0x620] sm:$0xff] }
 0x2fc   : > { %3525 = vmatpush3.msra.mxu0 %v867_v38  ;;  %1340 = vmatprep.mubr.f32.mxu0 %v864_v37  ;;  %v1406_v37 = vld [vmem:[#allocation16 + $0x7a8] sm:$0xff]  ;;  %v1356_v38 = vld [vmem:[#allocation16 + $0x618] sm:$0xff] }
 0x2fd   : > { %1270 = vmatmul.mubr.f32.vlgmr.msra.gmra.mxu1 %v863_v39  ;;  %1341 = vmatmul.mubr.f32.vlgmr.msra.gmra.mxu0 %v863_v39  ;;  %v1358_v39 = vld [vmem:[#allocation16 + $0x628] sm:$0xff] }
 0x2fe   : > { %1449 = vmatprep.subr.mxu0 %v1399_v40  ;;  %3529 = vmatprep.subr.mxu1 %v1448_v41  ;;  %v1354_v40 = vld [vmem:[#allocation16 + $0x608] sm:$0xff]  ;;  %v1403_v41 = vld [vmem:[#allocation16 + $0x790] sm:$0xff] }
 0x2ff   : > { %1450 = vmatpush1.msra.mxu0 %v1398_v42  ;;  %3530 = vmatpush3.msra.mxu1 %v1400_v43  ;;  %v1353_v42 = vld [vmem:[#allocation16 + $0x600] sm:$0xff]  ;;  %v1355_v43 = vld [vmem:[#allocation16 + $0x610] sm:$0xff] }
 0x300   : > { %1451 = vmatprep.subr.mxu0 %v1396_v44  ;;  %3531 = vmatprep.subr.mxu1 %v1445_v45  ;;  %v3317_v44 = vld [vmem:[%s5086_s28 + $0x28] sm:$0xff] }
 0x301   : > { %1452 = vmatpush1.msra.mxu0 %v1395_v28  ;;  %3532 = vmatpush3.msra.mxu1 %v1397_v46  ;;  %v1447_v45 = vld [vmem:[#allocation16 + $0x8f0] sm:$0xff]  ;;  %v1446_v46 = vld [vmem:[#allocation16 + $0x8e8] sm:$0xff] }
 0x302   : > { %1453 = vmatprep.subr.mxu0 %v1393_v30  ;;  %3533 = vmatprep.subr.mxu1 %v1442_v47  ;;  %v5102_v28 = vld [vmem:[%s5086_s28 + $0x20] sm:$0xff]  ;;  %v1444_v30 = vld [vmem:[#allocation16 + $0x8d8] sm:$0xff] }
 0x303   : > { %1454 = vmatpush1.msra.mxu0 %v1392_v48  ;;  %3534 = vmatpush3.msra.mxu1 %v1394_v49  ;;  %v1443_v47 = vld [vmem:[#allocation16 + $0x8d0] sm:$0xff]  ;;  %v1441_v48 = vld [vmem:[#allocation16 + $0x8c0] sm:$0xff]  ;;  %v1440_v49 = vld [vmem:[#allocation16 + $0x8b8] sm:$0xff] }
 0x304   : > { %1455 = vmatprep.subr.mxu0 %v1390_v50  ;;  %3535 = vmatprep.subr.mxu1 %v1439_v51  ;;  %v1438_v50 = vld [vmem:[#allocation16 + $0x8a8] sm:$0xff]  ;;  %v1437_v51 = vld [vmem:[#allocation16 + $0x8a0] sm:$0xff] }
 0x305   : > { %1456 = vmatpush1.msra.mxu0 %v1389_v52  ;;  %3536 = vmatpush3.msra.mxu1 %v1391_v53  ;;  %v1435_v52 = vld [vmem:[#allocation16 + $0x890] sm:$0xff]  ;;  %v1434_v53 = vld [vmem:[#allocation16 + $0x888] sm:$0xff] }
 0x306   : > { %1457 = vmatprep.subr.mxu0 %v1387_v54  ;;  %3537 = vmatprep.subr.mxu1 %v1436_v55  ;;  %v1432_v54 = vld [vmem:[#allocation16 + $0x878] sm:$0xff]  ;;  %v1431_v55 = vld [vmem:[#allocation16 + $0x870] sm:$0xff] }
 0x307   : > { %1458 = vmatpush1.msra.mxu0 %v1386_v56  ;;  %3538 = vmatpush3.msra.mxu1 %v1388_v57  ;;  %v1429_v56 = vld [vmem:[#allocation16 + $0x860] sm:$0xff]  ;;  %v1428_v57 = vld [vmem:[#allocation16 + $0x858] sm:$0xff] }
 0x308   : > { %1459 = vmatprep.subr.mxu0 %v1384_v58  ;;  %3539 = vmatprep.subr.mxu1 %v1433_v59  ;;  %v1426_v58 = vld [vmem:[#allocation16 + $0x848] sm:$0xff]  ;;  %v1425_v59 = vld [vmem:[#allocation16 + $0x840] sm:$0xff] }
 0x309   : > { %1460 = vmatpush1.msra.mxu0 %v1383_v60  ;;  %3540 = vmatpush3.msra.mxu1 %v1385_v61  ;;  %v1423_v60 = vld [vmem:[#allocation16 + $0x830] sm:$0xff]  ;;  %v1422_v61 = vld [vmem:[#allocation16 + $0x828] sm:$0xff] }
 0x30a   : > { %1461 = vmatprep.subr.mxu0 %v1381_v62  ;;  %3541 = vmatprep.subr.mxu1 %v1430_v63  ;;  %v1420_v62 = vld [vmem:[#allocation16 + $0x818] sm:$0xff]  ;;  %v1419_v63 = vld [vmem:[#allocation16 + $0x810] sm:$0xff] }
 0x30b   : > { %1462 = vmatpush1.msra.mxu0 %v1380_v0  ;;  %3542 = vmatpush3.msra.mxu1 %v1382_v1  ;;  %v1417_v0 = vld [vmem:[#allocation16 + $0x800] sm:$0xff]  ;;  %v1416_v1 = vld [vmem:[#allocation16 + $0x7f8] sm:$0xff] }
 0x30c   : > { %1463 = vmatprep.subr.mxu0 %v1378_v3  ;;  %3543 = vmatprep.subr.mxu1 %v1427_v4  ;;  %v1414_v3 = vld [vmem:[#allocation16 + $0x7e8] sm:$0xff]  ;;  %v1413_v4 = vld [vmem:[#allocation16 + $0x7e0] sm:$0xff] }
 0x30d   : > { %1464 = vmatpush1.msra.mxu0 %v1377_v7  ;;  %3544 = vmatpush3.msra.mxu1 %v1379_v8  ;;  %v1411_v7 = vld [vmem:[#allocation16 + $0x7d0] sm:$0xff]  ;;  %v1410_v8 = vld [vmem:[#allocation16 + $0x7c8] sm:$0xff] }
 0x30e   : > { %1465 = vmatprep.subr.mxu0 %v1375_v9  ;;  %3545 = vmatprep.subr.mxu1 %v1424_v10  ;;  %v1408_v9 = vld [vmem:[#allocation16 + $0x7b8] sm:$0xff]  ;;  %v1407_v10 = vld [vmem:[#allocation16 + $0x7b0] sm:$0xff] }
 0x30f   : > { %1466 = vmatpush1.msra.mxu0 %v1374_v11  ;;  %3546 = vmatpush3.msra.mxu1 %v1376_v12  ;;  %v1405_v11 = vld [vmem:[#allocation16 + $0x7a0] sm:$0xff]  ;;  %v1404_v12 = vld [vmem:[#allocation16 + $0x798] sm:$0xff] }
 0x310   : > { %1467 = vmatprep.subr.mxu0 %v1372_v13  ;;  %3547 = vmatprep.subr.mxu1 %v1421_v14  ;;  %v1402_v13 = vld [vmem:[#allocation16 + $0x788] sm:$0xff]  ;;  %v1401_v14 = vld [vmem:[#allocation16 + $0x780] sm:$0xff] }
 0x311   : > { %1468 = vmatpush1.msra.mxu0 %v1371_v15  ;;  %3548 = vmatpush3.msra.mxu1 %v1373_v16 }
 0x312   : > { %1469 = vmatprep.subr.mxu0 %v1369_v17  ;;  %3549 = vmatprep.subr.mxu1 %v1418_v18 }
 0x313   : > { %1470 = vmatpush1.msra.mxu0 %v1368_v19  ;;  %3550 = vmatpush3.msra.mxu1 %v1370_v20 }
 0x314   : > { %1471 = vmatprep.subr.mxu0 %v1366_v22  ;;  %3551 = vmatprep.subr.mxu1 %v1415_v23 }
 0x315   : > { %1472 = vmatpush1.msra.mxu0 %v1365_v24  ;;  %3552 = vmatpush3.msra.mxu1 %v1367_v25  ;;  %v1604_v25 = vsub.s32 2, %v5064_v2  ;;  %v5138_v2 = vld [vmem:[#allocation19 + $0x50] sm:$0xff] (%p856_p2) }
 0x316   : > { %1473 = vmatprep.subr.mxu0 %v1363_v26  ;;  %3553 = vmatprep.subr.mxu1 %v1412_v29 }
 0x317   : > { %1474 = vmatpush1.msra.mxu0 %v1362_v27  ;;  %3554 = vmatpush3.msra.mxu1 %v1364_v31 }
 0x318   : > { %1475 = vmatprep.subr.mxu0 %v1360_v32  ;;  %3555 = vmatprep.subr.mxu1 %v1409_v33  ;;  %v1605_v33 = vrot.slane %v5078_v21, %v1604_v25  ;;  %v5202_v25 = vld [vmem:[#allocation20] ss:$0 sm:$0xff] (%p856_p2) }
 0x319   : > { %1476 = vmatpush1.msra.mxu0 %v1359_v34  ;;  %3556 = vmatpush3.msra.mxu1 %v1361_v35 }
 0x31a   : > { %1477 = vmatprep.subr.mxu0 %v1357_v36  ;;  %3557 = vmatprep.subr.mxu1 %v1406_v37 }
 0x31b   : > { %1478 = vmatpush1.msra.mxu0 %v1356_v38  ;;  %3558 = vmatpush3.msra.mxu1 %v1358_v39  ;;  %v1597_v38 = vrot.slane %v5078_v21, %v836_v5  ;;  %v5140_v5 = vld [vmem:[#allocation19 + $0x58] sm:$0xff] (%p856_p2) }
 0x31c   : > { %1479 = vmatprep.subr.mxu0 %v1354_v40  ;;  %3559 = vmatprep.subr.mxu1 %v1403_v41 }
 0x31d   : > { %1480 = vmatpush1.msra.mxu0 %v1353_v42  ;;  %3560 = vmatpush3.msra.mxu1 %v1355_v43  ;;  %v1601_v42 = vrot.slane %v5078_v21, %v840_v6  ;;  %v5142_v6 = vld [vmem:[#allocation19 + $0x60] sm:$0xff] (%p856_p2)  ;;  %v5144_v21 = vld [vmem:[#allocation19 + $0x68] sm:$0xff] (%p856_p2) }
 0x31e   : > { %1584 = vmatprep.mubr.f32.mxu1 %v3317_v44  ;;  %1481 = vmatprep.subr.mxu0 %v1447_v45 }
 0x31f   : > { %1585 = vmatmul.mubr.f32.vlgmr.msra.gmra.mxu1 %v5102_v28  ;;  %1482 = vmatpush2.msra.mxu0 %v1446_v46 }
 0x320   : > { %1483 = vmatprep.subr.mxu0 %v1444_v30  ;;  %1513 = vmatprep.mubr.f32.mxu0 %v3317_v44 }
 0x321   : > { %1484 = vmatpush2.msra.mxu0 %v1443_v47  ;;  %v5118_v47 = vld [vmem:[#allocation19] sm:$0xff] (%p856_p2) }
 0x322   : > { %1485 = vmatprep.subr.mxu0 %v1441_v48  ;;  %v5120_v48 = vld [vmem:[#allocation19 + $0x8] sm:$0xff] (%p856_p2) }
 0x323   : > { %1486 = vmatpush2.msra.mxu0 %v1440_v49  ;;  %v5122_v49 = vld [vmem:[#allocation19 + $0x10] sm:$0xff] (%p856_p2) }
 0x324   : > { %1487 = vmatprep.subr.mxu0 %v1438_v50  ;;  %v5124_v50 = vld [vmem:[#allocation19 + $0x18] sm:$0xff] (%p856_p2) }
 0x325   : > { %1488 = vmatpush2.msra.mxu0 %v1437_v51  ;;  %v5126_v51 = vld [vmem:[#allocation19 + $0x20] sm:$0xff] (%p856_p2) }
 0x326   : > { %1489 = vmatprep.subr.mxu0 %v1435_v52  ;;  %v5128_v52 = vld [vmem:[#allocation19 + $0x28] sm:$0xff] (%p856_p2) }
 0x327   : > { %1490 = vmatpush2.msra.mxu0 %v1434_v53  ;;  %v5130_v53 = vld [vmem:[#allocation19 + $0x30] sm:$0xff] (%p856_p2) }
 0x328   : > { %1491 = vmatprep.subr.mxu0 %v1432_v54  ;;  %v5132_v54 = vld [vmem:[#allocation19 + $0x38] sm:$0xff] (%p856_p2) }
 0x329   : > { %1492 = vmatpush2.msra.mxu0 %v1431_v55  ;;  %v5134_v55 = vld [vmem:[#allocation19 + $0x40] sm:$0xff] (%p856_p2) }
 0x32a   : > { %1493 = vmatprep.subr.mxu0 %v1429_v56  ;;  %v5136_v56 = vld [vmem:[#allocation19 + $0x48] sm:$0xff] (%p856_p2) }
 0x32b   : > { %1494 = vmatpush2.msra.mxu0 %v1428_v57  ;;  %v5146_v57 = vld [vmem:[#allocation19 + $0x70] sm:$0xff] (%p856_p2) }
 0x32c   : > { %1495 = vmatprep.subr.mxu0 %v1426_v58  ;;  %v5148_v58 = vld [vmem:[#allocation19 + $0x78] sm:$0xff] (%p856_p2) }
 0x32d   : > { %1496 = vmatpush2.msra.mxu0 %v1425_v59  ;;  %v5150_v59 = vld [vmem:[#allocation19 + $0x80] sm:$0xff] (%p856_p2) }
 0x32e   : > { %1497 = vmatprep.subr.mxu0 %v1423_v60  ;;  %v5152_v60 = vld [vmem:[#allocation19 + $0x88] sm:$0xff] (%p856_p2) }
 0x32f   : > { %1498 = vmatpush2.msra.mxu0 %v1422_v61  ;;  %v5154_v61 = vld [vmem:[#allocation19 + $0x90] sm:$0xff] (%p856_p2) }
 0x330   : > { %1499 = vmatprep.subr.mxu0 %v1420_v62  ;;  %v5156_v62 = vld [vmem:[#allocation19 + $0x98] sm:$0xff] (%p856_p2) }
 0x331   : > { %1500 = vmatpush2.msra.mxu0 %v1419_v63  ;;  %v5158_v63 = vld [vmem:[#allocation19 + $0xa0] sm:$0xff] (%p856_p2) }
 0x332   : > { %1501 = vmatprep.subr.mxu0 %v1417_v0  ;;  %v5160_v0 = vld [vmem:[#allocation19 + $0xa8] sm:$0xff] (%p856_p2) }
 0x333   : > { %1502 = vmatpush2.msra.mxu0 %v1416_v1  ;;  %v5162_v1 = vld [vmem:[#allocation19 + $0xb0] sm:$0xff] (%p856_p2) }
 0x334   : > { %1503 = vmatprep.subr.mxu0 %v1414_v3  ;;  %v5164_v3 = vld [vmem:[#allocation19 + $0xb8] sm:$0xff] (%p856_p2) }
 0x335   : > { %1504 = vmatpush2.msra.mxu0 %v1413_v4  ;;  %v5166_v4 = vld [vmem:[#allocation19 + $0xc0] sm:$0xff] (%p856_p2) }
 0x336   : > { %1505 = vmatprep.subr.mxu0 %v1411_v7  ;;  %v5168_v7 = vld [vmem:[#allocation19 + $0xc8] sm:$0xff] (%p856_p2) }
 0x337   : > { %1506 = vmatpush2.msra.mxu0 %v1410_v8  ;;  %v5170_v8 = vld [vmem:[#allocation19 + $0xd0] sm:$0xff] (%p856_p2) }
 0x338   : > { %1507 = vmatprep.subr.mxu0 %v1408_v9  ;;  %v5172_v9 = vld [vmem:[#allocation19 + $0xd8] sm:$0xff] (%p856_p2) }
 0x339   : > { %1508 = vmatpush2.msra.mxu0 %v1407_v10  ;;  %v5174_v10 = vld [vmem:[#allocation19 + $0xe0] sm:$0xff] (%p856_p2) }
 0x33a   : > { %1509 = vmatprep.subr.mxu0 %v1405_v11  ;;  %v5176_v11 = vld [vmem:[#allocation19 + $0xe8] sm:$0xff] (%p856_p2) }
 0x33b   : > { %1510 = vmatpush2.msra.mxu0 %v1404_v12  ;;  %v5178_v12 = vld [vmem:[#allocation19 + $0xf0] sm:$0xff] (%p856_p2) }
 0x33c   : > { %1511 = vmatprep.subr.mxu0 %v1402_v13  ;;  %v5180_v13 = vld [vmem:[#allocation19 + $0xf8] sm:$0xff] (%p856_p2) }
 0x33d   : > { %1512 = vmatpush2.msra.mxu0 %v1401_v14  ;;  %v5182_v14 = vld [vmem:[#allocation19 + $0x100] sm:$0xff] (%p856_p2) }
 0x33e   : > { %1514 = vmatmul.mubr.f32.vlgmr.msra.gmra.mxu0 %v5102_v28 }
 0x37c   : > { %v3491_v16 = vpop.f32.mrf.mxu1 }
 0x37e   : > { %v3492_v18 = vpop.f32.mrf.mxu1 }
 0x37f   : > { %v3493_v29 = vadd.f32 %v3492_v18, %v3491_v16  ;;  %v5186_v16 = vld [vmem:[#allocation19 + $0x110] sm:$0xff] (%p856_p2)  ;;  %v5190_v18 = vld [vmem:[#allocation19 + $0x120] sm:$0xff] (%p856_p2) }
 0x39b   : > { %v1130_v15 = vpop.f32.mrf.mxu0 }
 0x39d   : > { %v1132_v17 = vpop.f32.mrf.mxu0 }
 0x3bd   : > { %v3526_v19 = vpop.f32.mrf.mxu0  ;;  %v1271_v20 = vpop.f32.mrf.mxu1 }
 0x3be   : > { %v1272_v37 = vadd.f32 %v1271_v20, %v1130_v15  ;;  %v5184_v15 = vld [vmem:[#allocation19 + $0x108] sm:$0xff] (%p856_p2)  ;;  %v5194_v20 = vld [vmem:[#allocation19 + $0x130] sm:$0xff] (%p856_p2) }
 0x3bf   : > { %v3527_v22 = vpop.f32.mrf.mxu0  ;;  %v1273_v23 = vpop.f32.mrf.mxu1 }
 0x3c0   : > { %v3528_v24 = vadd.f32 %v3527_v22, %v3526_v19  ;;  %v1274_v40 = vadd.f32 %v1273_v23, %v1132_v17  ;;  %v5188_v17 = vld [vmem:[#allocation19 + $0x118] sm:$0xff] (%p856_p2)  ;;  %v5192_v19 = vld [vmem:[#allocation19 + $0x128] sm:$0xff] (%p856_p2)  ;;  %v5198_v23 = vld [vmem:[#allocation19 + $0x140] sm:$0xff] (%p856_p2) }
 0x3c1   :  { %v5196_v22 = vld [vmem:[#allocation19 + $0x138] sm:$0xff] (%p856_p2) }
 0x3c2   : > { %v1343_v31 = vadd.f32 %v3528_v24, %v3493_v29  ;;  %v5200_v24 = vld [vmem:[#allocation19 + $0x148] sm:$0xff] (%p856_p2) }
 0x3df   : > { %v3561_v26 = vpop.f32.mrf.mxu1 }
 0x3e1   : > { %v3562_v27 = vpop.f32.mrf.mxu1 }
 0x3e2   : > { %v3563_v32 = vadd.f32 %v3562_v27, %v3561_v26 }
 0x3e4   : > { %v1592_v34 = vadd.f32 %v3563_v32, %v1343_v31 }
 0x3e6   : > { %v1611_v35 = vadd.f32 %v1605_v33, %v1592_v34 }
 0x3e8   : > { %v1614_v36 = vmax.f32 %v1611_v35, 0.0 }
 0x3ea   : > { %1620 = vst [vmem:[%s1617_s7 + $0x10] sm:$0xff] %v1614_v36 }
 0x3fe   : > { %v1515_v39 = vpop.f32.mrf.mxu0 }
 0x3ff   : > { %v1590_v41 = vadd.f32 %v1515_v39, %v1272_v37 }
 0x400   : > { %v1517_v43 = vpop.f32.mrf.mxu0 }
 0x401   : > { %v1609_v44 = vadd.f32 %v1597_v38, %v1590_v41  ;;  %v1591_v45 = vadd.f32 %v1517_v43, %v1274_v40 }
 0x403   : > { %v1612_v28 = vmax.f32 %v1609_v44, 0.0  ;;  %v1610_v46 = vadd.f32 %v1601_v42, %v1591_v45  ;;  %858 = sbr.rel (!%p856_p2) target bundleno = 665 (0x299), region = 258 }
 0x405   : > { %1618 = vst [vmem:[%s1617_s7] sm:$0xff] %v1612_v28  ;;  %v1613_v30 = vmax.f32 %v1610_v46, 0.0 }
 0x407   : > { %1619 = vst [vmem:[%s1617_s7 + $0x8] sm:$0xff] %v1613_v30 }
 0x408 LB: > { %3564 = vmatprep.subr.mxu0 %v5180_v13  ;;  %v4868_v26 = vmov 0.0   ;;  %s3443_s0 = smul.u32 48, %s4831_s30  ;;  %s4869_s9 = smov 112   ;;  %vm4870_vm3 = vmmov 0   ;;  %vm1696_vm4 = vcmask 916480   ;;  %vm1711_vm5 = vcmask 654336   ;;  %s4831_s30 = sphi %s5204_s30, %s1669_s30  }
 0x409   : > { %3565 = vmatpush3.msra.mxu0 %v5148_v58  ;;  %3881 = vmatprep.subr.mxu1 %v4868_v26  ;;  %s3329_s17 = sshll.u32 %s4831_s30, 3  ;;  %s1669_s30 = sadd.s32 1, %s4831_s30  }
 0x40a   : > { %3566 = vmatprep.subr.mxu0 %v5178_v12  ;;  %3882 = vmatpush3.msra.mxu1 %v5200_v24  ;;  %s1673_s6 = scalar_lea.vmem [#allocation4], %s3443_s0  ;;  %s1857_s1 = scalar_lea.vmem [#allocation5], %s3329_s17 }
 0x40b   : > { %3567 = vmatpush3.msra.mxu0 %v5146_v57  ;;  %3883 = vmatprep.subr.mxu1 %v4868_v26  ;;  %p1666_p3 = scmp.ge.s32.totalorder %s1669_s30, 11  }
 0x40c   : > { %3568 = vmatprep.subr.mxu0 %v5176_v11  ;;  %3884 = vmatpush3.msra.mxu1 %v5198_v23  ;;  %s5263_s18 = smov (%p1666_p3), 0  }
 0x40d   : > { %3569 = vmatpush3.msra.mxu0 %v5144_v21  ;;  %3885 = vmatprep.subr.mxu1 %v4868_v26 }
 0x40e   : > { %v1674_v29 = vld [vmem:[%s1673_s6] sm:$0xff]  ;;  %v1675_v27 = vld [vmem:[%s1673_s6 + $0x8] sm:$0xff]  ;;  %v3324_v31 = vld [vmem:[%s1673_s6 + $0x18] sm:$0xff]  ;;  %3570 = vmatprep.subr.mxu0 %v5174_v10  ;;  %3886 = vmatpush3.msra.mxu1 %v5196_v22 }
 0x40f   : > { %v3325_v32 = vld [vmem:[%s1673_s6 + $0x20] sm:$0xff]  ;;  %v5218_v33 = vmax.f32 %v1674_v29, %v3324_v31  ;;  %3571 = vmatpush3.msra.mxu0 %v5142_v6  ;;  %3887 = vmatprep.subr.mxu1 %v4868_v26  ;;  %v1676_v35 = vld [vmem:[%s1673_s6 + $0x10] sm:$0xff]  ;;  %v3326_v36 = vld [vmem:[%s1673_s6 + $0x28] sm:$0xff] }
 0x410   : > { %v1685_v34 = vmax.f32 %v1675_v27, %v3325_v32  ;;  %3572 = vmatprep.subr.mxu0 %v5172_v9  ;;  %3888 = vmatpush3.msra.mxu1 %v5194_v20  ;;  %v1686_v38 = vmax.f32 %v1676_v35, %v3326_v36 }
 0x411   : > { %3573 = vmatpush3.msra.mxu0 %v5140_v5  ;;  %3889 = vmatprep.subr.mxu1 %v4868_v26 }
 0x412   : > { %v4484_v37 = vpack.i.bf16 %v5218_v33, %v1685_v34  ;;  %3574 = vmatprep.subr.mxu0 %v5170_v8  ;;  %3890 = vmatpush3.msra.mxu1 %v5192_v19 }
 0x413   : > { %3575 = vmatpush3.msra.mxu0 %v5138_v2  ;;  %3891 = vmatprep.subr.mxu1 %v4868_v26 }
 0x414   : > { %4485 = vrot.lane.b32.xlu0 %v4484_v37, %s4869_s9  ;;  %3576 = vmatprep.subr.mxu0 %v5168_v7 }
 0x415   : > { %3577 = vmatpush3.msra.mxu0 %v5136_v56  ;;  %3892 = vmatpush3.msra.mxu1 %v5190_v18 }
 0x416   : > { %3578 = vmatprep.subr.mxu0 %v5166_v4  ;;  %3893 = vmatprep.subr.mxu1 %v4868_v26 }
 0x417   : > { %3579 = vmatpush3.msra.mxu0 %v5134_v55  ;;  %3894 = vmatpush3.msra.mxu1 %v5188_v17 }
 0x418   : > { %1694 = vrot.lane.b32.xlu0 %v1686_v38, %s4869_s9  ;;  %3580 = vmatprep.subr.mxu0 %v5164_v3 }
 0x419   : > { %3581 = vmatpush3.msra.mxu0 %v5132_v54  ;;  %3895 = vmatprep.subr.mxu1 %v4868_v26 }
 0x41a   : > { %3582 = vmatprep.subr.mxu0 %v5162_v1  ;;  %3896 = vmatpush3.msra.mxu1 %v5186_v16 }
 0x41b   : > { %3583 = vmatpush3.msra.mxu0 %v5130_v53  ;;  %3897 = vmatprep.subr.mxu1 %v4868_v26 }
 0x41c   : > { %3584 = vmatprep.subr.mxu0 %v5160_v0  ;;  %3898 = vmatpush3.msra.mxu1 %v5184_v15 }
 0x41d   : > { %3585 = vmatpush3.msra.mxu0 %v5128_v52  ;;  %3899 = vmatprep.subr.mxu1 %v4868_v26 }
 0x41e   : > { %3586 = vmatprep.subr.mxu0 %v5158_v63  ;;  %3900 = vmatpush3.msra.mxu1 %v5182_v14 }
 0x41f   : > { %3587 = vmatpush3.msra.mxu0 %v5126_v51  ;;  %3901 = vmatprep.mubr.msk.f32.mxu1 %vm4870_vm3, %v4868_v26 }
 0x420   : > { %3588 = vmatprep.subr.mxu0 %v5156_v62 }
 0x421   : > { %3589 = vmatpush3.msra.mxu0 %v5124_v50 }
 0x422   : > { %3590 = vmatprep.subr.mxu0 %v5154_v61 }
 0x423   : > { %3591 = vmatpush3.msra.mxu0 %v5122_v49 }
 0x424   : > { %3592 = vmatprep.subr.mxu0 %v5152_v60 }
 0x425   : > { %3593 = vmatpush3.msra.mxu0 %v5120_v48 }
 0x426   : > { %3594 = vmatprep.subr.mxu0 %v5150_v59 }
 0x427   : > { %3595 = vmatpush3.msra.mxu0 %v5118_v47 }
 0x486   : > { %v4486_v39 = vpop.permute.xlu0 %4485 }
 0x487   : > { %v4488_v40 = vunpack.i.h.bf16 %v4486_v39  ;;  %v4487_v41 = vunpack.i.l.bf16 %v4486_v39 }
 0x489   : > { %v1697_v43 = vsel %vm1696_vm4, %v4488_v40, %v4487_v41 }
 0x48a   : > { %v1695_v42 = vpop.permute.xlu0 %1694  ;;  %v1702_v46 = vmax.f32 %v5218_v33, %v1697_v43  ;;  %v5261_v33 = vld [vmem:[#allocation23] ss:$0 sm:$0xff] (%p1666_p3) }
 0x48b   : > { %v1704_v44 = vmax.f32 %v1686_v38, %v1695_v42  ;;  %v1698_v45 = vsel %vm1696_vm4, %v4487_v41, %v1695_v42 }
 0x48c   : > { %v1703_v28 = vmax.f32 %v1685_v34, %v1698_v45 }
 0x48d   : > { %3902 = vmatmul.mubr.msk.f32.vlgmr.msra.gmra.mxu1 %vm1711_vm5, %v1704_v44 }
 0x48e   : > { %1779 = vmatprep.mubr.f32.mxu0 %v1703_v28 }
 0x48f   : > { %1780 = vmatmul.mubr.f32.vlgmr.msra.gmra.mxu0 %v1702_v46 }
 0x54d   : > { %v1851_v30 = vpop.f32.mrf.mxu1 }
 0x54f   : > { %v3596_v26 = vpop.f32.mrf.mxu0  ;;  %v3903_v29 = vpop.f32.mrf.mxu1 }
 0x551   : > { %v3597_v27 = vpop.f32.mrf.mxu0 }
 0x552   : > { %v3598_v31 = vadd.f32 %v3597_v27, %v3596_v26 }
 0x554   : > { %v1782_v32 = vadd.f32 %v3598_v31, %v5202_v25 }
 0x556   : > { %v1852_v35 = vadd.f32 %v1851_v30, %v1782_v32  ;;  %1668 = sbr.rel (!%p1666_p3) target bundleno = 1032 (0x408), region = 269 }
 0x558   : > { %v1855_v36 = vmax.f32 %v1852_v35, 0.0 }
 0x55a   : > { %1858 = vst [vmem:[%s1857_s1] sm:$0xff] %v1855_v36 }
 0x55b LB: > { %v1905_v34 = vld [vmem:[#allocation22 + $0xf8] sm:$0xff]  ;;  %v4871_v38 = vmov 0.0   ;;  %v1904_v39 = vld [vmem:[#allocation22 + $0xf0] sm:$0xff]  ;;  %v1903_v47 = vld [vmem:[#allocation22 + $0xe8] sm:$0xff]  ;;  %s3330_s19 = sshll.u32 %s4835_s18, 3  ;;  %vm4872_vm6 = vmmov 0   ;;  %s4835_s18 = sphi %s5263_s18, %s1865_s18  }
 0x55c   : > { %v1884_v37 = vld [vmem:[#allocation22 + $0x78] sm:$0xff]  ;;  %3904 = vmatprep.subr.mxu0 %v4871_v38  ;;  %3939 = vmatprep.subr.mxu1 %v4871_v38  ;;  %v1883_v40 = vld [vmem:[#allocation22 + $0x70] sm:$0xff]  ;;  %v1882_v48 = vld [vmem:[#allocation22 + $0x68] sm:$0xff]  ;;  %s5301_s8 = scalar_lea.vmem [#allocation5], %s3330_s19  ;;  %s2146_s11 = scalar_lea.vmem [#allocation6], %s3330_s19 }
 0x55d   : > { %3905 = vmatpush3.msra.mxu0 %v1905_v34  ;;  %3940 = vmatpush3.msra.mxu1 %v1884_v37  ;;  %v1902_v49 = vld [vmem:[#allocation22 + $0xe0] sm:$0xff]  ;;  %v1901_v51 = vld [vmem:[#allocation22 + $0xd8] sm:$0xff]  ;;  %v1900_v53 = vld [vmem:[#allocation22 + $0xd0] sm:$0xff]  ;;  %s1865_s18 = sadd.s32 1, %s4835_s18  }
 0x55e   : > { %3906 = vmatprep.subr.mxu0 %v4871_v38  ;;  %3941 = vmatprep.subr.mxu1 %v4871_v38  ;;  %v1881_v50 = vld [vmem:[#allocation22 + $0x60] sm:$0xff]  ;;  %v1880_v52 = vld [vmem:[#allocation22 + $0x58] sm:$0xff]  ;;  %v1879_v54 = vld [vmem:[#allocation22 + $0x50] sm:$0xff]  ;;  %p1862_p4 = scmp.ge.s32.totalorder %s1865_s18, 9  }
 0x55f   : > { %3907 = vmatpush3.msra.mxu0 %v1904_v39  ;;  %3942 = vmatpush3.msra.mxu1 %v1883_v40  ;;  %v1899_v55 = vld [vmem:[#allocation22 + $0xc8] sm:$0xff]  ;;  %v1898_v2 = vld [vmem:[#allocation22 + $0xc0] sm:$0xff]  ;;  %v1897_v6 = vld [vmem:[#allocation22 + $0xb8] sm:$0xff]  ;;  %s5335_s20 = smov (%p1862_p4), 0  }
 0x560   : > { %3908 = vmatprep.subr.mxu0 %v4871_v38  ;;  %3943 = vmatprep.subr.mxu1 %v4871_v38  ;;  %v1878_v56 = vld [vmem:[#allocation22 + $0x48] sm:$0xff]  ;;  %v1877_v5 = vld [vmem:[#allocation22 + $0x40] sm:$0xff]  ;;  %v1876_v21 = vld [vmem:[#allocation22 + $0x38] sm:$0xff] }
 0x561   : > { %3909 = vmatpush3.msra.mxu0 %v1903_v47  ;;  %3944 = vmatpush3.msra.mxu1 %v1882_v48  ;;  %v1896_v57 = vld [vmem:[#allocation22 + $0xb0] sm:$0xff]  ;;  %v1895_v59 = vld [vmem:[#allocation22 + $0xa8] sm:$0xff]  ;;  %v1894_v61 = vld [vmem:[#allocation22 + $0xa0] sm:$0xff] }
 0x562   : > { %3910 = vmatprep.subr.mxu0 %v4871_v38  ;;  %3945 = vmatprep.subr.mxu1 %v4871_v38  ;;  %v1875_v58 = vld [vmem:[#allocation22 + $0x30] sm:$0xff]  ;;  %v1874_v60 = vld [vmem:[#allocation22 + $0x28] sm:$0xff]  ;;  %v1873_v62 = vld [vmem:[#allocation22 + $0x20] sm:$0xff] }
 0x563   : > { %3911 = vmatpush3.msra.mxu0 %v1902_v49  ;;  %3946 = vmatpush3.msra.mxu1 %v1881_v50  ;;  %v1893_v63 = vld [vmem:[#allocation22 + $0x98] sm:$0xff]  ;;  %v1892_v1 = vld [vmem:[#allocation22 + $0x90] sm:$0xff]  ;;  %v1891_v4 = vld [vmem:[#allocation22 + $0x88] sm:$0xff] }
 0x564   : > { %3912 = vmatprep.subr.mxu0 %v4871_v38  ;;  %3947 = vmatprep.subr.mxu1 %v4871_v38  ;;  %v1872_v0 = vld [vmem:[#allocation22 + $0x18] sm:$0xff]  ;;  %v1871_v3 = vld [vmem:[#allocation22 + $0x10] sm:$0xff]  ;;  %v1870_v7 = vld [vmem:[#allocation22 + $0x8] sm:$0xff] }
 0x565   : > { %3913 = vmatpush3.msra.mxu0 %v1901_v51  ;;  %3948 = vmatpush3.msra.mxu1 %v1880_v52  ;;  %v1890_v8 = vld [vmem:[#allocation22 + $0x80] sm:$0xff]  ;;  %v1868_v11 = vld [vmem:[%s5301_s8] sm:$0xff]  ;;  %v2064_v14 = vld [vmem:[#allocation22 + $0x168] sm:$0xff] }
 0x566   : > { %3914 = vmatprep.subr.mxu0 %v4871_v38  ;;  %3949 = vmatprep.subr.mxu1 %v4871_v38  ;;  %v3332_v9 = vld [vmem:[%s5301_s8 + $0x8] sm:$0xff]  ;;  %v2065_v13 = vld [vmem:[#allocation22 + $0x170] sm:$0xff]  ;;  %v2060_v18 = vld [vmem:[#allocation22 + $0x148] sm:$0xff] }
 0x567   : > { %3915 = vmatpush3.msra.mxu0 %v1900_v53  ;;  %3950 = vmatpush3.msra.mxu1 %v1879_v54  ;;  %v1869_v10 = vld [vmem:[#allocation22] sm:$0xff]  ;;  %v2066_v12 = vld [vmem:[#allocation22 + $0x178] sm:$0xff]  ;;  %v2061_v17 = vld [vmem:[#allocation22 + $0x150] sm:$0xff] }
 0x568   : > { %3916 = vmatprep.subr.mxu0 %v4871_v38  ;;  %3951 = vmatprep.subr.mxu1 %v4871_v38  ;;  %v2063_v15 = vld [vmem:[#allocation22 + $0x160] sm:$0xff]  ;;  %v2062_v16 = vld [vmem:[#allocation22 + $0x158] sm:$0xff]  ;;  %v2057_v22 = vld [vmem:[#allocation22 + $0x130] sm:$0xff] }
 0x569   : > { %3917 = vmatpush3.msra.mxu0 %v1899_v55  ;;  %3952 = vmatpush3.msra.mxu1 %v1878_v56  ;;  %v2059_v19 = vld [vmem:[#allocation22 + $0x140] sm:$0xff]  ;;  %v2058_v20 = vld [vmem:[#allocation22 + $0x138] sm:$0xff]  ;;  %v2056_v23 = vld [vmem:[#allocation22 + $0x128] sm:$0xff] }
 0x56a   : > { %3918 = vmatprep.subr.mxu0 %v4871_v38  ;;  %3953 = vmatprep.subr.mxu1 %v4871_v38  ;;  %v2055_v24 = vld [vmem:[#allocation22 + $0x120] sm:$0xff]  ;;  %v2054_v25 = vld [vmem:[#allocation22 + $0x118] sm:$0xff]  ;;  %v2053_v41 = vld [vmem:[#allocation22 + $0x110] sm:$0xff] }
 0x56b   : > { %3919 = vmatpush3.msra.mxu0 %v1898_v2  ;;  %3954 = vmatpush3.msra.mxu1 %v1877_v5  ;;  %v2052_v42 = vld [vmem:[#allocation22 + $0x108] sm:$0xff]  ;;  %v2051_v43 = vld [vmem:[#allocation22 + $0x100] sm:$0xff] }
 0x56c   : > { %3920 = vmatprep.subr.mxu0 %v4871_v38  ;;  %3955 = vmatprep.subr.mxu1 %v4871_v38  ;;  %v3334_v44 = vld [vmem:[%s5301_s8 + $0x10] sm:$0xff]  ;;  %v5333_v36 = vld [vmem:[#allocation26] ss:$0 sm:$0xff] (%p1862_p4) }
 0x56d   : > { %3921 = vmatpush3.msra.mxu0 %v1897_v6  ;;  %3956 = vmatpush3.msra.mxu1 %v1876_v21 }
 0x56e   : > { %3922 = vmatprep.subr.mxu0 %v4871_v38  ;;  %3957 = vmatprep.subr.mxu1 %v4871_v38 }
 0x56f   : > { %3923 = vmatpush3.msra.mxu0 %v1896_v57  ;;  %3958 = vmatpush3.msra.mxu1 %v1875_v58 }
 0x570   : > { %3924 = vmatprep.subr.mxu0 %v4871_v38  ;;  %3959 = vmatprep.subr.mxu1 %v4871_v38 }
 0x571   : > { %3925 = vmatpush3.msra.mxu0 %v1895_v59  ;;  %3960 = vmatpush3.msra.mxu1 %v1874_v60 }
 0x572   : > { %3926 = vmatprep.subr.mxu0 %v4871_v38  ;;  %3961 = vmatprep.subr.mxu1 %v4871_v38 }
 0x573   : > { %3927 = vmatpush3.msra.mxu0 %v1894_v61  ;;  %3962 = vmatpush3.msra.mxu1 %v1873_v62 }
 0x574   : > { %3928 = vmatprep.subr.mxu0 %v4871_v38  ;;  %3963 = vmatprep.subr.mxu1 %v4871_v38 }
 0x575   : > { %3929 = vmatpush3.msra.mxu0 %v1893_v63  ;;  %3964 = vmatpush3.msra.mxu1 %v1872_v0 }
 0x576   : > { %3930 = vmatprep.subr.mxu0 %v4871_v38  ;;  %3965 = vmatprep.subr.mxu1 %v4871_v38 }
 0x577   : > { %3931 = vmatpush3.msra.mxu0 %v1892_v1  ;;  %3966 = vmatpush3.msra.mxu1 %v1871_v3 }
 0x578   : > { %3932 = vmatprep.subr.mxu0 %v4871_v38  ;;  %3967 = vmatprep.subr.mxu1 %v4871_v38 }
 0x579   : > { %3933 = vmatpush3.msra.mxu0 %v1891_v4  ;;  %3968 = vmatpush3.msra.mxu1 %v1870_v7 }
 0x57a   : > { %3934 = vmatprep.subr.mxu0 %v4871_v38  ;;  %3936 = vmatprep.mubr.msk.f32.mxu0 %vm4872_vm6, %v4871_v38 }
 0x57b   : > { %3935 = vmatpush3.msra.mxu0 %v1890_v8  ;;  %3969 = vmatprep.subr.mxu1 %v4871_v38 }
 0x57c   : > { %3937 = vmatmul.mubr.f32.vlgmr.msra.gmra.mxu0 %v3332_v9  ;;  %3970 = vmatpush3.msra.mxu1 %v1869_v10 }
 0x57d   : > { %3971 = vmatprep.mubr.msk.f32.mxu1 %vm4872_vm6, %v4871_v38  ;;  %3974 = vmatprep.subr.mxu0 %v4871_v38 }
 0x57e   : > { %3972 = vmatmul.mubr.f32.vlgmr.msra.gmra.mxu1 %v1868_v11  ;;  %3975 = vmatpush3.msra.mxu0 %v2066_v12 }
 0x57f   : > { %3976 = vmatprep.subr.mxu0 %v4871_v38  ;;  %4006 = vmatprep.mubr.msk.f32.mxu0 %vm4872_vm6, %v4871_v38 }
 0x580   : > { %3977 = vmatpush3.msra.mxu0 %v2065_v13 }
 0x581   : > { %3978 = vmatprep.subr.mxu0 %v4871_v38 }
 0x582   : > { %3979 = vmatpush3.msra.mxu0 %v2064_v14 }
 0x583   : > { %3980 = vmatprep.subr.mxu0 %v4871_v38 }
 0x584   : > { %3981 = vmatpush3.msra.mxu0 %v2063_v15 }
 0x585   : > { %3982 = vmatprep.subr.mxu0 %v4871_v38 }
 0x586   : > { %3983 = vmatpush3.msra.mxu0 %v2062_v16 }
 0x587   : > { %3984 = vmatprep.subr.mxu0 %v4871_v38 }
 0x588   : > { %3985 = vmatpush3.msra.mxu0 %v2061_v17 }
 0x589   : > { %3986 = vmatprep.subr.mxu0 %v4871_v38 }
 0x58a   : > { %3987 = vmatpush3.msra.mxu0 %v2060_v18 }
 0x58b   : > { %3988 = vmatprep.subr.mxu0 %v4871_v38 }
 0x58c   : > { %3989 = vmatpush3.msra.mxu0 %v2059_v19 }
 0x58d   : > { %3990 = vmatprep.subr.mxu0 %v4871_v38 }
 0x58e   : > { %3991 = vmatpush3.msra.mxu0 %v2058_v20 }
 0x58f   : > { %3992 = vmatprep.subr.mxu0 %v4871_v38 }
 0x590   : > { %3993 = vmatpush3.msra.mxu0 %v2057_v22 }
 0x591   : > { %3994 = vmatprep.subr.mxu0 %v4871_v38 }
 0x592   : > { %3995 = vmatpush3.msra.mxu0 %v2056_v23 }
 0x593   : > { %3996 = vmatprep.subr.mxu0 %v4871_v38 }
 0x594   : > { %3997 = vmatpush3.msra.mxu0 %v2055_v24 }
 0x595   : > { %3998 = vmatprep.subr.mxu0 %v4871_v38 }
 0x596   : > { %3999 = vmatpush3.msra.mxu0 %v2054_v25 }
 0x597   : > { %4000 = vmatprep.subr.mxu0 %v4871_v38 }
 0x598   : > { %4001 = vmatpush3.msra.mxu0 %v2053_v41 }
 0x599   : > { %4002 = vmatprep.subr.mxu0 %v4871_v38 }
 0x59a   : > { %4003 = vmatpush3.msra.mxu0 %v2052_v42 }
 0x59b   : > { %4004 = vmatprep.subr.mxu0 %v4871_v38 }
 0x59c   : > { %4005 = vmatpush3.msra.mxu0 %v2051_v43 }
 0x59d   : > { %4007 = vmatmul.mubr.f32.vlgmr.msra.gmra.mxu0 %v3334_v44 }
 0x63c   : > { %v1972_v45 = vpop.f32.mrf.mxu0 }
 0x63e   : > { %v2042_v28 = vpop.f32.mrf.mxu1  ;;  %v3938_v46 = vpop.f32.mrf.mxu0 }
 0x63f   : > { %v2043_v26 = vadd.f32 %v2042_v28, %v1972_v45 }
 0x640   : > { %v3973_v30 = vpop.f32.mrf.mxu1 }
 0x65d   : > { %v2133_v29 = vpop.f32.mrf.mxu0 }
 0x65e   : > { %v2137_v27 = vadd.f32 %v2133_v29, %v2043_v26 }
 0x65f   : > { %v4008_v31 = vpop.f32.mrf.mxu0 }
 0x660   : > { %v2144_v32 = vadd.f32 %v5261_v33, %v2137_v27  ;;  %1864 = sbr.rel (!%p1862_p4) target bundleno = 1371 (0x55b), region = 280 }
 0x662   : > { %v2145_v35 = vmax.f32 %v2144_v32, 0.0 }
 0x664   : > { %2147 = vst [vmem:[%s2146_s11] sm:$0xff] %v2145_v35 }
 0x665 LB: > { %v2194_v34 = vld [vmem:[#allocation25 + $0xf8] sm:$0xff]  ;;  %v4873_v38 = vmov 0.0   ;;  %v2193_v39 = vld [vmem:[#allocation25 + $0xf0] sm:$0xff]  ;;  %v2192_v33 = vld [vmem:[#allocation25 + $0xe8] sm:$0xff]  ;;  %s3336_s21 = sshll.u32 %s4839_s20, 3  ;;  %vm4874_vm7 = vmmov 0   ;;  %s4839_s20 = sphi %s5335_s20, %s2154_s20  }
 0x666   : > { %v2173_v37 = vld [vmem:[#allocation25 + $0x78] sm:$0xff]  ;;  %4009 = vmatprep.subr.mxu0 %v4873_v38  ;;  %4044 = vmatprep.subr.mxu1 %v4873_v38  ;;  %v2172_v40 = vld [vmem:[#allocation25 + $0x70] sm:$0xff]  ;;  %v2171_v47 = vld [vmem:[#allocation25 + $0x68] sm:$0xff]  ;;  %s5373_s13 = scalar_lea.vmem [#allocation6], %s3336_s21  ;;  %s2435_s14 = scalar_lea.vmem [#allocation7], %s3336_s21 }
 0x667   : > { %4010 = vmatpush3.msra.mxu0 %v2194_v34  ;;  %4045 = vmatpush3.msra.mxu1 %v2173_v37  ;;  %v2191_v48 = vld [vmem:[#allocation25 + $0xe0] sm:$0xff]  ;;  %v2190_v50 = vld [vmem:[#allocation25 + $0xd8] sm:$0xff]  ;;  %v2189_v52 = vld [vmem:[#allocation25 + $0xd0] sm:$0xff]  ;;  %s2154_s20 = sadd.s32 1, %s4839_s20  }
 0x668   : > { %4011 = vmatprep.subr.mxu0 %v4873_v38  ;;  %4046 = vmatprep.subr.mxu1 %v4873_v38  ;;  %v2170_v49 = vld [vmem:[#allocation25 + $0x60] sm:$0xff]  ;;  %v2169_v51 = vld [vmem:[#allocation25 + $0x58] sm:$0xff]  ;;  %v2168_v53 = vld [vmem:[#allocation25 + $0x50] sm:$0xff]  ;;  %p2151_p5 = scmp.ge.s32.totalorder %s2154_s20, 7  }
 0x669   : > { %4012 = vmatpush3.msra.mxu0 %v2193_v39  ;;  %4047 = vmatpush3.msra.mxu1 %v2172_v40  ;;  %v2188_v54 = vld [vmem:[#allocation25 + $0xc8] sm:$0xff]  ;;  %v2187_v56 = vld [vmem:[#allocation25 + $0xc0] sm:$0xff]  ;;  %v2186_v5 = vld [vmem:[#allocation25 + $0xb8] sm:$0xff]  ;;  %s5419_s10 = smov (%p2151_p5), 0  }
 0x66a   : > { %4013 = vmatprep.subr.mxu0 %v4873_v38  ;;  %4048 = vmatprep.subr.mxu1 %v4873_v38  ;;  %v2167_v55 = vld [vmem:[#allocation25 + $0x48] sm:$0xff]  ;;  %v2166_v2 = vld [vmem:[#allocation25 + $0x40] sm:$0xff]  ;;  %v2165_v6 = vld [vmem:[#allocation25 + $0x38] sm:$0xff] }
 0x66b   : > { %4014 = vmatpush3.msra.mxu0 %v2192_v33  ;;  %4049 = vmatpush3.msra.mxu1 %v2171_v47  ;;  %v2185_v21 = vld [vmem:[#allocation25 + $0xb0] sm:$0xff]  ;;  %v2184_v58 = vld [vmem:[#allocation25 + $0xa8] sm:$0xff]  ;;  %v2183_v60 = vld [vmem:[#allocation25 + $0xa0] sm:$0xff] }
 0x66c   : > { %4015 = vmatprep.subr.mxu0 %v4873_v38  ;;  %4050 = vmatprep.subr.mxu1 %v4873_v38  ;;  %v2164_v57 = vld [vmem:[#allocation25 + $0x30] sm:$0xff]  ;;  %v2163_v59 = vld [vmem:[#allocation25 + $0x28] sm:$0xff]  ;;  %v2162_v61 = vld [vmem:[#allocation25 + $0x20] sm:$0xff] }
 0x66d   : > { %4016 = vmatpush3.msra.mxu0 %v2191_v48  ;;  %4051 = vmatpush3.msra.mxu1 %v2170_v49  ;;  %v2182_v62 = vld [vmem:[#allocation25 + $0x98] sm:$0xff]  ;;  %v2181_v0 = vld [vmem:[#allocation25 + $0x90] sm:$0xff]  ;;  %v2180_v3 = vld [vmem:[#allocation25 + $0x88] sm:$0xff] }
 0x66e   : > { %4017 = vmatprep.subr.mxu0 %v4873_v38  ;;  %4052 = vmatprep.subr.mxu1 %v4873_v38  ;;  %v2161_v63 = vld [vmem:[#allocation25 + $0x18] sm:$0xff]  ;;  %v2160_v1 = vld [vmem:[#allocation25 + $0x10] sm:$0xff]  ;;  %v2159_v4 = vld [vmem:[#allocation25 + $0x8] sm:$0xff] }
 0x66f   : > { %4018 = vmatpush3.msra.mxu0 %v2190_v50  ;;  %4053 = vmatpush3.msra.mxu1 %v2169_v51  ;;  %v2179_v7 = vld [vmem:[#allocation25 + $0x80] sm:$0xff]  ;;  %v2157_v10 = vld [vmem:[%s5373_s13] sm:$0xff]  ;;  %v2353_v13 = vld [vmem:[#allocation25 + $0x168] sm:$0xff] }
 0x670   : > { %4019 = vmatprep.subr.mxu0 %v4873_v38  ;;  %4054 = vmatprep.subr.mxu1 %v4873_v38  ;;  %v3338_v8 = vld [vmem:[%s5373_s13 + $0x8] sm:$0xff]  ;;  %v2354_v12 = vld [vmem:[#allocation25 + $0x170] sm:$0xff]  ;;  %v2349_v17 = vld [vmem:[#allocation25 + $0x148] sm:$0xff] }
 0x671   : > { %4020 = vmatpush3.msra.mxu0 %v2189_v52  ;;  %4055 = vmatpush3.msra.mxu1 %v2168_v53  ;;  %v2158_v9 = vld [vmem:[#allocation25] sm:$0xff]  ;;  %v2355_v11 = vld [vmem:[#allocation25 + $0x178] sm:$0xff]  ;;  %v2350_v16 = vld [vmem:[#allocation25 + $0x150] sm:$0xff] }
 0x672   : > { %4021 = vmatprep.subr.mxu0 %v4873_v38  ;;  %4056 = vmatprep.subr.mxu1 %v4873_v38  ;;  %v2352_v14 = vld [vmem:[#allocation25 + $0x160] sm:$0xff]  ;;  %v2351_v15 = vld [vmem:[#allocation25 + $0x158] sm:$0xff]  ;;  %v2346_v20 = vld [vmem:[#allocation25 + $0x130] sm:$0xff] }
 0x673   : > { %4022 = vmatpush3.msra.mxu0 %v2188_v54  ;;  %4057 = vmatpush3.msra.mxu1 %v2167_v55  ;;  %v2348_v18 = vld [vmem:[#allocation25 + $0x140] sm:$0xff]  ;;  %v2347_v19 = vld [vmem:[#allocation25 + $0x138] sm:$0xff]  ;;  %v2345_v22 = vld [vmem:[#allocation25 + $0x128] sm:$0xff] }
 0x674   : > { %4023 = vmatprep.subr.mxu0 %v4873_v38  ;;  %4058 = vmatprep.subr.mxu1 %v4873_v38  ;;  %v2344_v23 = vld [vmem:[#allocation25 + $0x120] sm:$0xff]  ;;  %v2343_v24 = vld [vmem:[#allocation25 + $0x118] sm:$0xff]  ;;  %v2342_v25 = vld [vmem:[#allocation25 + $0x110] sm:$0xff] }
 0x675   : > { %4024 = vmatpush3.msra.mxu0 %v2187_v56  ;;  %4059 = vmatpush3.msra.mxu1 %v2166_v2  ;;  %v2341_v41 = vld [vmem:[#allocation25 + $0x108] sm:$0xff]  ;;  %v2340_v42 = vld [vmem:[#allocation25 + $0x100] sm:$0xff]  ;;  %v5409_v37 = vld [vmem:[#allocation28 + $0x10] sm:$0xff] (%p2151_p5) }
 0x676   : > { %4025 = vmatprep.subr.mxu0 %v4873_v38  ;;  %4060 = vmatprep.subr.mxu1 %v4873_v38  ;;  %v3340_v43 = vld [vmem:[%s5373_s13 + $0x10] sm:$0xff]  ;;  %v5417_v33 = vld [vmem:[#allocation28 + $0x30] sm:$0xff] (%p2151_p5)  ;;  %v2444_v47 = vld [vmem:[#allocation28 + $0x38] sm:$0xff] (%p2151_p5) }
 0x677   : > { %4026 = vmatpush3.msra.mxu0 %v2186_v5  ;;  %4061 = vmatpush3.msra.mxu1 %v2165_v6  ;;  %v5405_v35 = vld [vmem:[#allocation28] sm:$0xff] (%p2151_p5)  ;;  %v5407_v34 = vld [vmem:[#allocation28 + $0x8] sm:$0xff] (%p2151_p5)  ;;  %v2447_v50 = vld [vmem:[#allocation28 + $0x50] sm:$0xff] (%p2151_p5) }
 0x678   : > { %4027 = vmatprep.subr.mxu0 %v4873_v38  ;;  %4062 = vmatprep.subr.mxu1 %v4873_v38  ;;  %v5413_v39 = vld [vmem:[#allocation28 + $0x20] sm:$0xff] (%p2151_p5)  ;;  %v5415_v40 = vld [vmem:[#allocation28 + $0x28] sm:$0xff] (%p2151_p5)  ;;  %v2448_v51 = vld [vmem:[#allocation28 + $0x58] sm:$0xff] (%p2151_p5) }
 0x679   : > { %4028 = vmatpush3.msra.mxu0 %v2185_v21  ;;  %4063 = vmatpush3.msra.mxu1 %v2164_v57  ;;  %v2445_v48 = vld [vmem:[#allocation28 + $0x40] sm:$0xff] (%p2151_p5)  ;;  %v2446_v49 = vld [vmem:[#allocation28 + $0x48] sm:$0xff] (%p2151_p5)  ;;  %v2451_v53 = vld [vmem:[#allocation28 + $0x70] sm:$0xff] (%p2151_p5) }
 0x67a   : > { %4029 = vmatprep.subr.mxu0 %v4873_v38  ;;  %4064 = vmatprep.subr.mxu1 %v4873_v38  ;;  %v2449_v52 = vld [vmem:[#allocation28 + $0x60] sm:$0xff] (%p2151_p5)  ;;  %v2452_v54 = vld [vmem:[#allocation28 + $0x78] sm:$0xff] (%p2151_p5) }
 0x67b   : > { %4030 = vmatpush3.msra.mxu0 %v2184_v58  ;;  %4065 = vmatpush3.msra.mxu1 %v2163_v59  ;;  %v3343_v55 = vld [vmem:[#allocation29] ss:$0 sm:$0xff] (%p2151_p5) }
 0x67c   : > { %4031 = vmatprep.subr.mxu0 %v4873_v38  ;;  %4066 = vmatprep.subr.mxu1 %v4873_v38 }
 0x67d   : > { %4032 = vmatpush3.msra.mxu0 %v2183_v60  ;;  %4067 = vmatpush3.msra.mxu1 %v2162_v61 }
 0x67e   : > { %4033 = vmatprep.subr.mxu0 %v4873_v38  ;;  %4068 = vmatprep.subr.mxu1 %v4873_v38 }
 0x67f   : > { %4034 = vmatpush3.msra.mxu0 %v2182_v62  ;;  %4069 = vmatpush3.msra.mxu1 %v2161_v63 }
 0x680   : > { %4035 = vmatprep.subr.mxu0 %v4873_v38  ;;  %4070 = vmatprep.subr.mxu1 %v4873_v38 }
 0x681   : > { %4036 = vmatpush3.msra.mxu0 %v2181_v0  ;;  %4071 = vmatpush3.msra.mxu1 %v2160_v1 }
 0x682   : > { %4037 = vmatprep.subr.mxu0 %v4873_v38  ;;  %4072 = vmatprep.subr.mxu1 %v4873_v38 }
 0x683   : > { %4038 = vmatpush3.msra.mxu0 %v2180_v3  ;;  %4073 = vmatpush3.msra.mxu1 %v2159_v4 }
 0x684   : > { %4039 = vmatprep.subr.mxu0 %v4873_v38  ;;  %4041 = vmatprep.mubr.msk.f32.mxu0 %vm4874_vm7, %v4873_v38 }
 0x685   : > { %4040 = vmatpush3.msra.mxu0 %v2179_v7  ;;  %4074 = vmatprep.subr.mxu1 %v4873_v38 }
 0x686   : > { %4042 = vmatmul.mubr.f32.vlgmr.msra.gmra.mxu0 %v3338_v8  ;;  %4075 = vmatpush3.msra.mxu1 %v2158_v9 }
 0x687   : > { %4076 = vmatprep.mubr.msk.f32.mxu1 %vm4874_vm7, %v4873_v38  ;;  %4079 = vmatprep.subr.mxu0 %v4873_v38 }
 0x688   : > { %4077 = vmatmul.mubr.f32.vlgmr.msra.gmra.mxu1 %v2157_v10  ;;  %4080 = vmatpush3.msra.mxu0 %v2355_v11 }
 0x689   : > { %4081 = vmatprep.subr.mxu0 %v4873_v38  ;;  %4111 = vmatprep.mubr.msk.f32.mxu0 %vm4874_vm7, %v4873_v38 }
 0x68a   : > { %4082 = vmatpush3.msra.mxu0 %v2354_v12 }
 0x68b   : > { %4083 = vmatprep.subr.mxu0 %v4873_v38 }
 0x68c   : > { %4084 = vmatpush3.msra.mxu0 %v2353_v13 }
 0x68d   : > { %4085 = vmatprep.subr.mxu0 %v4873_v38 }
 0x68e   : > { %4086 = vmatpush3.msra.mxu0 %v2352_v14 }
 0x68f   : > { %4087 = vmatprep.subr.mxu0 %v4873_v38 }
 0x690   : > { %4088 = vmatpush3.msra.mxu0 %v2351_v15 }
 0x691   : > { %4089 = vmatprep.subr.mxu0 %v4873_v38 }
 0x692   : > { %4090 = vmatpush3.msra.mxu0 %v2350_v16 }
 0x693   : > { %4091 = vmatprep.subr.mxu0 %v4873_v38 }
 0x694   : > { %4092 = vmatpush3.msra.mxu0 %v2349_v17 }
 0x695   : > { %4093 = vmatprep.subr.mxu0 %v4873_v38 }
 0x696   : > { %4094 = vmatpush3.msra.mxu0 %v2348_v18 }
 0x697   : > { %4095 = vmatprep.subr.mxu0 %v4873_v38 }
 0x698   : > { %4096 = vmatpush3.msra.mxu0 %v2347_v19 }
 0x699   : > { %4097 = vmatprep.subr.mxu0 %v4873_v38 }
 0x69a   : > { %4098 = vmatpush3.msra.mxu0 %v2346_v20 }
 0x69b   : > { %4099 = vmatprep.subr.mxu0 %v4873_v38 }
 0x69c   : > { %4100 = vmatpush3.msra.mxu0 %v2345_v22 }
 0x69d   : > { %4101 = vmatprep.subr.mxu0 %v4873_v38 }
 0x69e   : > { %4102 = vmatpush3.msra.mxu0 %v2344_v23 }
 0x69f   : > { %4103 = vmatprep.subr.mxu0 %v4873_v38 }
 0x6a0   : > { %4104 = vmatpush3.msra.mxu0 %v2343_v24 }
 0x6a1   : > { %4105 = vmatprep.subr.mxu0 %v4873_v38 }
 0x6a2   : > { %4106 = vmatpush3.msra.mxu0 %v2342_v25 }
 0x6a3   : > { %4107 = vmatprep.subr.mxu0 %v4873_v38 }
 0x6a4   : > { %4108 = vmatpush3.msra.mxu0 %v2341_v41 }
 0x6a5   : > { %4109 = vmatprep.subr.mxu0 %v4873_v38  ;;  %v5411_v38 = vld [vmem:[#allocation28 + $0x18] sm:$0xff] (%p2151_p5) }
 0x6a6   : > { %4110 = vmatpush3.msra.mxu0 %v2340_v42 }
 0x6a7   : > { %4112 = vmatmul.mubr.f32.vlgmr.msra.gmra.mxu0 %v3340_v43 }
 0x746   : > { %v2261_v44 = vpop.f32.mrf.mxu0 }
 0x748   : > { %v2331_v45 = vpop.f32.mrf.mxu1  ;;  %v4043_v28 = vpop.f32.mrf.mxu0 }
 0x749   : > { %v2332_v30 = vadd.f32 %v2331_v45, %v2261_v44 }
 0x74a   : > { %v4078_v46 = vpop.f32.mrf.mxu1 }
 0x767   : > { %v2422_v26 = vpop.f32.mrf.mxu0 }
 0x768   : > { %v2426_v29 = vadd.f32 %v2422_v26, %v2332_v30 }
 0x769   : > { %v4113_v27 = vpop.f32.mrf.mxu0 }
 0x76a   : > { %v2433_v31 = vadd.f32 %v5333_v36, %v2426_v29  ;;  %2153 = sbr.rel (!%p2151_p5) target bundleno = 1637 (0x665), region = 291  ;;  %v2450_v36 = vld [vmem:[#allocation28 + $0x68] sm:$0xff] (%p2151_p5) }
 0x76c   : > { %v2434_v32 = vmax.f32 %v2433_v31, 0.0 }
 0x76e   : > { %2436 = vst [vmem:[%s2435_s14] sm:$0xff] %v2434_v32 }
 0x76f LB: > { %v4875_v56 = vmov 0.0   ;;  %vm4876_vm8 = vmmov 0   ;;  %s3342_s25 = sshll.u32 %s4843_s10, 3  ;;  %s2459_s10 = sadd.s32 1, %s4843_s10   ;;  %s4843_s10 = sphi %s5419_s10, %s2459_s10  }
 0x770   : > { %4114 = vmatprep.subr.mxu0 %v4875_v56  ;;  %4146 = vmatprep.mubr.msk.f32.mxu0 %vm4876_vm8, %v4875_v56  ;;  %s2461_s2 = scalar_lea.vmem [#allocation7], %s3342_s25  ;;  %s2540_s3 = scalar_lea.vmem [#allocation8], %s3342_s25 }
 0x771   : > { %4115 = vmatpush3.msra.mxu0 %v2452_v54  ;;  %p2456_p6 = scmp.ge.s32.totalorder %s2459_s10, 7  }
 0x772   : > { %4116 = vmatprep.subr.mxu0 %v4875_v56  ;;  %v3359_v58 = vld [vmem:[%s5918_s15 + $0xf8] sm:$0xff] (%p2456_p6)  ;;  %v4877_v60 = vmov (%p2456_p6), 0.0   ;;  %v3358_v61 = vld [vmem:[%s5918_s15 + $0xf0] sm:$0xff] (%p2456_p6)  ;;  %v3357_v63 = vld [vmem:[%s5918_s15 + $0xe8] sm:$0xff] (%p2456_p6)  ;;  %vm4878_vm9 = vmmov (%p2456_p6), 0   ;;  %vm3168_vm10 = vcmask (%p2456_p6), 80896  }
 0x773   : > { %4117 = vmatpush3.msra.mxu0 %v2451_v53  ;;  %v2558_v59 = vld [vmem:[%s5918_s15 + $0x78] sm:$0xff] (%p2456_p6)  ;;  %4184 = vmatprep.subr.mxu1 (%p2456_p6), %v4877_v60  ;;  %v2557_v62 = vld [vmem:[%s5918_s15 + $0x70] sm:$0xff] (%p2456_p6)  ;;  %v2556_v0 = vld [vmem:[%s5918_s15 + $0x68] sm:$0xff] (%p2456_p6) }
 0x774   : > { %4118 = vmatprep.subr.mxu0 %v4875_v56  ;;  %4185 = vmatpush3.msra.mxu1 (%p2456_p6), %v2558_v59  ;;  %v3356_v1 = vld [vmem:[%s5918_s15 + $0xe0] sm:$0xff] (%p2456_p6)  ;;  %v3355_v4 = vld [vmem:[%s5918_s15 + $0xd8] sm:$0xff] (%p2456_p6)  ;;  %v3354_v8 = vld [vmem:[%s5918_s15 + $0xd0] sm:$0xff] (%p2456_p6) }
 0x775   : > { %4119 = vmatpush3.msra.mxu0 %v2450_v36  ;;  %v2462_v2 = vld [vmem:[%s2461_s2] sm:$0xff]  ;;  %4186 = vmatprep.subr.mxu1 (%p2456_p6), %v4877_v60  ;;  %v2554_v7 = vld [vmem:[%s5918_s15 + $0x58] sm:$0xff] (%p2456_p6)  ;;  %v2553_v9 = vld [vmem:[%s5918_s15 + $0x50] sm:$0xff] (%p2456_p6) }
 0x776   : > { %4120 = vmatprep.subr.mxu0 %v4875_v56  ;;  %4187 = vmatpush3.msra.mxu1 (%p2456_p6), %v2557_v62  ;;  %v2555_v3 = vld [vmem:[%s5918_s15 + $0x60] sm:$0xff] (%p2456_p6)  ;;  %v3353_v10 = vld [vmem:[%s5918_s15 + $0xc8] sm:$0xff] (%p2456_p6)  ;;  %v3351_v14 = vld [vmem:[%s5918_s15 + $0xb8] sm:$0xff] (%p2456_p6) }
 0x777   : > { %4121 = vmatpush3.msra.mxu0 %v2449_v52  ;;  %4188 = vmatprep.subr.mxu1 (%p2456_p6), %v4877_v60  ;;  %v2552_v11 = vld [vmem:[%s5918_s15 + $0x48] sm:$0xff] (%p2456_p6)  ;;  %v3352_v12 = vld [vmem:[%s5918_s15 + $0xc0] sm:$0xff] (%p2456_p6)  ;;  %v2550_v15 = vld [vmem:[%s5918_s15 + $0x38] sm:$0xff] (%p2456_p6) }
 0x778   : > { %4122 = vmatprep.subr.mxu0 %v4875_v56  ;;  %4189 = vmatpush3.msra.mxu1 (%p2456_p6), %v2556_v0  ;;  %v2551_v13 = vld [vmem:[%s5918_s15 + $0x40] sm:$0xff] (%p2456_p6)  ;;  %v3350_v16 = vld [vmem:[%s5918_s15 + $0xb0] sm:$0xff] (%p2456_p6)  ;;  %v3349_v18 = vld [vmem:[%s5918_s15 + $0xa8] sm:$0xff] (%p2456_p6) }
 0x779   : > { %4123 = vmatpush3.msra.mxu0 %v2448_v51  ;;  %4190 = vmatprep.subr.mxu1 (%p2456_p6), %v4877_v60  ;;  %v2549_v17 = vld [vmem:[%s5918_s15 + $0x30] sm:$0xff] (%p2456_p6)  ;;  %v2548_v19 = vld [vmem:[%s5918_s15 + $0x28] sm:$0xff] (%p2456_p6)  ;;  %v3348_v20 = vld [vmem:[%s5918_s15 + $0xa0] sm:$0xff] (%p2456_p6) }
 0x77a   : > { %4124 = vmatprep.subr.mxu0 %v4875_v56  ;;  %4191 = vmatpush3.msra.mxu1 (%p2456_p6), %v2555_v3  ;;  %v2547_v22 = vld [vmem:[%s5918_s15 + $0x20] sm:$0xff] (%p2456_p6)  ;;  %v3347_v23 = vld [vmem:[%s5918_s15 + $0x98] sm:$0xff] (%p2456_p6)  ;;  %v3346_v25 = vld [vmem:[%s5918_s15 + $0x90] sm:$0xff] (%p2456_p6) }
 0x77b   : > { %4125 = vmatpush3.msra.mxu0 %v2447_v50  ;;  %4192 = vmatprep.subr.mxu1 (%p2456_p6), %v4877_v60  ;;  %v2546_v24 = vld [vmem:[%s5918_s15 + $0x18] sm:$0xff] (%p2456_p6)  ;;  %v2545_v41 = vld [vmem:[%s5918_s15 + $0x10] sm:$0xff] (%p2456_p6)  ;;  %v3345_v42 = vld [vmem:[%s5918_s15 + $0x88] sm:$0xff] (%p2456_p6) }
 0x77c   : > { %4126 = vmatprep.subr.mxu0 %v4875_v56  ;;  %4193 = vmatpush3.msra.mxu1 (%p2456_p6), %v2554_v7  ;;  %v2544_v43 = vld [vmem:[%s5918_s15 + $0x8] sm:$0xff] (%p2456_p6)  ;;  %v3344_v44 = vld [vmem:[%s5918_s15 + $0x80] sm:$0xff] (%p2456_p6)  ;;  %v3375_v30 = vld [vmem:[%s5918_s15 + $0x178] sm:$0xff] (%p2456_p6) }
 0x77d   : > { %4127 = vmatpush3.msra.mxu0 %v2446_v49  ;;  %4194 = vmatprep.subr.mxu1 (%p2456_p6), %v4877_v60  ;;  %v2543_v28 = vld [vmem:[%s5918_s15] sm:$0xff] (%p2456_p6)  ;;  %v3374_v26 = vld [vmem:[%s5918_s15 + $0x170] sm:$0xff] (%p2456_p6)  ;;  %v3391_v29 = vld [vmem:[%s5918_s15 + $0x1f8] sm:$0xff] (%p2456_p6) }
 0x77e   : > { %4128 = vmatprep.subr.mxu0 %v4875_v56  ;;  %4195 = vmatpush3.msra.mxu1 (%p2456_p6), %v2553_v9  ;;  %v3373_v27 = vld [vmem:[%s5918_s15 + $0x168] sm:$0xff] (%p2456_p6)  ;;  %v3390_v31 = vld [vmem:[%s5918_s15 + $0x1f0] sm:$0xff] (%p2456_p6)  ;;  %v3372_v32 = vld [vmem:[%s5918_s15 + $0x160] sm:$0xff] (%p2456_p6) }
 0x77f   : > { %4129 = vmatpush3.msra.mxu0 %v2445_v48  ;;  %4196 = vmatprep.subr.mxu1 (%p2456_p6), %v4877_v60  ;;  %v3385_v48 = vld [vmem:[%s5918_s15 + $0x1c8] sm:$0xff] (%p2456_p6)  ;;  %v3367_v49 = vld [vmem:[%s5918_s15 + $0x138] sm:$0xff] (%p2456_p6)  ;;  %v3384_v50 = vld [vmem:[%s5918_s15 + $0x1c0] sm:$0xff] (%p2456_p6) }
 0x780   : > { %4130 = vmatprep.subr.mxu0 %v4875_v56  ;;  %4197 = vmatpush3.msra.mxu1 (%p2456_p6), %v2552_v11  ;;  %v3366_v51 = vld [vmem:[%s5918_s15 + $0x130] sm:$0xff] (%p2456_p6)  ;;  %v3383_v52 = vld [vmem:[%s5918_s15 + $0x1b8] sm:$0xff] (%p2456_p6)  ;;  %v3365_v36 = vld [vmem:[%s5918_s15 + $0x128] sm:$0xff] (%p2456_p6) }
 0x781   : > { %4131 = vmatpush3.msra.mxu0 %v2444_v47  ;;  %4198 = vmatprep.subr.mxu1 (%p2456_p6), %v4877_v60  ;;  %v3368_v47 = vld [vmem:[%s5918_s15 + $0x140] sm:$0xff] (%p2456_p6)  ;;  %v3382_v53 = vld [vmem:[%s5918_s15 + $0x1b0] sm:$0xff] (%p2456_p6)  ;;  %v3377_v59 = vld [vmem:[%s5918_s15 + $0x188] sm:$0xff] (%p2456_p6) }
 0x782   : > { %4132 = vmatprep.subr.mxu0 %v4875_v56  ;;  %4199 = vmatpush3.msra.mxu1 (%p2456_p6), %v2551_v13  ;;  %v3364_v54 = vld [vmem:[%s5918_s15 + $0x120] sm:$0xff] (%p2456_p6)  ;;  %v3423_v3 = vld [vmem:[%s5918_s15 + $0x2f8] sm:$0xff] (%p2456_p6)  ;;  %v3422_v7 = vld [vmem:[%s5918_s15 + $0x2f0] sm:$0xff] (%p2456_p6) }
 0x783   : > { %4133 = vmatpush3.msra.mxu0 %v5417_v33  ;;  %4200 = vmatprep.subr.mxu1 (%p2456_p6), %v4877_v60  ;;  %v3386_v33 = vld [vmem:[%s5918_s15 + $0x1d0] sm:$0xff] (%p2456_p6)  ;;  %v3376_v62 = vld [vmem:[%s5918_s15 + $0x180] sm:$0xff] (%p2456_p6)  ;;  %v3421_v9 = vld [vmem:[%s5918_s15 + $0x2e8] sm:$0xff] (%p2456_p6) }
 0x784   : > { %4134 = vmatprep.subr.mxu0 %v4875_v56  ;;  %4201 = vmatpush3.msra.mxu1 (%p2456_p6), %v2550_v15  ;;  %v3420_v11 = vld [vmem:[%s5918_s15 + $0x2e0] sm:$0xff] (%p2456_p6)  ;;  %v3419_v13 = vld [vmem:[%s5918_s15 + $0x2d8] sm:$0xff] (%p2456_p6)  ;;  %v3418_v15 = vld [vmem:[%s5918_s15 + $0x2d0] sm:$0xff] (%p2456_p6) }
 0x785   : > { %4135 = vmatpush3.msra.mxu0 %v5415_v40  ;;  %4202 = vmatprep.subr.mxu1 (%p2456_p6), %v4877_v60  ;;  %v3369_v40 = vld [vmem:[%s5918_s15 + $0x148] sm:$0xff] (%p2456_p6) }
 0x786   : > { %4136 = vmatprep.subr.mxu0 %v4875_v56  ;;  %4203 = vmatpush3.msra.mxu1 (%p2456_p6), %v2549_v17  ;;  %v3417_v17 = vld [vmem:[%s5918_s15 + $0x2c8] sm:$0xff] (%p2456_p6) }
 0x787   : > { %4137 = vmatpush3.msra.mxu0 %v5413_v39  ;;  %4204 = vmatprep.subr.mxu1 (%p2456_p6), %v4877_v60  ;;  %v3387_v39 = vld [vmem:[%s5918_s15 + $0x1d8] sm:$0xff] (%p2456_p6) }
 0x788   : > { %4138 = vmatprep.subr.mxu0 %v4875_v56  ;;  %4205 = vmatpush3.msra.mxu1 (%p2456_p6), %v2548_v19  ;;  %v3416_v19 = vld [vmem:[%s5918_s15 + $0x2c0] sm:$0xff] (%p2456_p6) }
 0x789   : > { %4139 = vmatpush3.msra.mxu0 %v5411_v38  ;;  %4206 = vmatprep.subr.mxu1 (%p2456_p6), %v4877_v60  ;;  %v3370_v38 = vld [vmem:[%s5918_s15 + $0x150] sm:$0xff] (%p2456_p6) }
 0x78a   : > { %4140 = vmatprep.subr.mxu0 %v4875_v56  ;;  %4207 = vmatpush3.msra.mxu1 (%p2456_p6), %v2547_v22  ;;  %v3415_v22 = vld [vmem:[%s5918_s15 + $0x2b8] sm:$0xff] (%p2456_p6) }
 0x78b   : > { %4141 = vmatpush3.msra.mxu0 %v5409_v37  ;;  %4208 = vmatprep.subr.mxu1 (%p2456_p6), %v4877_v60  ;;  %v3388_v37 = vld [vmem:[%s5918_s15 + $0x1e0] sm:$0xff] (%p2456_p6) }
 0x78c   : > { %4142 = vmatprep.subr.mxu0 %v4875_v56  ;;  %4209 = vmatpush3.msra.mxu1 (%p2456_p6), %v2546_v24  ;;  %v3414_v24 = vld [vmem:[%s5918_s15 + $0x2b0] sm:$0xff] (%p2456_p6) }
 0x78d   : > { %4143 = vmatpush3.msra.mxu0 %v5407_v34  ;;  %4210 = vmatprep.subr.mxu1 (%p2456_p6), %v4877_v60  ;;  %v3371_v34 = vld [vmem:[%s5918_s15 + $0x158] sm:$0xff] (%p2456_p6) }
 0x78e   : > { %4144 = vmatprep.subr.mxu0 %v4875_v56  ;;  %4211 = vmatpush3.msra.mxu1 (%p2456_p6), %v2545_v41  ;;  %v3363_v56 = vld [vmem:[%s5918_s15 + $0x118] sm:$0xff] (%p2456_p6)  ;;  %v3413_v41 = vld [vmem:[%s5918_s15 + $0x2a8] sm:$0xff] (%p2456_p6) }
 0x78f   : > { %4145 = vmatpush3.msra.mxu0 %v5405_v35  ;;  %4212 = vmatprep.subr.mxu1 (%p2456_p6), %v4877_v60  ;;  %v3389_v35 = vld [vmem:[%s5918_s15 + $0x1e8] sm:$0xff] (%p2456_p6) }
 0x790   : > { %4147 = vmatmul.mubr.f32.vlgmr.msra.gmra.mxu0 %v2462_v2  ;;  %4149 = vmatprep.subr.mxu0 (%p2456_p6), %v4877_v60  ;;  %v3380_v2 = vld [vmem:[%s5918_s15 + $0x1a0] sm:$0xff] (%p2456_p6) }
 0x791   :  { %4150 = vmatpush3.msra.mxu0 (%p2456_p6), %v3359_v58  ;;  %4213 = vmatpush3.msra.mxu1 (%p2456_p6), %v2544_v43  ;;  %v3360_v58 = vld [vmem:[%s5918_s15 + $0x100] sm:$0xff] (%p2456_p6) }
 0x792   :  { %4151 = vmatprep.subr.mxu0 (%p2456_p6), %v4877_v60  ;;  %4181 = vmatprep.mubr.msk.f32.mxu0 (%p2456_p6), %vm4878_vm9, %v4877_v60  ;;  %v3412_v43 = vld [vmem:[%s5918_s15 + $0x2a0] sm:$0xff] (%p2456_p6) }
 0x793   :  { %4152 = vmatpush3.msra.mxu0 (%p2456_p6), %v3358_v61  ;;  %4214 = vmatprep.subr.mxu1 (%p2456_p6), %v4877_v60 }
 0x794   :  { %4153 = vmatprep.subr.mxu0 (%p2456_p6), %v4877_v60  ;;  %4215 = vmatpush3.msra.mxu1 (%p2456_p6), %v2543_v28  ;;  %v3393_v28 = vld [vmem:[%s5918_s15 + $0x208] sm:$0xff] (%p2456_p6) }
 0x795   :  { %4154 = vmatpush3.msra.mxu0 (%p2456_p6), %v3357_v63  ;;  %4216 = vmatprep.mubr.msk.f32.mxu1 (%p2456_p6), %vm4878_vm9, %v4877_v60  ;;  %v3407_v63 = vld [vmem:[%s5918_s15 + $0x278] sm:$0xff] (%p2456_p6) }
 0x796   :  { %4155 = vmatprep.subr.mxu0 (%p2456_p6), %v4877_v60  ;;  %4254 = vmatprep.subr.mxu1 (%p2456_p6), %v4877_v60 }
 0x797   :  { %4156 = vmatpush3.msra.mxu0 (%p2456_p6), %v3356_v1  ;;  %v3406_v1 = vld [vmem:[%s5918_s15 + $0x270] sm:$0xff] (%p2456_p6) }
 0x798   :  { %4157 = vmatprep.subr.mxu0 (%p2456_p6), %v4877_v60 }
 0x799   :  { %4158 = vmatpush3.msra.mxu0 (%p2456_p6), %v3355_v4  ;;  %v3405_v4 = vld [vmem:[%s5918_s15 + $0x268] sm:$0xff] (%p2456_p6) }
 0x79a   :  { %4159 = vmatprep.subr.mxu0 (%p2456_p6), %v4877_v60 }
 0x79b   :  { %4160 = vmatpush3.msra.mxu0 (%p2456_p6), %v3354_v8  ;;  %v3404_v8 = vld [vmem:[%s5918_s15 + $0x260] sm:$0xff] (%p2456_p6) }
 0x79c   :  { %4161 = vmatprep.subr.mxu0 (%p2456_p6), %v4877_v60 }
 0x79d   :  { %4162 = vmatpush3.msra.mxu0 (%p2456_p6), %v3353_v10  ;;  %v3403_v10 = vld [vmem:[%s5918_s15 + $0x258] sm:$0xff] (%p2456_p6) }
 0x79e   :  { %4163 = vmatprep.subr.mxu0 (%p2456_p6), %v4877_v60 }
 0x79f   :  { %4164 = vmatpush3.msra.mxu0 (%p2456_p6), %v3352_v12  ;;  %v3402_v12 = vld [vmem:[%s5918_s15 + $0x250] sm:$0xff] (%p2456_p6) }
 0x7a0   :  { %4165 = vmatprep.subr.mxu0 (%p2456_p6), %v4877_v60 }
 0x7a1   :  { %4166 = vmatpush3.msra.mxu0 (%p2456_p6), %v3351_v14  ;;  %v3401_v14 = vld [vmem:[%s5918_s15 + $0x248] sm:$0xff] (%p2456_p6) }
 0x7a2   :  { %4167 = vmatprep.subr.mxu0 (%p2456_p6), %v4877_v60 }
 0x7a3   :  { %4168 = vmatpush3.msra.mxu0 (%p2456_p6), %v3350_v16  ;;  %v3400_v16 = vld [vmem:[%s5918_s15 + $0x240] sm:$0xff] (%p2456_p6) }
 0x7a4   :  { %4169 = vmatprep.subr.mxu0 (%p2456_p6), %v4877_v60 }
 0x7a5   :  { %4170 = vmatpush3.msra.mxu0 (%p2456_p6), %v3349_v18  ;;  %v3399_v18 = vld [vmem:[%s5918_s15 + $0x238] sm:$0xff] (%p2456_p6) }
 0x7a6   :  { %4171 = vmatprep.subr.mxu0 (%p2456_p6), %v4877_v60 }
 0x7a7   :  { %4172 = vmatpush3.msra.mxu0 (%p2456_p6), %v3348_v20  ;;  %v3398_v20 = vld [vmem:[%s5918_s15 + $0x230] sm:$0xff] (%p2456_p6) }
 0x7a8   :  { %4173 = vmatprep.subr.mxu0 (%p2456_p6), %v4877_v60 }
 0x7a9   :  { %4174 = vmatpush3.msra.mxu0 (%p2456_p6), %v3347_v23  ;;  %v3397_v23 = vld [vmem:[%s5918_s15 + $0x228] sm:$0xff] (%p2456_p6) }
 0x7aa   :  { %4175 = vmatprep.subr.mxu0 (%p2456_p6), %v4877_v60 }
 0x7ab   :  { %4176 = vmatpush3.msra.mxu0 (%p2456_p6), %v3346_v25  ;;  %v3396_v25 = vld [vmem:[%s5918_s15 + $0x220] sm:$0xff] (%p2456_p6) }
 0x7ac   :  { %4177 = vmatprep.subr.mxu0 (%p2456_p6), %v4877_v60 }
 0x7ad   :  { %4178 = vmatpush3.msra.mxu0 (%p2456_p6), %v3345_v42  ;;  %v3395_v42 = vld [vmem:[%s5918_s15 + $0x218] sm:$0xff] (%p2456_p6) }
 0x7ae   :  { %4179 = vmatprep.subr.mxu0 (%p2456_p6), %v4877_v60 }
 0x7af   :  { %4180 = vmatpush3.msra.mxu0 (%p2456_p6), %v3344_v44  ;;  %v3394_v44 = vld [vmem:[%s5918_s15 + $0x210] sm:$0xff] (%p2456_p6) }
 0x7b0   :  { %4219 = vmatprep.subr.mxu0 (%p2456_p6), %v4877_v60 }
 0x850   : > { %v2535_v5 = vpop.f32.mrf.mxu0 }
 0x851   : > { %v2536_v6 = vadd.f32 %v3343_v55, %v2535_v5  ;;  %2458 = sbr.rel (!%p2456_p6) target bundleno = 1903 (0x76f), region = 302  ;;  %v3381_v55 = vld [vmem:[%s5918_s15 + $0x1a8] sm:$0xff] (%p2456_p6)  ;;  %v3362_v5 = vld [vmem:[%s5918_s15 + $0x110] sm:$0xff] (%p2456_p6) }
 0x852   : > { %v4148_v21 = vpop.f32.mrf.mxu0 }
 0x853   : > { %v2539_v57 = vmax.f32 %v2536_v6, 0.0  ;;  %v3379_v6 = vld [vmem:[%s5918_s15 + $0x198] sm:$0xff] (%p2456_p6)  ;;  %v3361_v21 = vld [vmem:[%s5918_s15 + $0x108] sm:$0xff] (%p2456_p6) }
 0x855   : > { %2541 = vst [vmem:[%s2540_s3] sm:$0xff] %v2539_v57  ;;  %v3378_v57 = vld [vmem:[%s5918_s15 + $0x190] sm:$0xff] (%p2456_p6) }
 0x85c   :  { %v2560_v45 = vld [vmem:[#allocation8 + $0x8] sm:$0xff]  ;;  %v2542_v46 = vld [vmem:[#allocation8] sm:$0xff]  ;;  %v2719_v61 = vld [vmem:[#allocation8 + $0x10] sm:$0xff] }
 0x85d   :  { %4182 = vmatmul.mubr.f32.vlgmr.msra.gmra.mxu0 %v2560_v45  ;;  %4217 = vmatmul.mubr.f32.vlgmr.msra.gmra.mxu1 %v2542_v46  ;;  %v2809_v0 = vld [vmem:[#allocation8 + $0x18] sm:$0xff]  ;;  %v3411_v45 = vld [vmem:[%s5918_s15 + $0x298] sm:$0xff] }
 0x85e   :  { %4220 = vmatpush3.msra.mxu0 %v3375_v30  ;;  %4255 = vmatpush3.msra.mxu1 %v3391_v29  ;;  %v3410_v46 = vld [vmem:[%s5918_s15 + $0x290] sm:$0xff]  ;;  %v3392_v30 = vld [vmem:[%s5918_s15 + $0x200] sm:$0xff]  ;;  %v2899_v29 = vld [vmem:[#allocation8 + $0x20] sm:$0xff] }
 0x85f   :  { %4221 = vmatprep.subr.mxu0 %v4877_v60  ;;  %4256 = vmatprep.subr.mxu1 %v4877_v60 }
 0x860   :  { %4222 = vmatpush3.msra.mxu0 %v3374_v26  ;;  %4257 = vmatpush3.msra.mxu1 %v3390_v31  ;;  %v3409_v26 = vld [vmem:[%s5918_s15 + $0x288] sm:$0xff]  ;;  %v3439_v31 = vld [vmem:[%s5918_s15 + $0x378] sm:$0xff] }
 0x861   :  { %4223 = vmatprep.subr.mxu0 %v4877_v60  ;;  %4258 = vmatprep.subr.mxu1 %v4877_v60 }
 0x862   :  { %4224 = vmatpush3.msra.mxu0 %v3373_v27  ;;  %4259 = vmatpush3.msra.mxu1 %v3389_v35  ;;  %v3408_v27 = vld [vmem:[%s5918_s15 + $0x280] sm:$0xff]  ;;  %v3438_v35 = vld [vmem:[%s5918_s15 + $0x370] sm:$0xff] }
 0x863   :  { %4225 = vmatprep.subr.mxu0 %v4877_v60  ;;  %4260 = vmatprep.subr.mxu1 %v4877_v60 }
 0x864   :  { %4226 = vmatpush3.msra.mxu0 %v3372_v32  ;;  %4261 = vmatpush3.msra.mxu1 %v3388_v37  ;;  %v2989_v32 = vld [vmem:[#allocation8 + $0x28] sm:$0xff] }
 0x865   :  { %4227 = vmatprep.subr.mxu0 %v4877_v60  ;;  %4262 = vmatprep.subr.mxu1 %v4877_v60  ;;  %v3436_v37 = vld [vmem:[%s5918_s15 + $0x360] sm:$0xff] }
 0x866   :  { %4228 = vmatpush3.msra.mxu0 %v3371_v34  ;;  %4263 = vmatpush3.msra.mxu1 %v3387_v39  ;;  %v3437_v34 = vld [vmem:[%s5918_s15 + $0x368] sm:$0xff]  ;;  %v3434_v39 = vld [vmem:[%s5918_s15 + $0x350] sm:$0xff] }
 0x867   :  { %4229 = vmatprep.subr.mxu0 %v4877_v60  ;;  %4264 = vmatprep.subr.mxu1 %v4877_v60 }
 0x868   :  { %4230 = vmatpush3.msra.mxu0 %v3370_v38  ;;  %4265 = vmatpush3.msra.mxu1 %v3386_v33  ;;  %v3435_v38 = vld [vmem:[%s5918_s15 + $0x358] sm:$0xff]  ;;  %v3432_v33 = vld [vmem:[%s5918_s15 + $0x340] sm:$0xff] }
 0x869   :  { %4231 = vmatprep.subr.mxu0 %v4877_v60  ;;  %4266 = vmatprep.subr.mxu1 %v4877_v60 }
 0x86a   :  { %4232 = vmatpush3.msra.mxu0 %v3369_v40  ;;  %4267 = vmatpush3.msra.mxu1 %v3385_v48  ;;  %v3433_v40 = vld [vmem:[%s5918_s15 + $0x348] sm:$0xff]  ;;  %v3430_v48 = vld [vmem:[%s5918_s15 + $0x330] sm:$0xff] }
 0x86b   :  { %4233 = vmatprep.subr.mxu0 %v4877_v60  ;;  %4268 = vmatprep.subr.mxu1 %v4877_v60 }
 0x86c   :  { %4234 = vmatpush3.msra.mxu0 %v3368_v47  ;;  %4269 = vmatpush3.msra.mxu1 %v3384_v50  ;;  %v3431_v47 = vld [vmem:[%s5918_s15 + $0x338] sm:$0xff]  ;;  %v3428_v50 = vld [vmem:[%s5918_s15 + $0x320] sm:$0xff] }
 0x86d   :  { %4235 = vmatprep.subr.mxu0 %v4877_v60  ;;  %4270 = vmatprep.subr.mxu1 %v4877_v60 }
 0x86e   :  { %4236 = vmatpush3.msra.mxu0 %v3367_v49  ;;  %4271 = vmatpush3.msra.mxu1 %v3383_v52  ;;  %v3429_v49 = vld [vmem:[%s5918_s15 + $0x328] sm:$0xff]  ;;  %v3426_v52 = vld [vmem:[%s5918_s15 + $0x310] sm:$0xff] }
 0x86f   :  { %4237 = vmatprep.subr.mxu0 %v4877_v60  ;;  %4272 = vmatprep.subr.mxu1 %v4877_v60 }
 0x870   :  { %4238 = vmatpush3.msra.mxu0 %v3366_v51  ;;  %4273 = vmatpush3.msra.mxu1 %v3382_v53  ;;  %v3427_v51 = vld [vmem:[%s5918_s15 + $0x318] sm:$0xff]  ;;  %v3424_v53 = vld [vmem:[%s5918_s15 + $0x300] sm:$0xff] }
 0x871   :  { %4239 = vmatprep.subr.mxu0 %v4877_v60  ;;  %4274 = vmatprep.subr.mxu1 %v4877_v60 }
 0x872   :  { %4240 = vmatpush3.msra.mxu0 %v3365_v36  ;;  %4275 = vmatpush3.msra.mxu1 %v3381_v55  ;;  %v3425_v36 = vld [vmem:[%s5918_s15 + $0x308] sm:$0xff] }
 0x873   :  { %4241 = vmatprep.subr.mxu0 %v4877_v60  ;;  %4276 = vmatprep.subr.mxu1 %v4877_v60 }
 0x874   :  { %4242 = vmatpush3.msra.mxu0 %v3364_v54  ;;  %4277 = vmatpush3.msra.mxu1 %v3380_v2  ;;  %v3079_v54 = vld [vmem:[#allocation8 + $0x30] sm:$0xff] }
 0x875   :  { %4243 = vmatprep.subr.mxu0 %v4877_v60  ;;  %4278 = vmatprep.subr.mxu1 %v4877_v60 }
 0x876   :  { %4244 = vmatpush3.msra.mxu0 %v3363_v56  ;;  %4279 = vmatpush3.msra.mxu1 %v3379_v6 }
 0x877   :  { %4245 = vmatprep.subr.mxu0 %v4877_v60  ;;  %4280 = vmatprep.subr.mxu1 %v4877_v60 }
 0x878   :  { %4246 = vmatpush3.msra.mxu0 %v3362_v5  ;;  %4281 = vmatpush3.msra.mxu1 %v3378_v57 }
 0x879   :  { %4247 = vmatprep.subr.mxu0 %v4877_v60  ;;  %4282 = vmatprep.subr.mxu1 %v4877_v60 }
 0x87a   :  { %4248 = vmatpush3.msra.mxu0 %v3361_v21  ;;  %4251 = vmatprep.mubr.msk.f32.mxu0 %vm4878_vm9, %v4877_v60 }
 0x87b   :  { %4249 = vmatprep.subr.mxu0 %v4877_v60  ;;  %4283 = vmatpush3.msra.mxu1 %v3377_v59 }
 0x87c   :  { %4250 = vmatpush3.msra.mxu0 %v3360_v58  ;;  %4284 = vmatprep.subr.mxu1 %v4877_v60 }
 0x87d   :  { %4252 = vmatmul.mubr.f32.vlgmr.msra.gmra.mxu0 %v2719_v61  ;;  %4289 = vmatprep.subr.mxu0 %v4877_v60 }
 0x87e   :  { %4285 = vmatpush3.msra.mxu1 %v3376_v62  ;;  %4286 = vmatprep.mubr.msk.f32.mxu1 %vm4878_vm9, %v4877_v60 }
 0x87f   :  { %4290 = vmatpush3.msra.mxu0 %v3407_v63  ;;  %4287 = vmatmul.mubr.f32.vlgmr.msra.gmra.mxu1 %v2809_v0 }
 0x880   :  { %4291 = vmatprep.subr.mxu0 %v4877_v60  ;;  %4324 = vmatprep.subr.mxu1 %v4877_v60 }
 0x881   :  { %4292 = vmatpush3.msra.mxu0 %v3406_v1  ;;  %4325 = vmatpush3.msra.mxu1 %v3423_v3 }
 0x882   :  { %4293 = vmatprep.subr.mxu0 %v4877_v60  ;;  %4326 = vmatprep.subr.mxu1 %v4877_v60 }
 0x883   :  { %4294 = vmatpush3.msra.mxu0 %v3405_v4  ;;  %4327 = vmatpush3.msra.mxu1 %v3422_v7 }
 0x884   :  { %4295 = vmatprep.subr.mxu0 %v4877_v60  ;;  %4328 = vmatprep.subr.mxu1 %v4877_v60 }
 0x885   :  { %4296 = vmatpush3.msra.mxu0 %v3404_v8  ;;  %4329 = vmatpush3.msra.mxu1 %v3421_v9 }
 0x886   :  { %4297 = vmatprep.subr.mxu0 %v4877_v60  ;;  %4330 = vmatprep.subr.mxu1 %v4877_v60 }
 0x887   :  { %4298 = vmatpush3.msra.mxu0 %v3403_v10  ;;  %4331 = vmatpush3.msra.mxu1 %v3420_v11 }
 0x888   :  { %4299 = vmatprep.subr.mxu0 %v4877_v60  ;;  %4332 = vmatprep.subr.mxu1 %v4877_v60 }
 0x889   :  { %4300 = vmatpush3.msra.mxu0 %v3402_v12  ;;  %4333 = vmatpush3.msra.mxu1 %v3419_v13 }
 0x88a   :  { %4301 = vmatprep.subr.mxu0 %v4877_v60  ;;  %4334 = vmatprep.subr.mxu1 %v4877_v60 }
 0x88b   :  { %4302 = vmatpush3.msra.mxu0 %v3401_v14  ;;  %4335 = vmatpush3.msra.mxu1 %v3418_v15 }
 0x88c   :  { %4303 = vmatprep.subr.mxu0 %v4877_v60  ;;  %4336 = vmatprep.subr.mxu1 %v4877_v60 }
 0x88d   :  { %4304 = vmatpush3.msra.mxu0 %v3400_v16  ;;  %4337 = vmatpush3.msra.mxu1 %v3417_v17 }
 0x88e   :  { %4305 = vmatprep.subr.mxu0 %v4877_v60  ;;  %4338 = vmatprep.subr.mxu1 %v4877_v60 }
 0x88f   :  { %4306 = vmatpush3.msra.mxu0 %v3399_v18  ;;  %4339 = vmatpush3.msra.mxu1 %v3416_v19 }
 0x890   :  { %4307 = vmatprep.subr.mxu0 %v4877_v60  ;;  %4340 = vmatprep.subr.mxu1 %v4877_v60 }
 0x891   :  { %4308 = vmatpush3.msra.mxu0 %v3398_v20  ;;  %4341 = vmatpush3.msra.mxu1 %v3415_v22 }
 0x892   :  { %4309 = vmatprep.subr.mxu0 %v4877_v60  ;;  %4342 = vmatprep.subr.mxu1 %v4877_v60 }
 0x893   :  { %4310 = vmatpush3.msra.mxu0 %v3397_v23  ;;  %4343 = vmatpush3.msra.mxu1 %v3414_v24 }
 0x894   :  { %4311 = vmatprep.subr.mxu0 %v4877_v60  ;;  %4344 = vmatprep.subr.mxu1 %v4877_v60 }
 0x895   :  { %4312 = vmatpush3.msra.mxu0 %v3396_v25  ;;  %4345 = vmatpush3.msra.mxu1 %v3413_v41 }
 0x896   :  { %4313 = vmatprep.subr.mxu0 %v4877_v60  ;;  %4346 = vmatprep.subr.mxu1 %v4877_v60 }
 0x897   :  { %4314 = vmatpush3.msra.mxu0 %v3395_v42  ;;  %4347 = vmatpush3.msra.mxu1 %v3412_v43 }
 0x898   :  { %4315 = vmatprep.subr.mxu0 %v4877_v60  ;;  %4348 = vmatprep.subr.mxu1 %v4877_v60 }
 0x899   :  { %4316 = vmatpush3.msra.mxu0 %v3394_v44  ;;  %4349 = vmatpush3.msra.mxu1 %v3411_v45 }
 0x89a   :  { %4317 = vmatprep.subr.mxu0 %v4877_v60  ;;  %4350 = vmatprep.subr.mxu1 %v4877_v60 }
 0x89b   :  { %4318 = vmatpush3.msra.mxu0 %v3393_v28  ;;  %4351 = vmatpush3.msra.mxu1 %v3410_v46 }
 0x89c   :  { %4319 = vmatprep.subr.mxu0 %v4877_v60  ;;  %4352 = vmatprep.subr.mxu1 %v4877_v60 }
 0x89d   :  { %4320 = vmatpush3.msra.mxu0 %v3392_v30  ;;  %4321 = vmatprep.mubr.msk.f32.mxu0 %vm4878_vm9, %v4877_v60 }
 0x89e   :  { %4353 = vmatpush3.msra.mxu1 %v3409_v26  ;;  %4322 = vmatmul.mubr.f32.vlgmr.msra.gmra.mxu0 %v2899_v29 }
 0x89f   :  { %4354 = vmatprep.subr.mxu1 %v4877_v60  ;;  %4359 = vmatprep.subr.mxu0 %v4877_v60 }
 0x8a0   :  { %4355 = vmatpush3.msra.mxu1 %v3408_v27  ;;  %4356 = vmatprep.mubr.msk.f32.mxu1 %vm4878_vm9, %v4877_v60 }
 0x8a1   :  { %4360 = vmatpush3.msra.mxu0 %v3439_v31  ;;  %4357 = vmatmul.mubr.f32.vlgmr.msra.gmra.mxu1 %v2989_v32 }
 0x8a2   :  { %4361 = vmatprep.subr.mxu0 %v4877_v60  ;;  %4391 = vmatprep.mubr.msk.f32.mxu0 %vm4878_vm9, %v4877_v60 }
 0x8a3   :  { %4362 = vmatpush3.msra.mxu0 %v3438_v35 }
 0x8a4   :  { %4363 = vmatprep.subr.mxu0 %v4877_v60 }
 0x8a5   :  { %4364 = vmatpush3.msra.mxu0 %v3437_v34 }
 0x8a6   :  { %4365 = vmatprep.subr.mxu0 %v4877_v60 }
 0x8a7   :  { %4366 = vmatpush3.msra.mxu0 %v3436_v37 }
 0x8a8   :  { %4367 = vmatprep.subr.mxu0 %v4877_v60 }
 0x8a9   :  { %4368 = vmatpush3.msra.mxu0 %v3435_v38 }
 0x8aa   :  { %4369 = vmatprep.subr.mxu0 %v4877_v60 }
 0x8ab   :  { %4370 = vmatpush3.msra.mxu0 %v3434_v39 }
 0x8ac   :  { %4371 = vmatprep.subr.mxu0 %v4877_v60 }
 0x8ad   :  { %4372 = vmatpush3.msra.mxu0 %v3433_v40 }
 0x8ae   :  { %4373 = vmatprep.subr.mxu0 %v4877_v60 }
 0x8af   :  { %4374 = vmatpush3.msra.mxu0 %v3432_v33 }
 0x8b0   :  { %4375 = vmatprep.subr.mxu0 %v4877_v60 }
 0x8b1   :  { %4376 = vmatpush3.msra.mxu0 %v3431_v47 }
 0x8b2   :  { %4377 = vmatprep.subr.mxu0 %v4877_v60 }
 0x8b3   :  { %4378 = vmatpush3.msra.mxu0 %v3430_v48 }
 0x8b4   :  { %4379 = vmatprep.subr.mxu0 %v4877_v60 }
 0x8b5   :  { %4380 = vmatpush3.msra.mxu0 %v3429_v49 }
 0x8b6   :  { %4381 = vmatprep.subr.mxu0 %v4877_v60 }
 0x8b7   :  { %4382 = vmatpush3.msra.mxu0 %v3428_v50 }
 0x8b8   :  { %4383 = vmatprep.subr.mxu0 %v4877_v60 }
 0x8b9   :  { %4384 = vmatpush3.msra.mxu0 %v3427_v51 }
 0x8ba   :  { %4385 = vmatprep.subr.mxu0 %v4877_v60 }
 0x8bb   :  { %4386 = vmatpush3.msra.mxu0 %v3426_v52 }
 0x8bc   :  { %4387 = vmatprep.subr.mxu0 %v4877_v60 }
 0x8bd   :  { %4388 = vmatpush3.msra.mxu0 %v3425_v36 }
 0x8be   :  { %4389 = vmatprep.subr.mxu0 %v4877_v60 }
 0x8bf   :  { %4390 = vmatpush3.msra.mxu0 %v3424_v53 }
 0x8c0   :  { %4392 = vmatmul.mubr.f32.vlgmr.msra.gmra.mxu0 %v3079_v54 }
 0x91d   :  { %v2644_v55 = vpop.f32.mrf.mxu0  ;;  %v2714_v56 = vpop.f32.mrf.mxu1 }
 0x91e   :  { %v2715_v5 = vadd.f32 %v2714_v56, %v2644_v55 }
 0x91f   :  { %v4183_v2 = vpop.f32.mrf.mxu0  ;;  %v4218_v6 = vpop.f32.mrf.mxu1 }
 0x93d   :  { %v2803_v21 = vpop.f32.mrf.mxu0 }
 0x93e   :  { %v2807_v1 = vadd.f32 %v2803_v21, %v2715_v5 }
 0x93f   :  { %v4253_v57 = vpop.f32.mrf.mxu0  ;;  %v2893_v58 = vpop.f32.mrf.mxu1 }
 0x940   :  { %v2897_v3 = vadd.f32 %v2893_v58, %v2807_v1 }
 0x941   :  { %v4288_v59 = vpop.f32.mrf.mxu1 }
 0x95e   :  { %v2983_v61 = vpop.f32.mrf.mxu0 }
 0x95f   :  { %v2987_v4 = vadd.f32 %v2983_v61, %v2897_v3 }
 0x960   :  { %v4323_v62 = vpop.f32.mrf.mxu0 }
 0x961   :  { %v3073_v63 = vpop.f32.mrf.mxu1 }
 0x962   :  { %v3077_v7 = vadd.f32 %v3073_v63, %v2987_v4 }
 0x963   :  { %v4358_v0 = vpop.f32.mrf.mxu1 }
 0x980   :  { %v3163_v60 = vpop.f32.mrf.mxu0 }
 0x981   :  { %v3167_v8 = vadd.f32 %v3163_v60, %v3077_v7 }
 0x982   :  { %v4393_v9 = vpop.f32.mrf.mxu0 }
 0x983   :  { %v3169_v10 = vsel %vm3168_vm10, %v3167_v8, -inf }
 0x984   :  { %3170 = vmax.xlane.f32.xlu0 %v3169_v10 }
 0xa0d   :  { %v3171_v11 = vpop.xlane.xlu0 %3170 }
 0xa0e   :  { %v3172_v12 = vsub.f32 %v3167_v8, %v3171_v11 }
 0xa10   :  { %v3173_v13 = vmul.f32 1.442695, %v3172_v12 }
 0xa12   :  { %4489 = vpow2.f32 %v3173_v13 }
 0xa1f   :  { %v4490_v14 = vpop.eup %4489 }
 0xa20   :  { %v3175_v15 = vsel %vm3168_vm10, %v4490_v14, 0.0 }
 0xa21   :  { %3176 = vadd.xlane.f32.xlu0 %v3175_v15 }
 0xaaa   :  { %v3177_v16 = vpop.xlane.xlu0 %3176 }
 0xaab   :  { %4491 = vlog2.f32 %v3177_v16 }
 0xab8   :  { %v4492_v17 = vpop.eup %4491 }
 0xab9   :  { %v3179_v18 = vmul.f32 0.6931472, %v4492_v17 }
 0xabb   :  { %v3180_v19 = vsub.f32 %v3172_v12, %v3179_v18 }
 0xabd   :  { %3181 = vst.msk [vmem:[%s5919_s16] sm:$0xff] %vm3168_vm10, %v3180_v19 }
 0xabe   :  { %3186 = vsyncpa [#allocation10], 1 }
 0xabf   :  { %3187 = vsyncpa [#allocation12], 1 }
 0xac0   :  { %3188 = vsyncpa [#allocation15], 1 }
 0xac1   :  { %3189 = vsyncpa [#allocation18], 1 }
 0xac2   :  { %3190 = vsyncpa [#allocation21], 1 }
 0xac3   :  { %3191 = vsyncpa [#allocation24], 1 }
 0xac4   :  { %3192 = vsyncpa [#allocation27], 1 }
 0xac5   :  { %3193 = vsyncpa [#allocation30], 1 }

</bundles_post_ra>
